<compile_context>
chip_gen: v7x
topology: tpu7x:2x2x1
jax: 0.10.0
libtpu: 0.0.40
codegen_flags: <defaults>
</compile_context>

<pallas_src>
import functools

import jax
import jax.numpy as jnp
import numpy as np
from jax.experimental import pallas as pl
from jax.experimental.pallas import tpu as pltpu


# ------------- shared RK5 combination (used by kernel AND reference) --------
def _rk5_combine(f, x, h90):
    """Classic RK5 stage combination; h90 == h / 90 (precomputed)."""
    k1 = f(x)
    k2 = f(x + k1 * 0.25)
    k3 = f(x + k1 * 0.125 + k2 * 0.125)
    k4 = f(x - k1 * 0.5 + k3)
    k5 = f(x + k1 * 0.1875 + k4 * 0.5625)                    # 3/16, 9/16
    k6 = f(x + k1 * (-3.0 / 7.0) + k2 * (2.0 / 7.0) + k3 * (12.0 / 7.0)
             + k4 * (-12.0 / 7.0) + k5 * (8.0 / 7.0))
    return x + h90 * (7.0 * k1 + 32.0 * k3 + 12.0 * k4 + 32.0 * k5 + 7.0 * k6)


# --------------------------------- kernel -----------------------------------
def _rk5_kernel(n_lin, *refs):
    """refs = (h90_smem, xT, W0..W{n-1}, b0..b{n-1}, outT).

    xT / outT tiles are [D, bn] (feature-major, batch on lanes); weights are
    [out, in]; biases are [out, 1] and broadcast across the lane (batch) axis.
    """
    h_ref = refs[0]
    x_ref = refs[1]
    w_refs = refs[2:2 + n_lin]
    b_refs = refs[2 + n_lin:2 + 2 * n_lin]
    o_ref = refs[-1]

    # Hoist weight/bias loads out of the 6x-unrolled f().
    w_vals = [w[...] for w in w_refs]
    b_vals = [b[...] for b in b_refs]

    def f(z):
        # net = Sequential(tanh, Linear, tanh, Linear, ..., Linear):
        # activation BEFORE every Linear, none after the last one.
        for w, b in zip(w_vals, b_vals):
            z = jnp.tanh(z)
            z = jnp.dot(w, z, preferred_element_type=jnp.float32) + b
        return z

    x = x_ref[...]
    h90 = h_ref[0, 0]                       # h / 90, precomputed on host
    o_ref[...] = _rk5_combine(f, x, h90)


def rk5_forward(x, t, h, weights, biases, *, bn=256):
    """One RK5 step.  `t` is unused (matches PyTorch: time_lag='uniform').

    x:       [B, D]  float32
    weights: list of [out_i, in_i]  (original PyTorch Linear layout)
    biases:  list of [out_i, 1]
    """
    del t
    B, D = x.shape
    n_lin = len(weights)

    # Lane-dense feature-major layout: batch on the 128-wide lane axis.
    bn = max(128, int(bn))
    B_pad = -(-B // bn) * bn                # ceil to multiple of bn
    xT = x.T
    if B_pad != B:
        xT = jnp.pad(xT, ((0, 0), (0, B_pad - B)))

    h90 = jnp.array([[float(h) / 90.0]], dtype=jnp.float32)

    in_specs = [
        pl.BlockSpec(memory_space=pltpu.SMEM),                # scalar h/90
        pl.BlockSpec((D, bn), lambda i: (0, i)),               # xT tile
    ]
    for w in weights:
        in_specs.append(pl.BlockSpec(w.shape, lambda i: (0, 0)))   # resident
    for b in biases:
        in_specs.append(pl.BlockSpec(b.shape, lambda i: (0, 0)))   # resident

    kernel = functools.partial(_rk5_kernel, n_lin)
    outT = pl.pallas_call(
        kernel,
        out_shape=jax.ShapeDtypeStruct((D, B_pad), jnp.float32),
        grid=(pl.cdiv(B_pad, bn),),
        in_specs=in_specs,
        out_specs=pl.BlockSpec((D, bn), lambda i: (0, i)),
        compiler_params=pltpu.CompilerParams(
            dimension_semantics=("parallel",)),
    )(h90, xT, *weights, *biases)
    return outT[:, :B].T


# ---------------- pure-JAX reference (mirrors the PyTorch module) -----------
def _mlp_ref(z, weights, biases):
    for w, b in zip(weights, biases):
        z = jnp.tanh(z)
        # HIGHEST precision: keep the f32 reference honest on TPU (default
        # precision would run bf16 matmul passes and drift by ~1e-3).
        z = jnp.dot(z, w.T, precision=jax.lax.Precision.HIGHEST) + b[:, 0]
    return z


def _rk5_ref(x, h, weights, biases):
    f = lambda z: _mlp_ref(z, weights, biases)
    h90 = jnp.float32(float(h) / 90.0)
    return _rk5_combine(f, x, h90)


if __name__ == "__main__":
    # layers must have layers[0] == layers[-1] for the RK update to typecheck.
    layers = [32, 64, 64, 32]
    B = 512            # 2 tiles of bn=256 -> 2 parallel grid steps
    h = 0.1
    t = 0.0            # ignored (time_lag='uniform')

    key = jax.random.PRNGKey(0)
    keys = jax.random.split(key, 2 * len(layers) + 1)
    x = jax.random.normal(keys[0], (B, layers[0]), dtype=jnp.float32)

    # Weights in original PyTorch [out, in] layout (nn.init.normal_(w, 0, 1));
    # biases [out, 1] (the module zero-inits them; small random values here
    # exercise the bias-add path — identical params feed kernel and reference).
    weights, biases = [], []
    for i in range(len(layers) - 1):
        w = jax.random.normal(keys[2 * i + 1], (layers[i + 1], layers[i]),
                              dtype=jnp.float32)
        b = 0.1 * jax.random.normal(keys[2 * i + 2], (layers[i + 1], 1),
                                    dtype=jnp.float32)
        weights.append(w)
        biases.append(b)

    out = rk5_forward(x, t, h, weights, biases, bn=256)
    out = jax.block_until_ready(out)

    ref = _rk5_ref(x, h, weights, biases)
    # f32 tolerance: both sides run f32 math; residual differences come only
    # from MXU pass count / tanh implementation inside vs outside Mosaic.
    np.testing.assert_allclose(np.asarray(out), np.asarray(ref),
                               rtol=2e-3, atol=2e-3)
    print("KERNEL_OK")
</pallas_src>

<mosaic_0001>
module attributes {stable_mosaic.version = 11 : i64} {
  func.func @_rk5_kernel(%arg0: i32, %arg1: memref<1x1xf32, #tpu.memory_space<smem>>, %arg2: memref<32x256xf32, #tpu.memory_space<vmem>>, %arg3: memref<64x32xf32, #tpu.memory_space<vmem>>, %arg4: memref<64x64xf32, #tpu.memory_space<vmem>>, %arg5: memref<32x64xf32, #tpu.memory_space<vmem>>, %arg6: memref<64x1xf32, #tpu.memory_space<vmem>>, %arg7: memref<64x1xf32, #tpu.memory_space<vmem>>, %arg8: memref<32x1xf32, #tpu.memory_space<vmem>>, %arg9: memref<32x256xf32, #tpu.memory_space<vmem>>) attributes {dimension_semantics = [#tpu.dimension_semantics<parallel>], iteration_bounds = array<i64: 2>, scalar_prefetch = 0 : i64, scratch_operands = 0 : i64, tpu.core_type = #tpu.core_type<tc>, window_params = [{transform_indices = @transform_0, window_bounds = array<i64: 1, 1>}, {transform_indices = @transform_1, window_bounds = array<i64: 32, 256>}, {pipeline_mode = #tpu.pipeline_mode<synchronous>, transform_indices = @transform_2, window_bounds = array<i64: 64, 32>}, {pipeline_mode = #tpu.pipeline_mode<synchronous>, transform_indices = @transform_3, window_bounds = array<i64: 64, 64>}, {pipeline_mode = #tpu.pipeline_mode<synchronous>, transform_indices = @transform_4, window_bounds = array<i64: 32, 64>}, {pipeline_mode = #tpu.pipeline_mode<synchronous>, transform_indices = @transform_5, window_bounds = array<i64: 64, 1>}, {pipeline_mode = #tpu.pipeline_mode<synchronous>, transform_indices = @transform_6, window_bounds = array<i64: 64, 1>}, {pipeline_mode = #tpu.pipeline_mode<synchronous>, transform_indices = @transform_7, window_bounds = array<i64: 32, 1>}, {transform_indices = @transform_8, window_bounds = array<i64: 32, 256>}]} {
    %c0 = arith.constant 0 : index
    %c0_0 = arith.constant 0 : index
    %0 = vector.load %arg3[%c0, %c0_0] : memref<64x32xf32, #tpu.memory_space<vmem>>, vector<64x32xf32>
    %c0_1 = arith.constant 0 : index
    %c0_2 = arith.constant 0 : index
    %1 = vector.load %arg4[%c0_1, %c0_2] : memref<64x64xf32, #tpu.memory_space<vmem>>, vector<64x64xf32>
    %c0_3 = arith.constant 0 : index
    %c0_4 = arith.constant 0 : index
    %2 = vector.load %arg5[%c0_3, %c0_4] : memref<32x64xf32, #tpu.memory_space<vmem>>, vector<32x64xf32>
    %c0_5 = arith.constant 0 : index
    %c0_6 = arith.constant 0 : index
    %3 = vector.load %arg6[%c0_5, %c0_6] : memref<64x1xf32, #tpu.memory_space<vmem>>, vector<64x1xf32>
    %c0_7 = arith.constant 0 : index
    %c0_8 = arith.constant 0 : index
    %4 = vector.load %arg7[%c0_7, %c0_8] : memref<64x1xf32, #tpu.memory_space<vmem>>, vector<64x1xf32>
    %c0_9 = arith.constant 0 : index
    %c0_10 = arith.constant 0 : index
    %5 = vector.load %arg8[%c0_9, %c0_10] : memref<32x1xf32, #tpu.memory_space<vmem>>, vector<32x1xf32>
    %c0_11 = arith.constant 0 : index
    %c0_12 = arith.constant 0 : index
    %6 = vector.load %arg2[%c0_11, %c0_12] : memref<32x256xf32, #tpu.memory_space<vmem>>, vector<32x256xf32>
    %c0_13 = arith.constant 0 : index
    %c0_14 = arith.constant 0 : index
    %7 = memref.load %arg1[%c0_13, %c0_14] : memref<1x1xf32, #tpu.memory_space<smem>>
    %8 = math.tanh %6 : vector<32x256xf32>
    %cst = arith.constant dense<0.000000e+00> : vector<64x256xf32>
    %9 = tpu.matmul %0, %8, %cst {dimension_numbers = #tpu.dot_dimension_numbers<[1], [0], [0], [1], [0, 0, 1, 1], [], []>} : vector<64x32xf32>, vector<32x256xf32>, vector<64x256xf32> -> vector<64x256xf32>
    %10 = vector.broadcast %3 : vector<64x1xf32> to vector<64x256xf32>
    %11 = arith.addf %9, %10 : vector<64x256xf32>
    %12 = math.tanh %11 : vector<64x256xf32>
    %cst_15 = arith.constant dense<0.000000e+00> : vector<64x256xf32>
    %13 = tpu.matmul %1, %12, %cst_15 {dimension_numbers = #tpu.dot_dimension_numbers<[1], [0], [0], [1], [0, 0, 1, 1], [], []>} : vector<64x64xf32>, vector<64x256xf32>, vector<64x256xf32> -> vector<64x256xf32>
    %14 = vector.broadcast %4 : vector<64x1xf32> to vector<64x256xf32>
    %15 = arith.addf %13, %14 : vector<64x256xf32>
    %16 = math.tanh %15 : vector<64x256xf32>
    %cst_16 = arith.constant dense<0.000000e+00> : vector<32x256xf32>
    %17 = tpu.matmul %2, %16, %cst_16 {dimension_numbers = #tpu.dot_dimension_numbers<[1], [0], [0], [1], [0, 0, 1, 1], [], []>} : vector<32x64xf32>, vector<64x256xf32>, vector<32x256xf32> -> vector<32x256xf32>
    %18 = vector.broadcast %5 : vector<32x1xf32> to vector<32x256xf32>
    %19 = arith.addf %17, %18 : vector<32x256xf32>
    %cst_17 = arith.constant 2.500000e-01 : f32
    %20 = vector.broadcast %cst_17 : f32 to vector<32x256xf32>
    %21 = arith.mulf %19, %20 : vector<32x256xf32>
    %22 = arith.addf %6, %21 : vector<32x256xf32>
    %23 = math.tanh %22 : vector<32x256xf32>
    %cst_18 = arith.constant dense<0.000000e+00> : vector<64x256xf32>
    %24 = tpu.matmul %0, %23, %cst_18 {dimension_numbers = #tpu.dot_dimension_numbers<[1], [0], [0], [1], [0, 0, 1, 1], [], []>} : vector<64x32xf32>, vector<32x256xf32>, vector<64x256xf32> -> vector<64x256xf32>
    %25 = vector.broadcast %3 : vector<64x1xf32> to vector<64x256xf32>
    %26 = arith.addf %24, %25 : vector<64x256xf32>
    %27 = math.tanh %26 : vector<64x256xf32>
    %cst_19 = arith.constant dense<0.000000e+00> : vector<64x256xf32>
    %28 = tpu.matmul %1, %27, %cst_19 {dimension_numbers = #tpu.dot_dimension_numbers<[1], [0], [0], [1], [0, 0, 1, 1], [], []>} : vector<64x64xf32>, vector<64x256xf32>, vector<64x256xf32> -> vector<64x256xf32>
    %29 = vector.broadcast %4 : vector<64x1xf32> to vector<64x256xf32>
    %30 = arith.addf %28, %29 : vector<64x256xf32>
    %31 = math.tanh %30 : vector<64x256xf32>
    %cst_20 = arith.constant dense<0.000000e+00> : vector<32x256xf32>
    %32 = tpu.matmul %2, %31, %cst_20 {dimension_numbers = #tpu.dot_dimension_numbers<[1], [0], [0], [1], [0, 0, 1, 1], [], []>} : vector<32x64xf32>, vector<64x256xf32>, vector<32x256xf32> -> vector<32x256xf32>
    %33 = vector.broadcast %5 : vector<32x1xf32> to vector<32x256xf32>
    %34 = arith.addf %32, %33 : vector<32x256xf32>
    %cst_21 = arith.constant 1.250000e-01 : f32
    %35 = vector.broadcast %cst_21 : f32 to vector<32x256xf32>
    %36 = arith.mulf %19, %35 : vector<32x256xf32>
    %37 = arith.addf %6, %36 : vector<32x256xf32>
    %cst_22 = arith.constant 1.250000e-01 : f32
    %38 = vector.broadcast %cst_22 : f32 to vector<32x256xf32>
    %39 = arith.mulf %34, %38 : vector<32x256xf32>
    %40 = arith.addf %37, %39 : vector<32x256xf32>
    %41 = math.tanh %40 : vector<32x256xf32>
    %cst_23 = arith.constant dense<0.000000e+00> : vector<64x256xf32>
    %42 = tpu.matmul %0, %41, %cst_23 {dimension_numbers = #tpu.dot_dimension_numbers<[1], [0], [0], [1], [0, 0, 1, 1], [], []>} : vector<64x32xf32>, vector<32x256xf32>, vector<64x256xf32> -> vector<64x256xf32>
    %43 = vector.broadcast %3 : vector<64x1xf32> to vector<64x256xf32>
    %44 = arith.addf %42, %43 : vector<64x256xf32>
    %45 = math.tanh %44 : vector<64x256xf32>
    %cst_24 = arith.constant dense<0.000000e+00> : vector<64x256xf32>
    %46 = tpu.matmul %1, %45, %cst_24 {dimension_numbers = #tpu.dot_dimension_numbers<[1], [0], [0], [1], [0, 0, 1, 1], [], []>} : vector<64x64xf32>, vector<64x256xf32>, vector<64x256xf32> -> vector<64x256xf32>
    %47 = vector.broadcast %4 : vector<64x1xf32> to vector<64x256xf32>
    %48 = arith.addf %46, %47 : vector<64x256xf32>
    %49 = math.tanh %48 : vector<64x256xf32>
    %cst_25 = arith.constant dense<0.000000e+00> : vector<32x256xf32>
    %50 = tpu.matmul %2, %49, %cst_25 {dimension_numbers = #tpu.dot_dimension_numbers<[1], [0], [0], [1], [0, 0, 1, 1], [], []>} : vector<32x64xf32>, vector<64x256xf32>, vector<32x256xf32> -> vector<32x256xf32>
    %51 = vector.broadcast %5 : vector<32x1xf32> to vector<32x256xf32>
    %52 = arith.addf %50, %51 : vector<32x256xf32>
    %cst_26 = arith.constant 5.000000e-01 : f32
    %53 = vector.broadcast %cst_26 : f32 to vector<32x256xf32>
    %54 = arith.mulf %19, %53 : vector<32x256xf32>
    %55 = arith.subf %6, %54 : vector<32x256xf32>
    %56 = arith.addf %55, %52 : vector<32x256xf32>
    %57 = math.tanh %56 : vector<32x256xf32>
    %cst_27 = arith.constant dense<0.000000e+00> : vector<64x256xf32>
    %58 = tpu.matmul %0, %57, %cst_27 {dimension_numbers = #tpu.dot_dimension_numbers<[1], [0], [0], [1], [0, 0, 1, 1], [], []>} : vector<64x32xf32>, vector<32x256xf32>, vector<64x256xf32> -> vector<64x256xf32>
    %59 = vector.broadcast %3 : vector<64x1xf32> to vector<64x256xf32>
    %60 = arith.addf %58, %59 : vector<64x256xf32>
    %61 = math.tanh %60 : vector<64x256xf32>
    %cst_28 = arith.constant dense<0.000000e+00> : vector<64x256xf32>
    %62 = tpu.matmul %1, %61, %cst_28 {dimension_numbers = #tpu.dot_dimension_numbers<[1], [0], [0], [1], [0, 0, 1, 1], [], []>} : vector<64x64xf32>, vector<64x256xf32>, vector<64x256xf32> -> vector<64x256xf32>
    %63 = vector.broadcast %4 : vector<64x1xf32> to vector<64x256xf32>
    %64 = arith.addf %62, %63 : vector<64x256xf32>
    %65 = math.tanh %64 : vector<64x256xf32>
    %cst_29 = arith.constant dense<0.000000e+00> : vector<32x256xf32>
    %66 = tpu.matmul %2, %65, %cst_29 {dimension_numbers = #tpu.dot_dimension_numbers<[1], [0], [0], [1], [0, 0, 1, 1], [], []>} : vector<32x64xf32>, vector<64x256xf32>, vector<32x256xf32> -> vector<32x256xf32>
    %67 = vector.broadcast %5 : vector<32x1xf32> to vector<32x256xf32>
    %68 = arith.addf %66, %67 : vector<32x256xf32>
    %cst_30 = arith.constant 1.875000e-01 : f32
    %69 = vector.broadcast %cst_30 : f32 to vector<32x256xf32>
    %70 = arith.mulf %19, %69 : vector<32x256xf32>
    %71 = arith.addf %6, %70 : vector<32x256xf32>
    %cst_31 = arith.constant 5.625000e-01 : f32
    %72 = vector.broadcast %cst_31 : f32 to vector<32x256xf32>
    %73 = arith.mulf %68, %72 : vector<32x256xf32>
    %74 = arith.addf %71, %73 : vector<32x256xf32>
    %75 = math.tanh %74 : vector<32x256xf32>
    %cst_32 = arith.constant dense<0.000000e+00> : vector<64x256xf32>
    %76 = tpu.matmul %0, %75, %cst_32 {dimension_numbers = #tpu.dot_dimension_numbers<[1], [0], [0], [1], [0, 0, 1, 1], [], []>} : vector<64x32xf32>, vector<32x256xf32>, vector<64x256xf32> -> vector<64x256xf32>
    %77 = vector.broadcast %3 : vector<64x1xf32> to vector<64x256xf32>
    %78 = arith.addf %76, %77 : vector<64x256xf32>
    %79 = math.tanh %78 : vector<64x256xf32>
    %cst_33 = arith.constant dense<0.000000e+00> : vector<64x256xf32>
    %80 = tpu.matmul %1, %79, %cst_33 {dimension_numbers = #tpu.dot_dimension_numbers<[1], [0], [0], [1], [0, 0, 1, 1], [], []>} : vector<64x64xf32>, vector<64x256xf32>, vector<64x256xf32> -> vector<64x256xf32>
    %81 = vector.broadcast %4 : vector<64x1xf32> to vector<64x256xf32>
    %82 = arith.addf %80, %81 : vector<64x256xf32>
    %83 = math.tanh %82 : vector<64x256xf32>
    %cst_34 = arith.constant dense<0.000000e+00> : vector<32x256xf32>
    %84 = tpu.matmul %2, %83, %cst_34 {dimension_numbers = #tpu.dot_dimension_numbers<[1], [0], [0], [1], [0, 0, 1, 1], [], []>} : vector<32x64xf32>, vector<64x256xf32>, vector<32x256xf32> -> vector<32x256xf32>
    %85 = vector.broadcast %5 : vector<32x1xf32> to vector<32x256xf32>
    %86 = arith.addf %84, %85 : vector<32x256xf32>
    %cst_35 = arith.constant -0.428571433 : f32
    %87 = vector.broadcast %cst_35 : f32 to vector<32x256xf32>
    %88 = arith.mulf %19, %87 : vector<32x256xf32>
    %89 = arith.addf %6, %88 : vector<32x256xf32>
    %cst_36 = arith.constant 0.285714298 : f32
    %90 = vector.broadcast %cst_36 : f32 to vector<32x256xf32>
    %91 = arith.mulf %34, %90 : vector<32x256xf32>
    %92 = arith.addf %89, %91 : vector<32x256xf32>
    %cst_37 = arith.constant 1.71428573 : f32
    %93 = vector.broadcast %cst_37 : f32 to vector<32x256xf32>
    %94 = arith.mulf %52, %93 : vector<32x256xf32>
    %95 = arith.addf %92, %94 : vector<32x256xf32>
    %cst_38 = arith.constant -1.71428573 : f32
    %96 = vector.broadcast %cst_38 : f32 to vector<32x256xf32>
    %97 = arith.mulf %68, %96 : vector<32x256xf32>
    %98 = arith.addf %95, %97 : vector<32x256xf32>
    %cst_39 = arith.constant 1.14285719 : f32
    %99 = vector.broadcast %cst_39 : f32 to vector<32x256xf32>
    %100 = arith.mulf %86, %99 : vector<32x256xf32>
    %101 = arith.addf %98, %100 : vector<32x256xf32>
    %102 = math.tanh %101 : vector<32x256xf32>
    %cst_40 = arith.constant dense<0.000000e+00> : vector<64x256xf32>
    %103 = tpu.matmul %0, %102, %cst_40 {dimension_numbers = #tpu.dot_dimension_numbers<[1], [0], [0], [1], [0, 0, 1, 1], [], []>} : vector<64x32xf32>, vector<32x256xf32>, vector<64x256xf32> -> vector<64x256xf32>
    %104 = vector.broadcast %3 : vector<64x1xf32> to vector<64x256xf32>
    %105 = arith.addf %103, %104 : vector<64x256xf32>
    %106 = math.tanh %105 : vector<64x256xf32>
    %cst_41 = arith.constant dense<0.000000e+00> : vector<64x256xf32>
    %107 = tpu.matmul %1, %106, %cst_41 {dimension_numbers = #tpu.dot_dimension_numbers<[1], [0], [0], [1], [0, 0, 1, 1], [], []>} : vector<64x64xf32>, vector<64x256xf32>, vector<64x256xf32> -> vector<64x256xf32>
    %108 = vector.broadcast %4 : vector<64x1xf32> to vector<64x256xf32>
    %109 = arith.addf %107, %108 : vector<64x256xf32>
    %110 = math.tanh %109 : vector<64x256xf32>
    %cst_42 = arith.constant dense<0.000000e+00> : vector<32x256xf32>
    %111 = tpu.matmul %2, %110, %cst_42 {dimension_numbers = #tpu.dot_dimension_numbers<[1], [0], [0], [1], [0, 0, 1, 1], [], []>} : vector<32x64xf32>, vector<64x256xf32>, vector<32x256xf32> -> vector<32x256xf32>
    %112 = vector.broadcast %5 : vector<32x1xf32> to vector<32x256xf32>
    %113 = arith.addf %111, %112 : vector<32x256xf32>
    %cst_43 = arith.constant 7.000000e+00 : f32
    %114 = vector.broadcast %cst_43 : f32 to vector<32x256xf32>
    %115 = arith.mulf %114, %19 : vector<32x256xf32>
    %cst_44 = arith.constant 3.200000e+01 : f32
    %116 = vector.broadcast %cst_44 : f32 to vector<32x256xf32>
    %117 = arith.mulf %116, %52 : vector<32x256xf32>
    %118 = arith.addf %115, %117 : vector<32x256xf32>
    %cst_45 = arith.constant 1.200000e+01 : f32
    %119 = vector.broadcast %cst_45 : f32 to vector<32x256xf32>
    %120 = arith.mulf %119, %68 : vector<32x256xf32>
    %121 = arith.addf %118, %120 : vector<32x256xf32>
    %cst_46 = arith.constant 3.200000e+01 : f32
    %122 = vector.broadcast %cst_46 : f32 to vector<32x256xf32>
    %123 = arith.mulf %122, %86 : vector<32x256xf32>
    %124 = arith.addf %121, %123 : vector<32x256xf32>
    %cst_47 = arith.constant 7.000000e+00 : f32
    %125 = vector.broadcast %cst_47 : f32 to vector<32x256xf32>
    %126 = arith.mulf %125, %113 : vector<32x256xf32>
    %127 = arith.addf %124, %126 : vector<32x256xf32>
    %128 = vector.broadcast %7 : f32 to vector<32x256xf32>
    %129 = arith.mulf %128, %127 : vector<32x256xf32>
    %130 = arith.addf %6, %129 : vector<32x256xf32>
    %c0_48 = arith.constant 0 : index
    %c0_49 = arith.constant 0 : index
    %131 = vector.load %arg9[%c0_48, %c0_49] : memref<32x256xf32, #tpu.memory_space<vmem>>, vector<32x256xf32>
    tpu.vector_store %arg9[%c0_48, %c0_49], %130 {strides = array<i32>} : memref<32x256xf32, #tpu.memory_space<vmem>>, vector<32x256xf32>,
    return
  }
  func.func @transform_0(%arg0: i32) -> (i32, i32) {
    %c0_i32 = arith.constant 0 : i32
    %c0_i32_0 = arith.constant 0 : i32
    %c0_i32_1 = arith.constant 0 : i32
    return %c0_i32, %c0_i32_0 : i32, i32
  }
  func.func @transform_1(%arg0: i32) -> (i32, i32) {
    %c0_i32 = arith.constant 0 : i32
    %c0_i32_0 = arith.constant 0 : i32
    return %c0_i32, %arg0 : i32, i32
  }
  func.func @transform_2(%arg0: i32) -> (i32, i32) {
    %c0_i32 = arith.constant 0 : i32
    %c0_i32_0 = arith.constant 0 : i32
    %c0_i32_1 = arith.constant 0 : i32
    return %c0_i32, %c0_i32_0 : i32, i32
  }
  func.func @transform_3(%arg0: i32) -> (i32, i32) {
    %c0_i32 = arith.constant 0 : i32
    %c0_i32_0 = arith.constant 0 : i32
    %c0_i32_1 = arith.constant 0 : i32
    return %c0_i32, %c0_i32_0 : i32, i32
  }
  func.func @transform_4(%arg0: i32) -> (i32, i32) {
    %c0_i32 = arith.constant 0 : i32
    %c0_i32_0 = arith.constant 0 : i32
    %c0_i32_1 = arith.constant 0 : i32
    return %c0_i32, %c0_i32_0 : i32, i32
  }
  func.func @transform_5(%arg0: i32) -> (i32, i32) {
    %c0_i32 = arith.constant 0 : i32
    %c0_i32_0 = arith.constant 0 : i32
    %c0_i32_1 = arith.constant 0 : i32
    return %c0_i32, %c0_i32_0 : i32, i32
  }
  func.func @transform_6(%arg0: i32) -> (i32, i32) {
    %c0_i32 = arith.constant 0 : i32
    %c0_i32_0 = arith.constant 0 : i32
    %c0_i32_1 = arith.constant 0 : i32
    return %c0_i32, %c0_i32_0 : i32, i32
  }
  func.func @transform_7(%arg0: i32) -> (i32, i32) {
    %c0_i32 = arith.constant 0 : i32
    %c0_i32_0 = arith.constant 0 : i32
    %c0_i32_1 = arith.constant 0 : i32
    return %c0_i32, %c0_i32_0 : i32, i32
  }
  func.func @transform_8(%arg0: i32) -> (i32, i32) {
    %c0_i32 = arith.constant 0 : i32
    %c0_i32_0 = arith.constant 0 : i32
    return %c0_i32, %arg0 : i32, i32
  }
}

</mosaic_0001>

<bundles_post_ra>
// kernel: tpu_custom_call.1
= control target key start
LH: loop header
LB: loop body
LE: loop exit
PB: predicated region body
PF: predicated region fallthrough
CT: control target
= control target key end

     0   :  { %s5570_s0 = inlined_call_operand.<no memory space> [shape: f32[1,1], index: 0, kind: input, shape index: {}]   ;;  %s5571_s1 = inlined_call_operand.vmem [shape: f32[32,512], index: 1, kind: input, shape index: {}]   ;;  %s5572_s2 = inlined_call_operand.vmem [shape: f32[64,32], index: 2, kind: input, shape index: {}]   ;;  %s5573_s3 = inlined_call_operand.vmem [shape: f32[64,64], index: 3, kind: input, shape index: {}]   ;;  %s5574_s4 = inlined_call_operand.vmem [shape: f32[32,64], index: 4, kind: input, shape index: {}]   ;;  %s5575_s5 = inlined_call_operand.vmem [shape: f32[64,1], index: 5, kind: input, shape index: {}]   ;;  %s5576_s6 = inlined_call_operand.vmem [shape: f32[64,1], index: 6, kind: input, shape index: {}]   ;;  %s5577_s7 = inlined_call_operand.vmem [shape: f32[32,1], index: 7, kind: input, shape index: {}]   ;;  %s5578_s8 = inlined_call_operand.hbm [shape: f32[32,512], index: 8, kind: output, shape index: {}]  }
   0x1   :  { %13 = sst [smem:[#allocation2]] %s5570_s0 }
   0x2   :  { %14 = vsyncpa [#allocation5], 0 }
   0x3   :  { %16 = vsyncpa [#allocation5 + $0x1], 0  ;;  %s4137_s29 = smov 0   ;;  %s4139_s30 = smov 0  }
   0x4   :  { %s4141_s9 = smov 0   ;;  %s4143_s10 = smov 0  }
   0x5 LB: > { %s3044_s0 = sadd.s32 4294967295, %s4081_s10   ;;  %s3045_s11 = sadd.s32 4294967294, %s4081_s10   ;;  %s4081_s10 = sphi %s4143_s10, %s5714_s10   ;;  %s4077_s9 = sphi %s4141_s9, %s5713_s9   ;;  %s4073_s30 = sphi %s4139_s30, %s5712_s30   ;;  %s4069_s29 = sphi %s4137_s29, %s5711_s29  }
   0x6   : > { %s4160_s12 = sadd.s32 1, %s4081_s10   ;;  %s50_s13 = sadd.s32 1, %s4077_s9 }
   0x7   : > { %s47_s14 = ssub.s32 %s4081_s10, %s4160_s12  ;;  %p57_p0 = scmp.ne.s32.totalorder %s4077_s9, %s4073_s30 }
   0x8   : > { %p48_p1 = scmp.eq.s32.totalorder %s47_s14, 0  ;;  %p58_p2 = scmp.eq.s32.totalorder %s4081_s10, 0 }
   0x9   : > { %p213_p3 = scmp.eq.s32.totalorder %s3044_s0, 1  ;;  %p218_p4 = scmp.ne.s32.totalorder %s4073_s30, %s4069_s29 }
   0xa   : > { %s4173_s15 = scalar_select %p48_p1, %s4077_s9, %s50_s13  }
   0xb   : > { %p59_p5 = por %p58_p2, %p57_p0  ;;  %p4175_p6 = por %p213_p3, %p57_p0 }
   0xc   : > { %p219_p7 = scmp.eq.s32.totalorder %s3045_s11, 1  ;;  %p3047_p9 = scmp.ge.s32.totalorder %s4081_s10, 2 }
   0xe   : > { %p4179_p8 = por %p219_p7, %p218_p4  ;;  %256 = sbr.rel (%p3047_p9) target bundleno = 29 (0x1d), region = 44 }
  0x15   : > { %259 = sbr.rel (!%p59_p5) target bundleno = 29 (0x1d), region = 48  ;;  %s261_s18 = sand.u32 (%p59_p5), 1, %s4077_s9  }
  0x16   : > { %s3179_s19 = sshll.u32 (%p59_p5), %s4081_s10, 4  ;;  %s3048_s20 = sshll.u32 (%p59_p5), %s261_s18, 6 }
  0x17   : > { %s266_s23 = scalar_lea.vmem (%p59_p5), %s5571_s1, %s3179_s19  ;;  %s263_s24 = scalar_lea.vmem (%p59_p5), [#allocation3], %s3048_s20 }
  0x18   : > { %v279_v0 = vld [vmem:[%s266_s23] sm:$0xff] (%p59_p5)  ;;  %v281_v1 = vld [vmem:[%s266_s23 + $0x8] sm:$0xff] (%p59_p5) }
  0x19   : > { %v283_v2 = vld [vmem:[%s266_s23 + $0x20] sm:$0xff] (%p59_p5)  ;;  %280 = vst [vmem:[%s263_s24] sm:$0xff] (%p59_p5), %v279_v0  ;;  %282 = vst [vmem:[%s263_s24 + $0x8] sm:$0xff] (%p59_p5), %v281_v1  ;;  %v285_v3 = vld [vmem:[%s266_s23 + $0x28] sm:$0xff] (%p59_p5) }
  0x1a   : > { %284 = vst [vmem:[%s263_s24 + $0x10] sm:$0xff] (%p59_p5), %v283_v2  ;;  %v287_v4 = vld [vmem:[%s266_s23 + $0x40] sm:$0xff] (%p59_p5)  ;;  %v289_v5 = vld [vmem:[%s266_s23 + $0x48] sm:$0xff] (%p59_p5)  ;;  %286 = vst [vmem:[%s263_s24 + $0x18] sm:$0xff] (%p59_p5), %v285_v3 }
  0x1b   : > { %288 = vst [vmem:[%s263_s24 + $0x20] sm:$0xff] (%p59_p5), %v287_v4  ;;  %290 = vst [vmem:[%s263_s24 + $0x28] sm:$0xff] (%p59_p5), %v289_v5  ;;  %v291_v6 = vld [vmem:[%s266_s23 + $0x60] sm:$0xff] (%p59_p5)  ;;  %v293_v7 = vld [vmem:[%s266_s23 + $0x68] sm:$0xff] (%p59_p5) }
  0x1c   : > { %292 = vst [vmem:[%s263_s24 + $0x30] sm:$0xff] %v291_v6  ;;  %294 = vst [vmem:[%s263_s24 + $0x38] sm:$0xff] %v293_v7 }
  0x1d PF: > { %p3051_p10 = scmp.ge.s32.totalorder %s4081_s10, 1  ;;  %p299_p11 = scmp.lt.s32.totalorder %s4081_s10, 3 }
  0x1f   : > { %p300_p12 = pnand %p3051_p10, %p299_p11 }
  0x21   : > { %303 = sbr.rel (%p300_p12) target bundleno = 4672 (0x1240), region = 71 }
  0x28   : > { %s306_s25 = sand.u32 1, %s4073_s30   ;;  %v5579_v8 = vmov 0.0   ;;  %v4084_v9 = vmov 0   ;;  %v361_v10 = vld [vmem:[%s5575_s5] sm:$0xff]  ;;  %v363_v16 = vld [vmem:[%s5575_s5 + $0x10] sm:$0xff]  ;;  %v362_v18 = vld [vmem:[%s5575_s5 + $0x8] sm:$0xff] }
  0x29   : > { %s4196_s26 = sshll.u32 %s306_s25, 6  ;;  %527 = vmatprep.mubr.f32.mxu0 %v5579_v8  ;;  %721 = vmatprep.mubr.f32.mxu1 %v5579_v8  ;;  %v364_v20 = vld [vmem:[%s5575_s5 + $0x18] sm:$0xff]  ;;  %v365_v22 = vld [vmem:[%s5575_s5 + $0x20] sm:$0xff]  ;;  %v366_v23 = vld [vmem:[%s5575_s5 + $0x28] sm:$0xff]  ;;  %vm438_vm0 = vcmask 261120   ;;  %vm632_vm1 = vcmask 523264  }
  0x2a   : > { %3473 = vset.pattern.permute.xlu0 %v4084_v9  ;;  %3474 = vset.pattern.permute.xlu1 %v4084_v9  ;;  %s4204_s11 = scalar_lea.vmem [#allocation3], %s4196_s26  ;;  %v367_v24 = vld [vmem:[%s5575_s5 + $0x30] sm:$0xff]  ;;  %v368_v27 = vld [vmem:[%s5575_s5 + $0x38] sm:$0xff]  ;;  %v369_v30 = vld [vmem:[%s5576_s6] sm:$0xff]  ;;  %s389_s20 = sld [smem:[#allocation2]] }
  0x2b   : > { %v4207_v11 = vld [vmem:[%s4204_s11 + $0x8] sm:$0xff]  ;;  %v4210_v12 = vld [vmem:[%s4204_s11 + $0x18] sm:$0xff]  ;;  %v4213_v13 = vld [vmem:[%s4204_s11] sm:$0xff]  ;;  %400 = vperm.xlu0 %3473, %v361_v10   ;;  %410 = vperm.xlu1 %3474, %v363_v16   ;;  %s338_s21 = scalar_lea.vmem [#allocation4], %s4196_s26  ;;  %s3180_s22 = sshll.u32 %s3044_s0, 8 }
  0x2c   : > { %3475 = vtanh.f32 %v4207_v11  ;;  %v4217_v14 = vld [vmem:[%s4204_s11 + $0x10] sm:$0xff]  ;;  %v4221_v15 = vld [vmem:[%s4204_s11 + $0x28] sm:$0xff]  ;;  %v4228_v17 = vld [vmem:[%s4204_s11 + $0x38] sm:$0xff]  ;;  %s2977_s26 = sshll.u32 %s338_s21, 4  ;;  %s5520_s27 = scalar_lea.hbm %s5578_s8, %s3180_s22  ;;  %s5523_s26 = int_to_ptr.vmem [resolvable:$true] %s2977_s26 }
  0x2d   : > { %3477 = vtanh.f32 %v4210_v12  ;;  %v4235_v19 = vld [vmem:[%s4204_s11 + $0x20] sm:$0xff]  ;;  %v4242_v21 = vld [vmem:[%s4204_s11 + $0x30] sm:$0xff]  ;;  %v370_v35 = vld [vmem:[%s5576_s6 + $0x8] sm:$0xff]  ;;  %s5528_s0 = scalar_lea.sflag [#allocation5], %s306_s25  ;;  %s4019_s28 = scalar_lea.vmem %s5523_s26, 1024 }
  0x2e   : > { %3479 = vtanh.f32 %v4213_v13  ;;  %v371_v38 = vld [vmem:[%s5576_s6 + $0x10] sm:$0xff]  ;;  %v372_v41 = vld [vmem:[%s5576_s6 + $0x18] sm:$0xff]  ;;  %v4274_v42 = vld [vmem:[%s5572_s2] sm:$0xff]  ;;  %p4020_p13 = scmp.ne.s32.totalorder %s5523_s26, %s4019_s28  ;;  %s4085_s13 = smov [#allocation4]  }
  0x2f   : > { %3481 = vtanh.f32 %v4217_v14  ;;  %405 = vperm.xlu0 %3473, %v362_v18   ;;  %415 = vperm.xlu1 %3474, %v364_v20   ;;  %v373_v43 = vld [vmem:[%s5576_s6 + $0x20] sm:$0xff]  ;;  %v374_v44 = vld [vmem:[%s5576_s6 + $0x28] sm:$0xff]  ;;  %v375_v46 = vld [vmem:[%s5576_s6 + $0x30] sm:$0xff]  ;;  %s4023_s14 = sshll.u32 %s4085_s13, 4  ;;  %s4024_s14 = int_to_ptr.vmem [resolvable:$false] %s4023_s14 }
  0x30   : > { %3483 = vtanh.f32 %v4221_v15  ;;  %v4288_v45 = vld [vmem:[%s5572_s2 + $0x8] sm:$0xff]  ;;  %v376_v47 = vld [vmem:[%s5576_s6 + $0x38] sm:$0xff]  ;;  %v4302_v48 = vld [vmem:[%s5572_s2 + $0x10] sm:$0xff]  ;;  %p4021_p0 = pnand %p4020_p13, %p4175_p6  ;;  %s4025_s18 = scalar_lea.vmem %s4024_s14, 2048 }
  0x31   : > { %3485 = vtanh.f32 %v4228_v17  ;;  %v377_v49 = vld [vmem:[%s5577_s7] sm:$0xff]  ;;  %v378_v50 = vld [vmem:[%s5577_s7 + $0x8] sm:$0xff]  ;;  %v4316_v51 = vld [vmem:[%s5572_s2 + $0x18] sm:$0xff]  ;;  %p4026_p2 = scmp.lt.s32.totalorder %s5523_s26, %s4024_s14  ;;  %p4027_p3 = scmp.lt.s32.totalorder %s4025_s18, %s4019_s28 }
  0x32   : > { %3487 = vtanh.f32 %v4235_v19  ;;  %v379_v52 = vld [vmem:[%s5577_s7 + $0x10] sm:$0xff]  ;;  %v380_v53 = vld [vmem:[%s5577_s7 + $0x18] sm:$0xff]  ;;  %v4330_v54 = vld [vmem:[%s5572_s2 + $0x20] sm:$0xff]  ;;  %p4022_p1 = pneg %p4021_p0 }
  0x33   : > { %3489 = vtanh.f32 %v4242_v21  ;;  %420 = vperm.xlu0 %3473, %v365_v22   ;;  %425 = vperm.xlu1 %3474, %v366_v23   ;;  %v4338_v55 = vld [vmem:[%s5572_s2 + $0x28] sm:$0xff]  ;;  %v4346_v56 = vld [vmem:[%s5572_s2 + $0x30] sm:$0xff]  ;;  %v4354_v57 = vld [vmem:[%s5572_s2 + $0x38] sm:$0xff]  ;;  %p4028_p4 = por %p4027_p3, %p4026_p2 }
  0x35   : > { %p4029_p5 = pnand %p4028_p4, %p4022_p1 }
  0x36   : > { %v3476_v25 = vpop.eup %3475 }
  0x37   : > { %v3478_v26 = vpop.eup %3477  ;;  %430 = vperm.xlu0 %3473, %v367_v24   ;;  %435 = vperm.xlu1 %3474, %v368_v27  }
  0x38   : > { %v3480_v28 = vpop.eup %3479  ;;  %v3181_v29 = vpack.c.bf16 %v3478_v26, %v3476_v25 }
  0x39   : > { %v3482_v31 = vpop.eup %3481 }
  0x3a   : > { %v3484_v32 = vpop.eup %3483  ;;  %3182 = vmatprep.subr.bf16.mxu0 %v3181_v29  ;;  %v3183_v33 = vpack.c.bf16 %v3482_v31, %v3480_v28 }
  0x3b   : > { %v3486_v34 = vpop.eup %3485  ;;  %594 = vperm.xlu0 %3473, %v369_v30   ;;  %599 = vperm.xlu1 %3474, %v370_v35  }
  0x3c   : > { %v3488_v36 = vpop.eup %3487  ;;  %3184 = vmatpush1.bf16.msra.mxu0 %v3183_v33  ;;  %v3185_v37 = vpack.c.bf16 %v3486_v34, %v3484_v32 }
  0x3d   : > { %v3490_v39 = vpop.eup %3489 }
  0x3e   : > { %3186 = vmatprep.subr.bf16.mxu0 %v3185_v37  ;;  %v3187_v40 = vpack.c.bf16 %v3490_v39, %v3488_v36 }
  0x3f   : > { %604 = vperm.xlu0 %3473, %v371_v38   ;;  %609 = vperm.xlu1 %3474, %v372_v41  }
  0x40   : > { %3188 = vmatpush1.bf16.msra.mxu0 %v3187_v40 }
  0x43   : > { %3054 = vmatmul.mubr.msk.f32.vlgmr.msra.gmra.mrb[0].mxu0 %vm438_vm0, %v4274_v42  ;;  %614 = vperm.xlu0 %3473, %v373_v43  }
  0x44   : > { %533 = vmatprep.mubr.f32.mxu0 %v5579_v8  ;;  %619 = vperm.xlu1 %3474, %v374_v44  }
  0x47   : > { %3055 = vmatmul.mubr.msk.f32.gmra.mrb[2].mxu0 %vm438_vm0, %v4288_v45  ;;  %624 = vperm.xlu0 %3473, %v375_v46  }
  0x48   : > { %539 = vmatprep.mubr.f32.mxu0 %v5579_v8  ;;  %629 = vperm.xlu1 %3474, %v376_v47  }
  0x4b   : > { %3056 = vmatmul.mubr.msk.f32.gmra.mrb[4].mxu0 %vm438_vm0, %v4302_v48  ;;  %788 = vperm.xlu0 %3473, %v377_v49  }
  0x4c   : > { %545 = vmatprep.mubr.f32.mxu0 %v5579_v8  ;;  %793 = vperm.xlu1 %3474, %v378_v50  }
  0x4f   : > { %3057 = vmatmul.mubr.msk.f32.gmra.mrb[6].mxu0 %vm438_vm0, %v4316_v51  ;;  %798 = vperm.xlu0 %3473, %v379_v52  }
  0x50   : > { %551 = vmatprep.mubr.f32.mxu0 %v5579_v8  ;;  %803 = vperm.xlu1 %3474, %v380_v53  }
  0x53   : > { %3058 = vmatmul.mubr.msk.f32.gmra.mrb[8].mxu0 %vm438_vm0, %v4330_v54 }
  0x54   : > { %557 = vmatprep.mubr.f32.mxu0 %v5579_v8 }
  0x57   : > { %3059 = vmatmul.mubr.msk.f32.gmra.mrb[10].mxu0 %vm438_vm0, %v4338_v55 }
  0x58   : > { %563 = vmatprep.mubr.f32.mxu0 %v5579_v8 }
  0x5b   : > { %3060 = vmatmul.mubr.msk.f32.gmra.mrb[12].mxu0 %vm438_vm0, %v4346_v56 }
  0x5c   : > { %569 = vmatprep.mubr.f32.mxu0 %v5579_v8 }
  0x5f   : > { %3061 = vmatmul.mubr.msk.f32.gmra.mrb[14].mxu0 %vm438_vm0, %v4354_v57 }
  0x60   : > { %882 = vmatprep.mubr.f32.mxu0 %v5579_v8 }
  0xaa   : > { %v4359_v58 = vpop.permute.xlu0 %400  ;;  %v4366_v3 = vpop.permute.xlu1 %410 }
  0xab   : > { %5638 = vst [vmem:[#allocation7_spill] sm:$0xff] %v4359_v58  ;;  %5640 = vst [vmem:[#allocation9_spill] sm:$0xff] %v4366_v3 }
  0xae   : > { %v4363_v63 = vpop.permute.xlu0 %405  ;;  %v4371_v10 = vpop.permute.xlu1 %415 }
  0xaf   : > { %5639 = vst [vmem:[#allocation8_spill] sm:$0xff] %v4363_v63  ;;  %5641 = vst [vmem:[#allocation10_spill] sm:$0xff] %v4371_v10 }
  0xb2   : > { %v4375_v25 = vpop.permute.xlu0 %420  ;;  %v4379_v34 = vpop.permute.xlu1 %425 }
  0xb3   : > { %5642 = vst [vmem:[#allocation11_spill] sm:$0xff] %v4379_v34 }
  0xb6   : > { %v4383_v41 = vpop.permute.xlu0 %430 }
 0x116   : > { %v529_v59 = vpop.f32.mrb[0].mxu0 }
 0x117   : > { %v530_v60 = vadd.f32 %v529_v59, %v4359_v58  ;;  %v531_v61 = vpop.f32.mrb[1].mxu0  ;;  %v4387_v59 = vpop.permute.xlu1 %435 }
 0x118   : > { %v532_v62 = vadd.f32 %v531_v61, %v4359_v58 }
 0x119   : > { %3491 = vtanh.f32 %v530_v60 }
 0x11a   : > { %v535_v0 = vpop.f32.mrb[2].mxu0  ;;  %3493 = vtanh.f32 %v532_v62 }
 0x11b   : > { %v536_v1 = vadd.f32 %v535_v0, %v4363_v63  ;;  %v537_v2 = vpop.f32.mrb[3].mxu0 }
 0x11c   : > { %v538_v4 = vadd.f32 %v537_v2, %v4363_v63 }
 0x11d   : > { %3495 = vtanh.f32 %v536_v1 }
 0x11e   : > { %3497 = vtanh.f32 %v538_v4  ;;  %v541_v5 = vpop.f32.mrb[4].mxu0 }
 0x11f   : > { %v542_v6 = vadd.f32 %v541_v5, %v4366_v3  ;;  %v543_v7 = vpop.f32.mrb[5].mxu0 }
 0x120   : > { %v544_v9 = vadd.f32 %v543_v7, %v4366_v3 }
 0x121   : > { %3499 = vtanh.f32 %v542_v6 }
 0x122   : > { %v547_v16 = vpop.f32.mrb[6].mxu0  ;;  %3501 = vtanh.f32 %v544_v9 }
 0x123   : > { %v548_v18 = vadd.f32 %v547_v16, %v4371_v10  ;;  %v549_v20 = vpop.f32.mrb[7].mxu0  ;;  %v3492_v23 = vpop.eup %3491 }
 0x124   : > { %v550_v22 = vadd.f32 %v549_v20, %v4371_v10  ;;  %v3494_v24 = vpop.eup %3493 }
 0x125   : > { %3503 = vtanh.f32 %v548_v18 }
 0x126   : > { %3505 = vtanh.f32 %v550_v22  ;;  %v553_v26 = vpop.f32.mrb[8].mxu0 }
 0x127   : > { %v3496_v27 = vpop.eup %3495  ;;  %v554_v28 = vadd.f32 %v553_v26, %v4375_v25  ;;  %v555_v29 = vpop.f32.mrb[9].mxu0  ;;  %v4402_v26 = vld [vmem:[%s5573_s3 + $0x8] sm:$0xff] }
 0x128   : > { %v3498_v30 = vpop.eup %3497  ;;  %v556_v31 = vadd.f32 %v555_v29, %v4375_v25  ;;  %v3191_v32 = vpack.c.bf16 %v3496_v27, %v3492_v23  ;;  %v4410_v27 = vld [vmem:[%s5573_s3 + $0x10] sm:$0xff]  ;;  %v4426_v29 = vld [vmem:[%s5573_s3 + $0x20] sm:$0xff] }
 0x129   : > { %v3189_v33 = vpack.c.bf16 %v3498_v30, %v3494_v24  ;;  %3507 = vtanh.f32 %v554_v28  ;;  %v4394_v24 = vld [vmem:[%s5573_s3] sm:$0xff]  ;;  %v4418_v28 = vld [vmem:[%s5573_s3 + $0x18] sm:$0xff]  ;;  %v4434_v30 = vld [vmem:[%s5573_s3 + $0x28] sm:$0xff] }
 0x12a   : > { %v559_v35 = vpop.f32.mrb[10].mxu0  ;;  %3509 = vtanh.f32 %v556_v31  ;;  %v4442_v31 = vld [vmem:[%s5573_s3 + $0x30] sm:$0xff] }
 0x12b   : > { %v560_v36 = vadd.f32 %v559_v35, %v4379_v34  ;;  %v561_v37 = vpop.f32.mrb[11].mxu0  ;;  %3190 = vmatprep.subr.bf16.mxu1 %v3189_v33  ;;  %v3500_v39 = vpop.eup %3499 }
 0x12c   : > { %v562_v38 = vadd.f32 %v561_v37, %v4379_v34  ;;  %3192 = vmatpush1.bf16.msra.mxu1 %v3191_v32  ;;  %v3502_v40 = vpop.eup %3501  ;;  %v4450_v32 = vld [vmem:[%s5573_s3 + $0x38] sm:$0xff]  ;;  %v4455_v33 = vpop.permute.xlu0 %594 }
 0x12d   : > { %3511 = vtanh.f32 %v560_v36  ;;  %5643 = vst [vmem:[#allocation12_spill] sm:$0xff] %v4455_v33 }
 0x12e   : > { %3513 = vtanh.f32 %v562_v38  ;;  %v565_v43 = vpop.f32.mrb[12].mxu0 }
 0x12f   : > { %v3504_v44 = vpop.eup %3503  ;;  %v566_v46 = vadd.f32 %v565_v43, %v4383_v41  ;;  %v567_v47 = vpop.f32.mrb[13].mxu0 }
 0x130   : > { %v3506_v49 = vpop.eup %3505  ;;  %v568_v50 = vadd.f32 %v567_v47, %v4383_v41  ;;  %v3195_v52 = vpack.c.bf16 %v3504_v44, %v3500_v39  ;;  %v4459_v39 = vpop.permute.xlu1 %599 }
 0x131   : > { %v3193_v53 = vpack.c.bf16 %v3506_v49, %v3502_v40  ;;  %3515 = vtanh.f32 %v566_v46  ;;  %5644 = vst [vmem:[#allocation13_spill] sm:$0xff] %v4459_v39  ;;  %v4463_v47 = vpop.permute.xlu0 %604 }
 0x132   : > { %v571_v60 = vpop.f32.mrb[14].mxu0  ;;  %3517 = vtanh.f32 %v568_v50  ;;  %5645 = vst [vmem:[#allocation14_spill] sm:$0xff] %v4463_v47 }
 0x133   : > { %v572_v61 = vadd.f32 %v571_v60, %v4387_v59  ;;  %v573_v62 = vpop.f32.mrb[15].mxu0  ;;  %3194 = vmatprep.subr.bf16.mxu1 %v3193_v53  ;;  %v3508_v1 = vpop.eup %3507 }
 0x134   : > { %v574_v0 = vadd.f32 %v573_v62, %v4387_v59  ;;  %3196 = vmatpush1.bf16.msra.mxu1 %v3195_v52  ;;  %v3510_v2 = vpop.eup %3509  ;;  %v4467_v60 = vpop.permute.xlu1 %609 }
 0x135   : > { %3519 = vtanh.f32 %v572_v61  ;;  %5646 = vst [vmem:[#allocation15_spill] sm:$0xff] %v4467_v60 }
 0x136   : > { %3521 = vtanh.f32 %v574_v0 }
 0x137   : > { %v3512_v4 = vpop.eup %3511 }
 0x138   : > { %v3514_v5 = vpop.eup %3513  ;;  %v3199_v6 = vpack.c.bf16 %v3512_v4, %v3508_v1 }
 0x139   : > { %v3197_v7 = vpack.c.bf16 %v3514_v5, %v3510_v2  ;;  %v4471_v5 = vpop.permute.xlu0 %614 }
 0x13a   : > { %5647 = vst [vmem:[#allocation16_spill] sm:$0xff] %v4471_v5 }
 0x13b   : > { %3198 = vmatprep.subr.bf16.mxu1 %v3197_v7  ;;  %v3516_v9 = vpop.eup %3515 }
 0x13c   : > { %3200 = vmatpush1.bf16.msra.mxu1 %v3199_v6  ;;  %v3518_v16 = vpop.eup %3517 }
 0x13f   : > { %v3520_v18 = vpop.eup %3519 }
 0x140   : > { %v3522_v20 = vpop.eup %3521  ;;  %v3203_v22 = vpack.c.bf16 %v3520_v18, %v3516_v9 }
 0x141   : > { %v3201_v23 = vpack.c.bf16 %v3522_v20, %v3518_v16 }
 0x143   : > { %3202 = vmatprep.subr.bf16.mxu1 %v3201_v23 }
 0x144   : > { %3204 = vmatpush1.bf16.msra.mxu1 %v3203_v22 }
 0x147   : > { %3062 = vmatmul.mubr.msk.f32.vlgmr.msra.gmra.mrb[0].mxu1 %vm632_vm1, %v4394_v24 }
 0x148   : > { %727 = vmatprep.mubr.f32.mxu1 %v5579_v8 }
 0x14b   : > { %3063 = vmatmul.mubr.msk.f32.gmra.mrb[2].mxu1 %vm632_vm1, %v4402_v26 }
 0x14c   : > { %733 = vmatprep.mubr.f32.mxu1 %v5579_v8 }
 0x14f   : > { %3064 = vmatmul.mubr.msk.f32.gmra.mrb[4].mxu1 %vm632_vm1, %v4410_v27 }
 0x150   : > { %739 = vmatprep.mubr.f32.mxu1 %v5579_v8 }
 0x153   : > { %3065 = vmatmul.mubr.msk.f32.gmra.mrb[6].mxu1 %vm632_vm1, %v4418_v28 }
 0x154   : > { %745 = vmatprep.mubr.f32.mxu1 %v5579_v8 }
 0x157   : > { %3066 = vmatmul.mubr.msk.f32.gmra.mrb[8].mxu1 %vm632_vm1, %v4426_v29 }
 0x158   : > { %751 = vmatprep.mubr.f32.mxu1 %v5579_v8 }
 0x15b   : > { %3067 = vmatmul.mubr.msk.f32.gmra.mrb[10].mxu1 %vm632_vm1, %v4434_v30 }
 0x15c   : > { %757 = vmatprep.mubr.f32.mxu1 %v5579_v8 }
 0x15f   : > { %3068 = vmatmul.mubr.msk.f32.gmra.mrb[12].mxu1 %vm632_vm1, %v4442_v31 }
 0x160   : > { %763 = vmatprep.mubr.f32.mxu1 %v5579_v8 }
 0x163   : > { %3069 = vmatmul.mubr.msk.f32.gmra.mrb[14].mxu1 %vm632_vm1, %v4450_v32 }
 0x164   : > { %995 = vmatprep.mubr.f32.mxu1 %v5579_v8 }
 0x21a   : > { %v723_v35 = vpop.f32.mrb[0].mxu1 }
 0x21b   : > { %v724_v36 = vadd.f32 %v723_v35, %v4455_v33  ;;  %v725_v37 = vpop.f32.mrb[1].mxu1  ;;  %v4475_v35 = vpop.permute.xlu1 %619 }
 0x21c   : > { %v726_v38 = vadd.f32 %v725_v37, %v4455_v33  ;;  %5648 = vst [vmem:[#allocation17_spill] sm:$0xff] %v4475_v35 }
 0x21d   : > { %3523 = vtanh.f32 %v724_v36 }
 0x21e   : > { %v729_v40 = vpop.f32.mrb[2].mxu1  ;;  %3525 = vtanh.f32 %v726_v38 }
 0x21f   : > { %v730_v43 = vadd.f32 %v729_v40, %v4459_v39  ;;  %v731_v44 = vpop.f32.mrb[3].mxu1 }
 0x220   : > { %v732_v46 = vadd.f32 %v731_v44, %v4459_v39 }
 0x221   : > { %3527 = vtanh.f32 %v730_v43 }
 0x222   : > { %3529 = vtanh.f32 %v732_v46  ;;  %v735_v49 = vpop.f32.mrb[4].mxu1  ;;  %v4479_v46 = vpop.permute.xlu0 %624 }
 0x223   : > { %v736_v50 = vadd.f32 %v735_v49, %v4463_v47  ;;  %v737_v52 = vpop.f32.mrb[5].mxu1 }
 0x224   : > { %v738_v53 = vadd.f32 %v737_v52, %v4463_v47 }
 0x225   : > { %3531 = vtanh.f32 %v736_v50 }
 0x226   : > { %v741_v61 = vpop.f32.mrb[6].mxu1  ;;  %3533 = vtanh.f32 %v738_v53 }
 0x227   : > { %v742_v62 = vadd.f32 %v741_v61, %v4467_v60  ;;  %v743_v0 = vpop.f32.mrb[7].mxu1  ;;  %v3524_v2 = vpop.eup %3523 }
 0x228   : > { %v744_v1 = vadd.f32 %v743_v0, %v4467_v60  ;;  %v3526_v4 = vpop.eup %3525 }
 0x229   : > { %3535 = vtanh.f32 %v742_v62 }
 0x22a   : > { %3537 = vtanh.f32 %v744_v1  ;;  %v747_v6 = vpop.f32.mrb[8].mxu1 }
 0x22b   : > { %v3528_v7 = vpop.eup %3527  ;;  %v748_v9 = vadd.f32 %v747_v6, %v4471_v5  ;;  %v749_v16 = vpop.f32.mrb[9].mxu1 }
 0x22c   : > { %v3530_v18 = vpop.eup %3529  ;;  %v750_v20 = vadd.f32 %v749_v16, %v4471_v5  ;;  %v3207_v22 = vpack.c.bf16 %v3528_v7, %v3524_v2  ;;  %v4483_v2 = vpop.permute.xlu1 %629 }
 0x22d   : > { %v3205_v23 = vpack.c.bf16 %v3530_v18, %v3526_v4  ;;  %3539 = vtanh.f32 %v748_v9  ;;  %5649 = vst [vmem:[#allocation18_spill] sm:$0xff] %v4483_v2 }
 0x22e   : > { %v753_v36 = vpop.f32.mrb[10].mxu1  ;;  %3541 = vtanh.f32 %v750_v20 }
 0x22f   : > { %v754_v37 = vadd.f32 %v753_v36, %v4475_v35  ;;  %v755_v38 = vpop.f32.mrb[11].mxu1  ;;  %3206 = vmatprep.subr.bf16.mxu0 %v3205_v23  ;;  %v3532_v43 = vpop.eup %3531 }
 0x230   : > { %v756_v40 = vadd.f32 %v755_v38, %v4475_v35  ;;  %3208 = vmatpush1.bf16.msra.mxu0 %v3207_v22  ;;  %v3534_v44 = vpop.eup %3533 }
 0x231   : > { %3543 = vtanh.f32 %v754_v37 }
 0x232   : > { %3545 = vtanh.f32 %v756_v40  ;;  %v759_v49 = vpop.f32.mrb[12].mxu1 }
 0x233   : > { %v3536_v50 = vpop.eup %3535  ;;  %v760_v52 = vadd.f32 %v759_v49, %v4479_v46  ;;  %v761_v53 = vpop.f32.mrb[13].mxu1 }
 0x234   : > { %v3538_v61 = vpop.eup %3537  ;;  %v762_v62 = vadd.f32 %v761_v53, %v4479_v46  ;;  %v3211_v0 = vpack.c.bf16 %v3536_v50, %v3532_v43  ;;  %v4490_v50 = vld [vmem:[%s5574_s4] sm:$0xff]  ;;  %v4506_v53 = vld [vmem:[%s5574_s4 + $0x10] sm:$0xff] }
 0x235   : > { %v3209_v1 = vpack.c.bf16 %v3538_v61, %v3534_v44  ;;  %3547 = vtanh.f32 %v760_v52  ;;  %v4498_v52 = vld [vmem:[%s5574_s4 + $0x8] sm:$0xff]  ;;  %v4514_v61 = vld [vmem:[%s5574_s4 + $0x18] sm:$0xff] }
 0x236   : > { %v765_v4 = vpop.f32.mrb[14].mxu1  ;;  %3549 = vtanh.f32 %v762_v62  ;;  %v4519_v62 = vpop.permute.xlu0 %788 }
 0x237   : > { %v766_v6 = vadd.f32 %v765_v4, %v4483_v2  ;;  %v767_v7 = vpop.f32.mrb[15].mxu1  ;;  %3210 = vmatprep.subr.bf16.mxu0 %v3209_v1  ;;  %v3540_v16 = vpop.eup %3539  ;;  %5650 = vst [vmem:[#allocation19_spill] sm:$0xff] %v4519_v62 }
 0x238   : > { %v768_v9 = vadd.f32 %v767_v7, %v4483_v2  ;;  %3212 = vmatpush1.bf16.msra.mxu0 %v3211_v0  ;;  %v3542_v18 = vpop.eup %3541 }
 0x239   : > { %3551 = vtanh.f32 %v766_v6 }
 0x23a   : > { %3553 = vtanh.f32 %v768_v9  ;;  %v4528_v9 = vpop.permute.xlu1 %793 }
 0x23b   : > { %v3544_v20 = vpop.eup %3543 }
 0x23c   : > { %v3546_v22 = vpop.eup %3545  ;;  %v3215_v23 = vpack.c.bf16 %v3544_v20, %v3540_v16 }
 0x23d   : > { %v3213_v36 = vpack.c.bf16 %v3546_v22, %v3542_v18 }
 0x23f   : > { %3214 = vmatprep.subr.bf16.mxu0 %v3213_v36  ;;  %v3548_v37 = vpop.eup %3547 }
 0x240   : > { %3216 = vmatpush1.bf16.msra.mxu0 %v3215_v23  ;;  %v3550_v38 = vpop.eup %3549 }
 0x243   : > { %v3552_v40 = vpop.eup %3551 }
 0x244   : > { %v3554_v43 = vpop.eup %3553  ;;  %v3219_v44 = vpack.c.bf16 %v3552_v40, %v3548_v37  ;;  %v4540_v40 = vpop.permute.xlu0 %798 }
 0x245   : > { %v3217_v49 = vpack.c.bf16 %v3554_v43, %v3550_v38  ;;  %5655 = vst [vmem:[#allocation24_spill] sm:$0xff] %v4540_v40 }
 0x247   : > { %3218 = vmatprep.subr.bf16.mxu0 %v3217_v49 }
 0x248   : > { %3220 = vmatpush1.bf16.msra.mxu0 %v3219_v44 }
 0x24b   : > { %3070 = vmatmul.mubr.msk.f32.vlgmr.msra.gmra.mrb[16].mxu0 %vm632_vm1, %v4490_v50 }
 0x24c   : > { %888 = vmatprep.mubr.f32.mxu0 %v5579_v8 }
 0x24f   : > { %3071 = vmatmul.mubr.msk.f32.gmra.mrb[18].mxu0 %vm632_vm1, %v4498_v52 }
 0x250   : > { %894 = vmatprep.mubr.f32.mxu0 %v5579_v8 }
 0x253   : > { %3072 = vmatmul.mubr.msk.f32.gmra.mrb[20].mxu0 %vm632_vm1, %v4506_v53 }
 0x254   : > { %900 = vmatprep.mubr.f32.mxu0 %v5579_v8 }
 0x257   : > { %3073 = vmatmul.mubr.msk.f32.gmra.mrb[22].mxu0 %vm632_vm1, %v4514_v61 }
 0x258   : > { %1124 = vmatprep.mubr.f32.mxu0 %v5579_v8 }
 0x31e   : > { %v884_v0 = vpop.f32.mrb[16].mxu0 }
 0x31f   : > { %v4522_v1 = vadd.f32 %v884_v0, %v4519_v62  ;;  %v886_v4 = vpop.f32.mrb[17].mxu0 }
 0x320   : > { %v4525_v6 = vadd.f32 %v886_v4, %v4519_v62 }
 0x321   : > { %5651 = vst [vmem:[#allocation20_spill] sm:$0xff] %v4522_v1  ;;  %v907_v7 = vmul.f32 0.25, %v4522_v1 }
 0x322   : > { %5652 = vst [vmem:[#allocation21_spill] sm:$0xff] %v4525_v6  ;;  %v890_v16 = vpop.f32.mrb[18].mxu0  ;;  %v908_v18 = vmul.f32 0.25, %v4525_v6 }
 0x323   : > { %v4532_v20 = vadd.f32 %v890_v16, %v4528_v9  ;;  %v892_v22 = vpop.f32.mrb[19].mxu0  ;;  %v915_v23 = vadd.f32 %v907_v7, %v4213_v13  ;;  %v4552_v16 = vpop.permute.xlu1 %803 }
 0x324   : > { %v4536_v36 = vadd.f32 %v892_v22, %v4528_v9  ;;  %v916_v37 = vadd.f32 %v908_v18, %v4207_v11  ;;  %5656 = vst [vmem:[#allocation25_spill] sm:$0xff] %v4552_v16 }
 0x325   : > { %5653 = vst [vmem:[#allocation22_spill] sm:$0xff] %v4532_v20  ;;  %v909_v38 = vmul.f32 0.25, %v4532_v20  ;;  %3555 = vtanh.f32 %v915_v23 }
 0x326   : > { %5654 = vst [vmem:[#allocation23_spill] sm:$0xff] %v4536_v36  ;;  %v896_v43 = vpop.f32.mrb[20].mxu0  ;;  %v910_v44 = vmul.f32 0.25, %v4536_v36  ;;  %3557 = vtanh.f32 %v916_v37 }
 0x327   : > { %v4544_v49 = vadd.f32 %v896_v43, %v4540_v40  ;;  %v898_v0 = vpop.f32.mrb[21].mxu0  ;;  %v917_v4 = vadd.f32 %v909_v38, %v4217_v14 }
 0x328   : > { %v4548_v13 = vadd.f32 %v898_v0, %v4540_v40  ;;  %v918_v7 = vadd.f32 %v910_v44, %v4210_v12 }
 0x329   : > { %v911_v11 = vmul.f32 0.25, %v4544_v49  ;;  %3559 = vtanh.f32 %v917_v4 }
 0x32a   : > { %v902_v18 = vpop.f32.mrb[22].mxu0  ;;  %3561 = vtanh.f32 %v918_v7  ;;  %v912_v22 = vmul.f32 0.25, %v4548_v13 }
 0x32b   : > { %v4556_v43 = vadd.f32 %v902_v18, %v4552_v16  ;;  %v904_v14 = vpop.f32.mrb[23].mxu0  ;;  %v919_v23 = vadd.f32 %v911_v11, %v4235_v19 }
 0x32c   : > { %v4560_v38 = vadd.f32 %v904_v14, %v4552_v16  ;;  %v920_v12 = vadd.f32 %v912_v22, %v4221_v15 }
 0x32d   : > { %v913_v37 = vmul.f32 0.25, %v4556_v43  ;;  %3563 = vtanh.f32 %v919_v23 }
 0x32e   : > { %5657 = vst [vmem:[#allocation26_spill] sm:$0xff] %v4560_v38  ;;  %v914_v44 = vmul.f32 0.25, %v4560_v38  ;;  %3565 = vtanh.f32 %v920_v12 }
 0x32f   : > { %v921_v0 = vadd.f32 %v913_v37, %v4242_v21  ;;  %v3556_v7 = vpop.eup %3555 }
 0x330   : > { %v922_v4 = vadd.f32 %v914_v44, %v4228_v17  ;;  %v3558_v18 = vpop.eup %3557  ;;  %v5658_v17 = vmov 0.0  }
 0x331   : > { %3567 = vtanh.f32 %v921_v0 }
 0x332   : > { %3569 = vtanh.f32 %v922_v4 }
 0x333   : > { %v3560_v19 = vpop.eup %3559 }
 0x334   : > { %v3562_v11 = vpop.eup %3561  ;;  %v3223_v14 = vpack.c.bf16 %v3560_v19, %v3556_v7 }
 0x335   : > { %v3221_v8 = vpack.c.bf16 %v3562_v11, %v3558_v18 }
 0x337   : > { %3222 = vmatprep.subr.bf16.mxu1 %v3221_v8  ;;  %v3564_v15 = vpop.eup %3563 }
 0x338   : > { %3224 = vmatpush1.bf16.msra.mxu1 %v3223_v14  ;;  %v3566_v22 = vpop.eup %3565 }
 0x33b   : > { %v3568_v16 = vpop.eup %3567 }
 0x33c   : > { %v3570_v38 = vpop.eup %3569  ;;  %v3227_v40 = vpack.c.bf16 %v3568_v16, %v3564_v15 }
 0x33d   : > { %v3225_v21 = vpack.c.bf16 %v3570_v38, %v3566_v22 }
 0x33f   : > { %3226 = vmatprep.subr.bf16.mxu1 %v3225_v21 }
 0x340   : > { %3228 = vmatpush1.bf16.msra.mxu1 %v3227_v40 }
 0x343   : > { %3074 = vmatmul.mubr.msk.f32.vlgmr.msra.gmra.mrb[16].mxu1 %vm438_vm0, %v4274_v42 }
 0x344   : > { %1001 = vmatprep.mubr.f32.mxu1 %v5658_v17 }
 0x347   : > { %3075 = vmatmul.mubr.msk.f32.gmra.mrb[18].mxu1 %vm438_vm0, %v4288_v45 }
 0x348   : > { %1007 = vmatprep.mubr.f32.mxu1 %v5658_v17 }
 0x34b   : > { %3076 = vmatmul.mubr.msk.f32.gmra.mrb[20].mxu1 %vm438_vm0, %v4302_v48 }
 0x34c   : > { %1013 = vmatprep.mubr.f32.mxu1 %v5658_v17 }
 0x34f   : > { %3077 = vmatmul.mubr.msk.f32.gmra.mrb[22].mxu1 %vm438_vm0, %v4316_v51 }
 0x350   : > { %1019 = vmatprep.mubr.f32.mxu1 %v5658_v17 }
 0x353   : > { %3078 = vmatmul.mubr.msk.f32.gmra.mrb[24].mxu1 %vm438_vm0, %v4330_v54 }
 0x354   : > { %1025 = vmatprep.mubr.f32.mxu1 %v5658_v17 }
 0x357   : > { %3079 = vmatmul.mubr.msk.f32.gmra.mrb[26].mxu1 %vm438_vm0, %v4338_v55 }
 0x358   : > { %1031 = vmatprep.mubr.f32.mxu1 %v5658_v17 }
 0x35b   : > { %3080 = vmatmul.mubr.msk.f32.gmra.mrb[28].mxu1 %vm438_vm0, %v4346_v56 }
 0x35c   : > { %1037 = vmatprep.mubr.f32.mxu1 %v5658_v17 }
 0x35f   : > { %3081 = vmatmul.mubr.msk.f32.gmra.mrb[30].mxu1 %vm438_vm0, %v4354_v57 }
 0x360   : > { %1253 = vmatprep.mubr.f32.mxu1 %v5658_v17 }
 0x416   : > { %v997_v8 = vpop.f32.mrb[16].mxu1 }
 0x417   : > { %v998_v42 = vadd.f32 %v997_v8, %v4359_v58  ;;  %v999_v45 = vpop.f32.mrb[17].mxu1 }
 0x418   : > { %v1000_v48 = vadd.f32 %v999_v45, %v4359_v58 }
 0x419   : > { %3571 = vtanh.f32 %v998_v42 }
 0x41a   : > { %v1003_v51 = vpop.f32.mrb[18].mxu1  ;;  %3573 = vtanh.f32 %v1000_v48 }
 0x41b   : > { %v1004_v54 = vadd.f32 %v1003_v51, %v4363_v63  ;;  %v1005_v55 = vpop.f32.mrb[19].mxu1 }
 0x41c   : > { %v1006_v56 = vadd.f32 %v1005_v55, %v4363_v63 }
 0x41d   : > { %3575 = vtanh.f32 %v1004_v54 }
 0x41e   : > { %3577 = vtanh.f32 %v1006_v56  ;;  %v1009_v40 = vpop.f32.mrb[20].mxu1 }
 0x41f   : > { %v1010_v57 = vadd.f32 %v1009_v40, %v4366_v3  ;;  %v1011_v16 = vpop.f32.mrb[21].mxu1 }
 0x420   : > { %v1012_v23 = vadd.f32 %v1011_v16, %v4366_v3 }
 0x421   : > { %3579 = vtanh.f32 %v1010_v57 }
 0x422   : > { %v1015_v38 = vpop.f32.mrb[22].mxu1  ;;  %3581 = vtanh.f32 %v1012_v23 }
 0x423   : > { %v1016_v12 = vadd.f32 %v1015_v38, %v4371_v10  ;;  %v1017_v37 = vpop.f32.mrb[23].mxu1  ;;  %v3572_v0 = vpop.eup %3571 }
 0x424   : > { %v1018_v44 = vadd.f32 %v1017_v37, %v4371_v10  ;;  %v3574_v4 = vpop.eup %3573 }
 0x425   : > { %3583 = vtanh.f32 %v1016_v12 }
 0x426   : > { %3585 = vtanh.f32 %v1018_v44  ;;  %v1021_v7 = vpop.f32.mrb[24].mxu1 }
 0x427   : > { %v3576_v18 = vpop.eup %3575  ;;  %v1022_v19 = vadd.f32 %v1021_v7, %v4375_v25  ;;  %v1023_v11 = vpop.f32.mrb[25].mxu1 }
 0x428   : > { %v3578_v14 = vpop.eup %3577  ;;  %v1024_v15 = vadd.f32 %v1023_v11, %v4375_v25  ;;  %v3231_v22 = vpack.c.bf16 %v3576_v18, %v3572_v0 }
 0x429   : > { %v3229_v21 = vpack.c.bf16 %v3578_v14, %v3574_v4  ;;  %3587 = vtanh.f32 %v1022_v19 }
 0x42a   : > { %v1027_v8 = vpop.f32.mrb[26].mxu1  ;;  %3589 = vtanh.f32 %v1024_v15 }
 0x42b   : > { %v1028_v42 = vadd.f32 %v1027_v8, %v4379_v34  ;;  %v1029_v45 = vpop.f32.mrb[27].mxu1  ;;  %3230 = vmatprep.subr.bf16.mxu0 %v3229_v21  ;;  %v3580_v51 = vpop.eup %3579 }
 0x42c   : > { %v1030_v48 = vadd.f32 %v1029_v45, %v4379_v34  ;;  %3232 = vmatpush1.bf16.msra.mxu0 %v3231_v22  ;;  %v3582_v54 = vpop.eup %3581 }
 0x42d   : > { %3591 = vtanh.f32 %v1028_v42 }
 0x42e   : > { %3593 = vtanh.f32 %v1030_v48  ;;  %v1033_v55 = vpop.f32.mrb[28].mxu1 }
 0x42f   : > { %v3584_v56 = vpop.eup %3583  ;;  %v1034_v40 = vadd.f32 %v1033_v55, %v4383_v41  ;;  %v1035_v57 = vpop.f32.mrb[29].mxu1 }
 0x430   : > { %v3586_v16 = vpop.eup %3585  ;;  %v1036_v23 = vadd.f32 %v1035_v57, %v4383_v41  ;;  %v3235_v38 = vpack.c.bf16 %v3584_v56, %v3580_v51 }
 0x431   : > { %v3233_v12 = vpack.c.bf16 %v3586_v16, %v3582_v54  ;;  %3595 = vtanh.f32 %v1034_v40 }
 0x432   : > { %v1039_v37 = vpop.f32.mrb[30].mxu1  ;;  %3597 = vtanh.f32 %v1036_v23 }
 0x433   : > { %v1040_v44 = vadd.f32 %v1039_v37, %v4387_v59  ;;  %v1041_v0 = vpop.f32.mrb[31].mxu1  ;;  %3234 = vmatprep.subr.bf16.mxu0 %v3233_v12  ;;  %v3588_v7 = vpop.eup %3587 }
 0x434   : > { %v1042_v4 = vadd.f32 %v1041_v0, %v4387_v59  ;;  %3236 = vmatpush1.bf16.msra.mxu0 %v3235_v38  ;;  %v3590_v18 = vpop.eup %3589 }
 0x435   : > { %3599 = vtanh.f32 %v1040_v44 }
 0x436   : > { %3601 = vtanh.f32 %v1042_v4 }
 0x437   : > { %v3592_v19 = vpop.eup %3591 }
 0x438   : > { %v3594_v11 = vpop.eup %3593  ;;  %v3239_v14 = vpack.c.bf16 %v3592_v19, %v3588_v7 }
 0x439   : > { %v3237_v15 = vpack.c.bf16 %v3594_v11, %v3590_v18 }
 0x43b   : > { %3238 = vmatprep.subr.bf16.mxu0 %v3237_v15  ;;  %v3596_v22 = vpop.eup %3595 }
 0x43c   : > { %3240 = vmatpush1.bf16.msra.mxu0 %v3239_v14  ;;  %v3598_v21 = vpop.eup %3597 }
 0x43f   : > { %v3600_v8 = vpop.eup %3599 }
 0x440   : > { %v3602_v42 = vpop.eup %3601  ;;  %v3243_v45 = vpack.c.bf16 %v3600_v8, %v3596_v22 }
 0x441   : > { %v3241_v48 = vpack.c.bf16 %v3602_v42, %v3598_v21 }
 0x443   : > { %3242 = vmatprep.subr.bf16.mxu0 %v3241_v48 }
 0x444   : > { %3244 = vmatpush1.bf16.msra.mxu0 %v3243_v45 }
 0x447   : > { %3082 = vmatmul.mubr.msk.f32.vlgmr.msra.gmra.mrb[24].mxu0 %vm632_vm1, %v4394_v24 }
 0x448   : > { %1130 = vmatprep.mubr.f32.mxu0 %v5658_v17 }
 0x44b   : > { %3083 = vmatmul.mubr.msk.f32.gmra.mrb[26].mxu0 %vm632_vm1, %v4402_v26 }
 0x44c   : > { %1136 = vmatprep.mubr.f32.mxu0 %v5658_v17 }
 0x44f   : > { %3084 = vmatmul.mubr.msk.f32.gmra.mrb[28].mxu0 %vm632_vm1, %v4410_v27 }
 0x450   : > { %1142 = vmatprep.mubr.f32.mxu0 %v5658_v17 }
 0x453   : > { %3085 = vmatmul.mubr.msk.f32.gmra.mrb[30].mxu0 %vm632_vm1, %v4418_v28 }
 0x454   : > { %1148 = vmatprep.mubr.f32.mxu0 %v5658_v17 }
 0x457   : > { %3086 = vmatmul.mubr.msk.f32.gmra.mrb[32].mxu0 %vm632_vm1, %v4426_v29 }
 0x458   : > { %1154 = vmatprep.mubr.f32.mxu0 %v5658_v17 }
 0x45b   : > { %3087 = vmatmul.mubr.msk.f32.gmra.mrb[34].mxu0 %vm632_vm1, %v4434_v30 }
 0x45c   : > { %1160 = vmatprep.mubr.f32.mxu0 %v5658_v17 }
 0x45f   : > { %3088 = vmatmul.mubr.msk.f32.gmra.mrb[36].mxu0 %vm632_vm1, %v4442_v31 }
 0x460   : > { %1166 = vmatprep.mubr.f32.mxu0 %v5658_v17 }
 0x463   : > { %3089 = vmatmul.mubr.msk.f32.gmra.mrb[38].mxu0 %vm632_vm1, %v4450_v32 }
 0x464   : > { %1382 = vmatprep.mubr.f32.mxu0 %v5658_v17 }
 0x51a   : > { %v1126_v24 = vpop.f32.mrb[24].mxu0 }
 0x51b   : > { %v1127_v26 = vadd.f32 %v1126_v24, %v4455_v33  ;;  %v1128_v27 = vpop.f32.mrb[25].mxu0 }
 0x51c   : > { %v1129_v28 = vadd.f32 %v1128_v27, %v4455_v33 }
 0x51d   : > { %3603 = vtanh.f32 %v1127_v26 }
 0x51e   : > { %v1132_v29 = vpop.f32.mrb[26].mxu0  ;;  %3605 = vtanh.f32 %v1129_v28 }
 0x51f   : > { %v1133_v30 = vadd.f32 %v1132_v29, %v4459_v39  ;;  %v1134_v51 = vpop.f32.mrb[27].mxu0 }
 0x520   : > { %v1135_v31 = vadd.f32 %v1134_v51, %v4459_v39 }
 0x521   : > { %3607 = vtanh.f32 %v1133_v30 }
 0x522   : > { %3609 = vtanh.f32 %v1135_v31  ;;  %v1138_v54 = vpop.f32.mrb[28].mxu0 }
 0x523   : > { %v1139_v32 = vadd.f32 %v1138_v54, %v4463_v47  ;;  %v1140_v55 = vpop.f32.mrb[29].mxu0 }
 0x524   : > { %v1141_v56 = vadd.f32 %v1140_v55, %v4463_v47 }
 0x525   : > { %3611 = vtanh.f32 %v1139_v32 }
 0x526   : > { %v1144_v40 = vpop.f32.mrb[30].mxu0  ;;  %3613 = vtanh.f32 %v1141_v56 }
 0x527   : > { %v1145_v57 = vadd.f32 %v1144_v40, %v4467_v60  ;;  %v1146_v16 = vpop.f32.mrb[31].mxu0  ;;  %v3604_v38 = vpop.eup %3603 }
 0x528   : > { %v1147_v23 = vadd.f32 %v1146_v16, %v4467_v60  ;;  %v3606_v12 = vpop.eup %3605 }
 0x529   : > { %3615 = vtanh.f32 %v1145_v57 }
 0x52a   : > { %3617 = vtanh.f32 %v1147_v23  ;;  %v1150_v37 = vpop.f32.mrb[32].mxu0 }
 0x52b   : > { %v3608_v44 = vpop.eup %3607  ;;  %v1151_v0 = vadd.f32 %v1150_v37, %v4471_v5  ;;  %v1152_v4 = vpop.f32.mrb[33].mxu0 }
 0x52c   : > { %v3610_v7 = vpop.eup %3609  ;;  %v1153_v18 = vadd.f32 %v1152_v4, %v4471_v5  ;;  %v3247_v19 = vpack.c.bf16 %v3608_v44, %v3604_v38 }
 0x52d   : > { %v3245_v11 = vpack.c.bf16 %v3610_v7, %v3606_v12  ;;  %3619 = vtanh.f32 %v1151_v0  ;;  %v2431_v7 = vmul.f32 -0.42857143, %v4522_v1 }
 0x52e   : > { %v1156_v14 = vpop.f32.mrb[34].mxu0  ;;  %3621 = vtanh.f32 %v1153_v18  ;;  %v1279_v18 = vmul.f32 0.125, %v4525_v6 }
 0x52f   : > { %v1157_v15 = vadd.f32 %v1156_v14, %v4475_v35  ;;  %v1158_v22 = vpop.f32.mrb[35].mxu0  ;;  %3246 = vmatprep.subr.bf16.mxu1 %v3245_v11  ;;  %v3612_v8 = vpop.eup %3611  ;;  %v1281_v11 = vmul.f32 0.125, %v4536_v36 }
 0x530   : > { %v1159_v21 = vadd.f32 %v1158_v22, %v4475_v35  ;;  %3248 = vmatpush1.bf16.msra.mxu1 %v3247_v19  ;;  %v3614_v42 = vpop.eup %3613  ;;  %v1280_v19 = vmul.f32 0.125, %v4532_v20 }
 0x531   : > { %3623 = vtanh.f32 %v1157_v15 }
 0x532   : > { %3625 = vtanh.f32 %v1159_v21  ;;  %v1162_v45 = vpop.f32.mrb[36].mxu0  ;;  %v2434_v21 = vmul.f32 -0.42857143, %v4536_v36 }
 0x533   : > { %v3616_v48 = vpop.eup %3615  ;;  %v1163_v24 = vadd.f32 %v1162_v45, %v4479_v46  ;;  %v1164_v26 = vpop.f32.mrb[37].mxu0  ;;  %v4674_v45 = vld [vmem:[%s4204_s11 + $0x8] sm:$0xff] }
 0x534   : > { %v3618_v27 = vpop.eup %3617  ;;  %v1165_v28 = vadd.f32 %v1164_v26, %v4479_v46  ;;  %v3251_v29 = vpack.c.bf16 %v3616_v48, %v3612_v8  ;;  %v1287_v48 = vadd.f32 %v4674_v45, %v1279_v18  ;;  %v1282_v26 = vmul.f32 0.125, %v4544_v49 }
 0x535   : > { %v3249_v30 = vpack.c.bf16 %v3618_v27, %v3614_v42  ;;  %3627 = vtanh.f32 %v1163_v24 }
 0x536   : > { %v1168_v51 = vpop.f32.mrb[38].mxu0  ;;  %3629 = vtanh.f32 %v1165_v28  ;;  %v4681_v28 = vld [vmem:[%s4204_s11 + $0x10] sm:$0xff] }
 0x537   : > { %v1169_v31 = vadd.f32 %v1168_v51, %v4483_v2  ;;  %v1170_v54 = vpop.f32.mrb[39].mxu0  ;;  %3250 = vmatprep.subr.bf16.mxu1 %v3249_v30  ;;  %v3620_v55 = vpop.eup %3619  ;;  %v2435_v51 = vmul.f32 -0.42857143, %v4544_v49 }
 0x538   : > { %v1171_v32 = vadd.f32 %v1170_v54, %v4483_v2  ;;  %3252 = vmatpush1.bf16.msra.mxu1 %v3251_v29  ;;  %v3622_v56 = vpop.eup %3621  ;;  %v1288_v29 = vadd.f32 %v4681_v28, %v1280_v19 }
 0x539   : > { %3631 = vtanh.f32 %v1169_v31 }
 0x53a   : > { %3633 = vtanh.f32 %v1171_v32  ;;  %v4687_v32 = vld [vmem:[%s4204_s11 + $0x18] sm:$0xff] }
 0x53b   : > { %v3624_v40 = vpop.eup %3623 }
 0x53c   : > { %v3626_v57 = vpop.eup %3625  ;;  %v3255_v16 = vpack.c.bf16 %v3624_v40, %v3620_v55  ;;  %v1289_v55 = vadd.f32 %v4687_v32, %v1281_v11 }
 0x53d   : > { %v3253_v23 = vpack.c.bf16 %v3626_v57, %v3622_v56  ;;  %v1283_v56 = vmul.f32 0.125, %v4548_v13 }
 0x53f   : > { %3254 = vmatprep.subr.bf16.mxu1 %v3253_v23  ;;  %v3628_v38 = vpop.eup %3627  ;;  %v2442_v23 = vadd.f32 %v4687_v32, %v2434_v21 }
 0x540   : > { %3256 = vmatpush1.bf16.msra.mxu1 %v3255_v16  ;;  %v3630_v12 = vpop.eup %3629 }
 0x543   : > { %v3632_v37 = vpop.eup %3631 }
 0x544   : > { %v3634_v44 = vpop.eup %3633  ;;  %v3259_v0 = vpack.c.bf16 %v3632_v37, %v3628_v38  ;;  %v2436_v38 = vmul.f32 -0.42857143, %v4548_v13 }
 0x545   : > { %v3257_v4 = vpack.c.bf16 %v3634_v44, %v3630_v12 }
 0x547   : > { %3258 = vmatprep.subr.bf16.mxu1 %v3257_v4  ;;  %v4697_v4 = vld [vmem:[%s4204_s11 + $0x20] sm:$0xff] }
 0x548   : > { %3260 = vmatpush1.bf16.msra.mxu1 %v3259_v0  ;;  %v2443_v19 = vadd.f32 %v4697_v4, %v2435_v51  ;;  %v5659_v51 = vld [vmem:[#allocation24_spill] sm:$0xff] }
 0x54b   : > { %3090 = vmatmul.mubr.msk.f32.vlgmr.msra.gmra.mrb[32].mxu1 %vm632_vm1, %v4490_v50  ;;  %v1278_v50 = vmul.f32 0.125, %v4522_v1 }
 0x54c   : > { %1259 = vmatprep.mubr.f32.mxu1 %v5658_v17 }
 0x54f   : > { %3091 = vmatmul.mubr.msk.f32.gmra.mrb[34].mxu1 %vm632_vm1, %v4498_v52  ;;  %v2432_v52 = vmul.f32 -0.42857143, %v4525_v6 }
 0x550   : > { %1265 = vmatprep.mubr.f32.mxu1 %v5658_v17 }
 0x551   : > { %v2440_v24 = vadd.f32 %v4674_v45, %v2432_v52 }
 0x553   : > { %3092 = vmatmul.mubr.msk.f32.gmra.mrb[36].mxu1 %vm632_vm1, %v4506_v53  ;;  %v2433_v53 = vmul.f32 -0.42857143, %v4532_v20 }
 0x554   : > { %1271 = vmatprep.mubr.f32.mxu1 %v5658_v17 }
 0x555   : > { %v2441_v30 = vadd.f32 %v4681_v28, %v2433_v53 }
 0x557   : > { %3093 = vmatmul.mubr.msk.f32.gmra.mrb[38].mxu1 %vm632_vm1, %v4514_v61  ;;  %v4667_v61 = vld [vmem:[%s4204_s11] sm:$0xff] }
 0x558   : > { %1511 = vmatprep.mubr.f32.mxu1 %v5658_v17  ;;  %v1286_v15 = vadd.f32 %v4667_v61, %v1278_v50  ;;  %v2439_v22 = vadd.f32 %v4667_v61, %v2431_v7  ;;  %v1290_v50 = vadd.f32 %v4697_v4, %v1282_v26 }
 0x61e   : > { %v1255_v14 = vpop.f32.mrb[32].mxu1 }
 0x61f   : > { %v1256_v8 = vadd.f32 %v1255_v14, %v4519_v62  ;;  %v1257_v42 = vpop.f32.mrb[33].mxu1  ;;  %v4705_v14 = vld [vmem:[%s4204_s11 + $0x28] sm:$0xff] }
 0x620   : > { %v1258_v27 = vadd.f32 %v1257_v42, %v4519_v62  ;;  %v2444_v26 = vadd.f32 %v4705_v14, %v2436_v38  ;;  %v5661_v38 = vld [vmem:[#allocation26_spill] sm:$0xff] }
 0x621   : > { %v1294_v31 = vmul.f32 0.125, %v1256_v8  ;;  %v2447_v54 = vmul.f32 0.2857143, %v1256_v8 }
 0x622   : > { %v1295_v40 = vmul.f32 0.125, %v1258_v27  ;;  %v2448_v57 = vmul.f32 0.2857143, %v1258_v27  ;;  %v1261_v16 = vpop.f32.mrb[34].mxu1 }
 0x623   : > { %v1302_v12 = vadd.f32 %v1294_v31, %v1286_v15  ;;  %v4693_v37 = vadd.f32 %v2447_v54, %v2439_v22  ;;  %v1262_v44 = vadd.f32 %v1261_v16, %v4528_v9  ;;  %v1263_v0 = vpop.f32.mrb[35].mxu1  ;;  %v1291_v15 = vadd.f32 %v4705_v14, %v1283_v56 }
 0x624   : > { %v1303_v7 = vadd.f32 %v1295_v40, %v1287_v48  ;;  %v4700_v18 = vadd.f32 %v2448_v57, %v2440_v24  ;;  %v1264_v52 = vadd.f32 %v1263_v0, %v4528_v9  ;;  %v1284_v22 = vmul.f32 0.125, %v4556_v43 }
 0x625   : > { %v1296_v53 = vmul.f32 0.125, %v1262_v44  ;;  %v2449_v11 = vmul.f32 0.2857143, %v1262_v44  ;;  %v2437_v48 = vmul.f32 -0.42857143, %v4556_v43  ;;  %3635 = vtanh.f32 %v1302_v12 }
 0x626   : > { %v1297_v21 = vmul.f32 0.125, %v1264_v52  ;;  %v2450_v8 = vmul.f32 0.2857143, %v1264_v52  ;;  %v1267_v42 = vpop.f32.mrb[36].mxu1  ;;  %3637 = vtanh.f32 %v1303_v7  ;;  %v1285_v0 = vmul.f32 0.125, %v5661_v38 }
 0x627   : > { %v1304_v24 = vadd.f32 %v1296_v53, %v1288_v29  ;;  %v4711_v27 = vadd.f32 %v2449_v11, %v2441_v30  ;;  %v1268_v31 = vadd.f32 %v1267_v42, %v5659_v51  ;;  %v1269_v54 = vpop.f32.mrb[37].mxu1  ;;  %v2438_v52 = vmul.f32 -0.42857143, %v5661_v38 }
 0x628   : > { %v1305_v40 = vadd.f32 %v1297_v21, %v1289_v55  ;;  %v4714_v57 = vadd.f32 %v2450_v8, %v2442_v23  ;;  %v1270_v56 = vadd.f32 %v1269_v54, %v5659_v51  ;;  %v5662_v55 = vld [vmem:[#allocation25_spill] sm:$0xff] }
 0x629   : > { %3639 = vtanh.f32 %v1304_v24  ;;  %v1298_v16 = vmul.f32 0.125, %v1268_v31  ;;  %v2451_v44 = vmul.f32 0.2857143, %v1268_v31  ;;  %v4726_v24 = vld [vmem:[%s4204_s11 + $0x30] sm:$0xff] }
 0x62a   : > { %5660 = vst [vmem:[#allocation24_spill] sm:$0xff] %v4714_v57  ;;  %3641 = vtanh.f32 %v1305_v40  ;;  %v1299_v12 = vmul.f32 0.125, %v1270_v56  ;;  %v2452_v29 = vmul.f32 0.2857143, %v1270_v56  ;;  %v1273_v30 = vpop.f32.mrb[38].mxu1  ;;  %v1292_v31 = vadd.f32 %v4726_v24, %v1284_v22  ;;  %v4731_v57 = vld [vmem:[%s4204_s11 + $0x38] sm:$0xff] }
 0x62b   : > { %v1306_v53 = vadd.f32 %v1298_v16, %v1290_v50  ;;  %v4719_v7 = vadd.f32 %v2451_v44, %v2443_v19  ;;  %v1274_v23 = vadd.f32 %v1273_v30, %v5662_v55  ;;  %v1275_v11 = vpop.f32.mrb[39].mxu1  ;;  %v2445_v40 = vadd.f32 %v4726_v24, %v2437_v48 }
 0x62c   : > { %v1307_v21 = vadd.f32 %v1299_v12, %v1291_v15  ;;  %v4722_v8 = vadd.f32 %v2452_v29, %v2444_v26  ;;  %v1276_v42 = vadd.f32 %v1275_v11, %v5662_v55  ;;  %v1293_v50 = vadd.f32 %v4731_v57, %v1285_v0 }
 0x62d   : > { %v1300_v54 = vmul.f32 0.125, %v1274_v23  ;;  %v2453_v56 = vmul.f32 0.2857143, %v1274_v23  ;;  %v2446_v16 = vadd.f32 %v4731_v57, %v2438_v52  ;;  %3643 = vtanh.f32 %v1306_v53 }
 0x62e   : > { %v1301_v19 = vmul.f32 0.125, %v1276_v42  ;;  %v2454_v15 = vmul.f32 0.2857143, %v1276_v42  ;;  %3645 = vtanh.f32 %v1307_v21  ;;  %v4742_v21 = vld [vmem:[%s5572_s2] sm:$0xff] }
 0x62f   : > { %v1308_v26 = vadd.f32 %v1300_v54, %v1292_v31  ;;  %v4735_v44 = vadd.f32 %v2453_v56, %v2445_v40  ;;  %v3636_v22 = vpop.eup %3635  ;;  %v4750_v56 = vld [vmem:[%s5572_s2 + $0x8] sm:$0xff] }
 0x630   : > { %v1309_v12 = vadd.f32 %v1301_v19, %v1293_v50  ;;  %v4737_v29 = vadd.f32 %v2454_v15, %v2446_v16  ;;  %v3638_v48 = vpop.eup %3637  ;;  %v4758_v50 = vld [vmem:[%s5572_s2 + $0x10] sm:$0xff]  ;;  %v4766_v19 = vld [vmem:[%s5572_s2 + $0x18] sm:$0xff]  ;;  %v4774_v16 = vld [vmem:[%s5572_s2 + $0x20] sm:$0xff] }
 0x631   : > { %3647 = vtanh.f32 %v1308_v26  ;;  %v4782_v15 = vld [vmem:[%s5572_s2 + $0x28] sm:$0xff]  ;;  %v4790_v26 = vld [vmem:[%s5572_s2 + $0x30] sm:$0xff] }
 0x632   : > { %3649 = vtanh.f32 %v1309_v12  ;;  %v4798_v12 = vld [vmem:[%s5572_s2 + $0x38] sm:$0xff] }
 0x633   : > { %v3640_v30 = vpop.eup %3639  ;;  %5663 = vst [vmem:[#allocation26_spill] sm:$0xff] %v4798_v12 }
 0x634   : > { %v3642_v23 = vpop.eup %3641  ;;  %v3263_v11 = vpack.c.bf16 %v3640_v30, %v3636_v22 }
 0x635   : > { %v3261_v0 = vpack.c.bf16 %v3642_v23, %v3638_v48 }
 0x637   : > { %3262 = vmatprep.subr.bf16.mxu0 %v3261_v0  ;;  %v3644_v52 = vpop.eup %3643 }
 0x638   : > { %3264 = vmatpush1.bf16.msra.mxu0 %v3263_v11  ;;  %v3646_v42 = vpop.eup %3645 }
 0x63b   : > { %v3648_v53 = vpop.eup %3647 }
 0x63c   : > { %v3650_v31 = vpop.eup %3649  ;;  %v3267_v54 = vpack.c.bf16 %v3648_v53, %v3644_v52 }
 0x63d   : > { %v3265_v40 = vpack.c.bf16 %v3650_v31, %v3646_v42 }
 0x63f   : > { %3266 = vmatprep.subr.bf16.mxu0 %v3265_v40 }
 0x640   : > { %3268 = vmatpush1.bf16.msra.mxu0 %v3267_v54 }
 0x643   : > { %3094 = vmatmul.mubr.msk.f32.vlgmr.msra.gmra.mrb[40].mxu0 %vm438_vm0, %v4742_v21 }
 0x644   : > { %1388 = vmatprep.mubr.f32.mxu0 %v5658_v17 }
 0x647   : > { %3095 = vmatmul.mubr.msk.f32.gmra.mrb[42].mxu0 %vm438_vm0, %v4750_v56 }
 0x648   : > { %1394 = vmatprep.mubr.f32.mxu0 %v5658_v17 }
 0x64b   : > { %3096 = vmatmul.mubr.msk.f32.gmra.mrb[44].mxu0 %vm438_vm0, %v4758_v50 }
 0x64c   : > { %1400 = vmatprep.mubr.f32.mxu0 %v5658_v17 }
 0x64f   : > { %3097 = vmatmul.mubr.msk.f32.gmra.mrb[46].mxu0 %vm438_vm0, %v4766_v19 }
 0x650   : > { %1406 = vmatprep.mubr.f32.mxu0 %v5658_v17 }
 0x653   : > { %3098 = vmatmul.mubr.msk.f32.gmra.mrb[48].mxu0 %vm438_vm0, %v4774_v16 }
 0x654   : > { %1412 = vmatprep.mubr.f32.mxu0 %v5658_v17 }
 0x657   : > { %3099 = vmatmul.mubr.msk.f32.gmra.mrb[50].mxu0 %vm438_vm0, %v4782_v15 }
 0x658   : > { %1418 = vmatprep.mubr.f32.mxu0 %v5658_v17 }
 0x65b   : > { %3100 = vmatmul.mubr.msk.f32.gmra.mrb[52].mxu0 %vm438_vm0, %v4790_v26 }
 0x65c   : > { %1424 = vmatprep.mubr.f32.mxu0 %v5658_v17 }
 0x65f   : > { %3101 = vmatmul.mubr.msk.f32.gmra.mrb[54].mxu0 %vm438_vm0, %v4798_v12 }
 0x660   : > { %1640 = vmatprep.mubr.f32.mxu0 %v5658_v17 }
 0x716   : > { %v1384_v22 = vpop.f32.mrb[40].mxu0 }
 0x717   : > { %v1385_v48 = vadd.f32 %v1384_v22, %v4359_v58  ;;  %v1386_v30 = vpop.f32.mrb[41].mxu0 }
 0x718   : > { %v1387_v23 = vadd.f32 %v1386_v30, %v4359_v58 }
 0x719   : > { %3651 = vtanh.f32 %v1385_v48 }
 0x71a   : > { %v1390_v11 = vpop.f32.mrb[42].mxu0  ;;  %3653 = vtanh.f32 %v1387_v23 }
 0x71b   : > { %v1391_v0 = vadd.f32 %v1390_v11, %v4363_v63  ;;  %v1392_v52 = vpop.f32.mrb[43].mxu0 }
 0x71c   : > { %v1393_v42 = vadd.f32 %v1392_v52, %v4363_v63 }
 0x71d   : > { %3655 = vtanh.f32 %v1391_v0 }
 0x71e   : > { %3657 = vtanh.f32 %v1393_v42  ;;  %v1396_v53 = vpop.f32.mrb[44].mxu0 }
 0x71f   : > { %v1397_v31 = vadd.f32 %v1396_v53, %v4366_v3  ;;  %v1398_v54 = vpop.f32.mrb[45].mxu0 }
 0x720   : > { %v1399_v40 = vadd.f32 %v1398_v54, %v4366_v3 }
 0x721   : > { %3659 = vtanh.f32 %v1397_v31 }
 0x722   : > { %v1402_v22 = vpop.f32.mrb[46].mxu0  ;;  %3661 = vtanh.f32 %v1399_v40 }
 0x723   : > { %v1403_v30 = vadd.f32 %v1402_v22, %v4371_v10  ;;  %v1404_v58 = vpop.f32.mrb[47].mxu0  ;;  %v3652_v11 = vpop.eup %3651 }
 0x724   : > { %v1405_v48 = vadd.f32 %v1404_v58, %v4371_v10  ;;  %v3654_v23 = vpop.eup %3653 }
 0x725   : > { %3663 = vtanh.f32 %v1403_v30 }
 0x726   : > { %3665 = vtanh.f32 %v1405_v48  ;;  %v1408_v0 = vpop.f32.mrb[48].mxu0 }
 0x727   : > { %v3656_v52 = vpop.eup %3655  ;;  %v1409_v42 = vadd.f32 %v1408_v0, %v4375_v25  ;;  %v1410_v53 = vpop.f32.mrb[49].mxu0 }
 0x728   : > { %v3658_v63 = vpop.eup %3657  ;;  %v1411_v54 = vadd.f32 %v1410_v53, %v4375_v25  ;;  %v3271_v3 = vpack.c.bf16 %v3656_v52, %v3652_v11 }
 0x729   : > { %v3269_v31 = vpack.c.bf16 %v3658_v63, %v3654_v23  ;;  %3667 = vtanh.f32 %v1409_v42 }
 0x72a   : > { %v1414_v12 = vpop.f32.mrb[50].mxu0  ;;  %3669 = vtanh.f32 %v1411_v54 }
 0x72b   : > { %v1415_v40 = vadd.f32 %v1414_v12, %v4379_v34  ;;  %v1416_v22 = vpop.f32.mrb[51].mxu0  ;;  %3270 = vmatprep.subr.bf16.mxu1 %v3269_v31  ;;  %v3660_v30 = vpop.eup %3659 }
 0x72c   : > { %v1417_v58 = vadd.f32 %v1416_v22, %v4379_v34  ;;  %3272 = vmatpush1.bf16.msra.mxu1 %v3271_v3  ;;  %v3662_v48 = vpop.eup %3661 }
 0x72d   : > { %3671 = vtanh.f32 %v1415_v40 }
 0x72e   : > { %3673 = vtanh.f32 %v1417_v58  ;;  %v1420_v0 = vpop.f32.mrb[52].mxu0 }
 0x72f   : > { %v3664_v10 = vpop.eup %3663  ;;  %v1421_v53 = vadd.f32 %v1420_v0, %v4383_v41  ;;  %v1422_v11 = vpop.f32.mrb[53].mxu0 }
 0x730   : > { %v3666_v63 = vpop.eup %3665  ;;  %v1423_v23 = vadd.f32 %v1422_v11, %v4383_v41  ;;  %v3275_v52 = vpack.c.bf16 %v3664_v10, %v3660_v30 }
 0x731   : > { %v3273_v12 = vpack.c.bf16 %v3666_v63, %v3662_v48  ;;  %3675 = vtanh.f32 %v1421_v53 }
 0x732   : > { %v1426_v42 = vpop.f32.mrb[54].mxu0  ;;  %3677 = vtanh.f32 %v1423_v23  ;;  %v4822_v23 = vld [vmem:[%s5573_s3] sm:$0xff] }
 0x733   : > { %v1427_v54 = vadd.f32 %v1426_v42, %v4387_v59  ;;  %v1428_v31 = vpop.f32.mrb[55].mxu0  ;;  %3274 = vmatprep.subr.bf16.mxu1 %v3273_v12  ;;  %v3668_v40 = vpop.eup %3667  ;;  %v4846_v42 = vld [vmem:[%s5573_s3 + $0x18] sm:$0xff] }
 0x734   : > { %v1429_v3 = vadd.f32 %v1428_v31, %v4387_v59  ;;  %3276 = vmatpush1.bf16.msra.mxu1 %v3275_v52  ;;  %v3670_v22 = vpop.eup %3669  ;;  %v4838_v52 = vld [vmem:[%s5573_s3 + $0x10] sm:$0xff]  ;;  %v4862_v31 = vld [vmem:[%s5573_s3 + $0x28] sm:$0xff] }
 0x735   : > { %3679 = vtanh.f32 %v1427_v54  ;;  %v4854_v54 = vld [vmem:[%s5573_s3 + $0x20] sm:$0xff]  ;;  %5664 = vst [vmem:[#allocation25_spill] sm:$0xff] %v4862_v31 }
 0x736   : > { %3681 = vtanh.f32 %v1429_v3  ;;  %v4870_v3 = vld [vmem:[%s5573_s3 + $0x30] sm:$0xff] }
 0x737   : > { %v3672_v58 = vpop.eup %3671  ;;  %5665 = vst [vmem:[#allocation27_spill] sm:$0xff] %v4870_v3 }
 0x738   : > { %v3674_v0 = vpop.eup %3673  ;;  %v3279_v34 = vpack.c.bf16 %v3672_v58, %v3668_v40  ;;  %v4878_v40 = vld [vmem:[%s5573_s3 + $0x38] sm:$0xff] }
 0x739   : > { %v3277_v11 = vpack.c.bf16 %v3674_v0, %v3670_v22  ;;  %5666 = vst [vmem:[#allocation28_spill] sm:$0xff] %v4878_v40 }
 0x73b   : > { %3278 = vmatprep.subr.bf16.mxu1 %v3277_v11  ;;  %v3676_v10 = vpop.eup %3675 }
 0x73c   : > { %3280 = vmatpush1.bf16.msra.mxu1 %v3279_v34  ;;  %v3678_v30 = vpop.eup %3677  ;;  %v4830_v34 = vld [vmem:[%s5573_s3 + $0x8] sm:$0xff] }
 0x73f   : > { %v3680_v48 = vpop.eup %3679 }
 0x740   : > { %v3682_v53 = vpop.eup %3681  ;;  %v3283_v63 = vpack.c.bf16 %v3680_v48, %v3676_v10 }
 0x741   : > { %v3281_v12 = vpack.c.bf16 %v3682_v53, %v3678_v30 }
 0x743   : > { %3282 = vmatprep.subr.bf16.mxu1 %v3281_v12 }
 0x744   : > { %3284 = vmatpush1.bf16.msra.mxu1 %v3283_v63 }
 0x747   : > { %3102 = vmatmul.mubr.msk.f32.vlgmr.msra.gmra.mrb[40].mxu1 %vm632_vm1, %v4822_v23 }
 0x748   : > { %1517 = vmatprep.mubr.f32.mxu1 %v5658_v17 }
 0x74b   : > { %3103 = vmatmul.mubr.msk.f32.gmra.mrb[42].mxu1 %vm632_vm1, %v4830_v34 }
 0x74c   : > { %1523 = vmatprep.mubr.f32.mxu1 %v5658_v17 }
 0x74f   : > { %3104 = vmatmul.mubr.msk.f32.gmra.mrb[44].mxu1 %vm632_vm1, %v4838_v52 }
 0x750   : > { %1529 = vmatprep.mubr.f32.mxu1 %v5658_v17 }
 0x753   : > { %3105 = vmatmul.mubr.msk.f32.gmra.mrb[46].mxu1 %vm632_vm1, %v4846_v42 }
 0x754   : > { %1535 = vmatprep.mubr.f32.mxu1 %v5658_v17 }
 0x757   : > { %3106 = vmatmul.mubr.msk.f32.gmra.mrb[48].mxu1 %vm632_vm1, %v4854_v54 }
 0x758   : > { %1541 = vmatprep.mubr.f32.mxu1 %v5658_v17 }
 0x75b   : > { %3107 = vmatmul.mubr.msk.f32.gmra.mrb[50].mxu1 %vm632_vm1, %v4862_v31 }
 0x75c   : > { %1547 = vmatprep.mubr.f32.mxu1 %v5658_v17 }
 0x75f   : > { %3108 = vmatmul.mubr.msk.f32.gmra.mrb[52].mxu1 %vm632_vm1, %v4870_v3 }
 0x760   : > { %1553 = vmatprep.mubr.f32.mxu1 %v5658_v17 }
 0x763   : > { %3109 = vmatmul.mubr.msk.f32.gmra.mrb[54].mxu1 %vm632_vm1, %v4878_v40 }
 0x764   : > { %1761 = vmatprep.mubr.f32.mxu1 %v5658_v17 }
 0x81a   : > { %v1513_v22 = vpop.f32.mrb[40].mxu1 }
 0x81b   : > { %v1514_v58 = vadd.f32 %v1513_v22, %v4455_v33  ;;  %v1515_v0 = vpop.f32.mrb[41].mxu1 }
 0x81c   : > { %v1516_v11 = vadd.f32 %v1515_v0, %v4455_v33 }
 0x81d   : > { %3683 = vtanh.f32 %v1514_v58 }
 0x81e   : > { %v1519_v10 = vpop.f32.mrb[42].mxu1  ;;  %3685 = vtanh.f32 %v1516_v11 }
 0x81f   : > { %v1520_v30 = vadd.f32 %v1519_v10, %v4459_v39  ;;  %v1521_v48 = vpop.f32.mrb[43].mxu1 }
 0x820   : > { %v1522_v53 = vadd.f32 %v1521_v48, %v4459_v39 }
 0x821   : > { %3687 = vtanh.f32 %v1520_v30 }
 0x822   : > { %3689 = vtanh.f32 %v1522_v53  ;;  %v1525_v63 = vpop.f32.mrb[44].mxu1 }
 0x823   : > { %v1526_v12 = vadd.f32 %v1525_v63, %v4463_v47  ;;  %v1527_v40 = vpop.f32.mrb[45].mxu1 }
 0x824   : > { %v1528_v3 = vadd.f32 %v1527_v40, %v4463_v47 }
 0x825   : > { %3691 = vtanh.f32 %v1526_v12 }
 0x826   : > { %v1531_v22 = vpop.f32.mrb[46].mxu1  ;;  %3693 = vtanh.f32 %v1528_v3 }
 0x827   : > { %v1532_v0 = vadd.f32 %v1531_v22, %v4467_v60  ;;  %v1533_v33 = vpop.f32.mrb[47].mxu1  ;;  %v3684_v10 = vpop.eup %3683 }
 0x828   : > { %v1534_v58 = vadd.f32 %v1533_v33, %v4467_v60  ;;  %v3686_v11 = vpop.eup %3685 }
 0x829   : > { %3695 = vtanh.f32 %v1532_v0 }
 0x82a   : > { %3697 = vtanh.f32 %v1534_v58  ;;  %v1537_v30 = vpop.f32.mrb[48].mxu1 }
 0x82b   : > { %v3688_v48 = vpop.eup %3687  ;;  %v1538_v53 = vadd.f32 %v1537_v30, %v4471_v5  ;;  %v1539_v63 = vpop.f32.mrb[49].mxu1 }
 0x82c   : > { %v3690_v39 = vpop.eup %3689  ;;  %v1540_v40 = vadd.f32 %v1539_v63, %v4471_v5  ;;  %v3287_v47 = vpack.c.bf16 %v3688_v48, %v3684_v10 }
 0x82d   : > { %v3285_v12 = vpack.c.bf16 %v3690_v39, %v3686_v11  ;;  %3699 = vtanh.f32 %v1538_v53 }
 0x82e   : > { %v1543_v31 = vpop.f32.mrb[50].mxu1  ;;  %3701 = vtanh.f32 %v1540_v40 }
 0x82f   : > { %v1544_v3 = vadd.f32 %v1543_v31, %v4475_v35  ;;  %v1545_v22 = vpop.f32.mrb[51].mxu1  ;;  %3286 = vmatprep.subr.bf16.mxu0 %v3285_v12  ;;  %v3692_v0 = vpop.eup %3691 }
 0x830   : > { %v1546_v33 = vadd.f32 %v1545_v22, %v4475_v35  ;;  %3288 = vmatpush1.bf16.msra.mxu0 %v3287_v47  ;;  %v3694_v58 = vpop.eup %3693 }
 0x831   : > { %3703 = vtanh.f32 %v1544_v3 }
 0x832   : > { %3705 = vtanh.f32 %v1546_v33  ;;  %v1549_v30 = vpop.f32.mrb[52].mxu1 }
 0x833   : > { %v3696_v60 = vpop.eup %3695  ;;  %v1550_v63 = vadd.f32 %v1549_v30, %v4479_v46  ;;  %v1551_v10 = vpop.f32.mrb[53].mxu1 }
 0x834   : > { %v3698_v39 = vpop.eup %3697  ;;  %v1552_v11 = vadd.f32 %v1551_v10, %v4479_v46  ;;  %v3291_v48 = vpack.c.bf16 %v3696_v60, %v3692_v0 }
 0x835   : > { %v3289_v31 = vpack.c.bf16 %v3698_v39, %v3694_v58  ;;  %3707 = vtanh.f32 %v1550_v63 }
 0x836   : > { %v1555_v53 = vpop.f32.mrb[54].mxu1  ;;  %3709 = vtanh.f32 %v1552_v11  ;;  %v4902_v11 = vld [vmem:[%s5574_s4] sm:$0xff] }
 0x837   : > { %v1556_v40 = vadd.f32 %v1555_v53, %v4483_v2  ;;  %v1557_v12 = vpop.f32.mrb[55].mxu1  ;;  %3290 = vmatprep.subr.bf16.mxu0 %v3289_v31  ;;  %v3700_v3 = vpop.eup %3699  ;;  %5667 = vst [vmem:[#allocation29_spill] sm:$0xff] %v4902_v11  ;;  %v4926_v53 = vld [vmem:[%s5574_s4 + $0x18] sm:$0xff] }
 0x838   : > { %v1558_v47 = vadd.f32 %v1557_v12, %v4483_v2  ;;  %3292 = vmatpush1.bf16.msra.mxu0 %v3291_v48  ;;  %v3702_v22 = vpop.eup %3701  ;;  %v4918_v48 = vld [vmem:[%s5574_s4 + $0x10] sm:$0xff]  ;;  %5670 = vst [vmem:[#allocation32_spill] sm:$0xff] %v4926_v53  ;;  %v1666_v12 = vmul.f32 0.5, %v4525_v6 }
 0x839   : > { %3711 = vtanh.f32 %v1556_v40  ;;  %5669 = vst [vmem:[#allocation31_spill] sm:$0xff] %v4918_v48  ;;  %v1665_v40 = vmul.f32 0.5, %v4522_v1 }
 0x83a   : > { %3713 = vtanh.f32 %v1558_v47  ;;  %v1667_v47 = vmul.f32 0.5, %v4532_v20 }
 0x83b   : > { %v3704_v33 = vpop.eup %3703 }
 0x83c   : > { %v3706_v30 = vpop.eup %3705  ;;  %v3295_v35 = vpack.c.bf16 %v3704_v33, %v3700_v3  ;;  %v1668_v3 = vmul.f32 0.5, %v4536_v36  ;;  %v2866_v33 = vmul.f32 7.0, %v4522_v1 }
 0x83d   : > { %v3293_v10 = vpack.c.bf16 %v3706_v30, %v3702_v22  ;;  %v1673_v22 = vsub.f32 %v4667_v61, %v1665_v40  ;;  %v1670_v61 = vmul.f32 0.5, %v4548_v13 }
 0x83e   : > { %v1676_v1 = vsub.f32 %v4687_v32, %v1668_v3 }
 0x83f   : > { %3294 = vmatprep.subr.bf16.mxu0 %v3293_v10  ;;  %v3708_v60 = vpop.eup %3707  ;;  %v1674_v10 = vsub.f32 %v4674_v45, %v1666_v12  ;;  %v2870_v45 = vmul.f32 7.0, %v4544_v49  ;;  %v2871_v12 = vmul.f32 7.0, %v4548_v13 }
 0x840   : > { %3296 = vmatpush1.bf16.msra.mxu0 %v3295_v35  ;;  %v3710_v0 = vpop.eup %3709  ;;  %v4910_v35 = vld [vmem:[%s5574_s4 + $0x8] sm:$0xff] }
 0x841   : > { %5668 = vst [vmem:[#allocation30_spill] sm:$0xff] %v4910_v35 }
 0x843   : > { %v3712_v58 = vpop.eup %3711 }
 0x844   : > { %v3714_v63 = vpop.eup %3713  ;;  %v3299_v39 = vpack.c.bf16 %v3712_v58, %v3708_v60  ;;  %v2867_v60 = vmul.f32 7.0, %v4525_v6  ;;  %v1669_v58 = vmul.f32 0.5, %v4544_v49 }
 0x845   : > { %v3297_v31 = vpack.c.bf16 %v3714_v63, %v3710_v0  ;;  %v2868_v0 = vmul.f32 7.0, %v4532_v20 }
 0x847   : > { %3298 = vmatprep.subr.bf16.mxu0 %v3297_v31  ;;  %v1675_v31 = vsub.f32 %v4681_v28, %v1667_v47 }
 0x848   : > { %3300 = vmatpush1.bf16.msra.mxu0 %v3299_v39 }
 0x84b   : > { %3110 = vmatmul.mubr.msk.f32.vlgmr.msra.gmra.mrb[56].mxu0 %vm632_vm1, %v4902_v11 }
 0x84c   : > { %1646 = vmatprep.mubr.f32.mxu0 %v5658_v17 }
 0x84f   : > { %3111 = vmatmul.mubr.msk.f32.gmra.mrb[58].mxu0 %vm632_vm1, %v4910_v35 }
 0x850   : > { %1652 = vmatprep.mubr.f32.mxu0 %v5658_v17 }
 0x853   : > { %3112 = vmatmul.mubr.msk.f32.gmra.mrb[60].mxu0 %vm632_vm1, %v4918_v48 }
 0x854   : > { %1658 = vmatprep.mubr.f32.mxu0 %v5658_v17 }
 0x857   : > { %3113 = vmatmul.mubr.msk.f32.gmra.mrb[62].mxu0 %vm632_vm1, %v4926_v53  ;;  %v2869_v53 = vmul.f32 7.0, %v4536_v36  ;;  %v1677_v36 = vsub.f32 %v4697_v4, %v1669_v58 }
 0x858   : > { %1890 = vmatprep.mubr.f32.mxu0 %v5658_v17 }
 0x91e   : > { %v1642_v30 = vpop.f32.mrb[56].mxu0 }
 0x91f   : > { %v1643_v63 = vadd.f32 %v1642_v30, %v4519_v62  ;;  %v1644_v39 = vpop.f32.mrb[57].mxu0  ;;  %v1671_v30 = vmul.f32 0.5, %v4556_v43 }
 0x920   : > { %v1645_v40 = vadd.f32 %v1644_v39, %v4519_v62 }
 0x921   : > { %v1681_v20 = vadd.f32 %v1673_v22, %v1643_v63  ;;  %v2463_v6 = vmul.f32 1.7142857, %v1643_v63  ;;  %v2874_v48 = vmul.f32 32.0, %v1643_v63  ;;  %v1678_v22 = vsub.f32 %v4705_v14, %v1670_v61  ;;  %v5671_v61 = vld [vmem:[#allocation24_spill] sm:$0xff] }
 0x922   : > { %v1682_v35 = vadd.f32 %v1674_v10, %v1645_v40  ;;  %v2464_v11 = vmul.f32 1.7142857, %v1645_v40  ;;  %v2875_v28 = vmul.f32 32.0, %v1645_v40  ;;  %v1648_v47 = vpop.f32.mrb[58].mxu0  ;;  %v1672_v40 = vmul.f32 0.5, %v5661_v38 }
 0x923   : > { %v4952_v2 = vadd.f32 %v2463_v6, %v4693_v37  ;;  %v4954_v39 = vadd.f32 %v2874_v48, %v2866_v33  ;;  %v1649_v32 = vadd.f32 %v1648_v47, %v4528_v9  ;;  %v1650_v3 = vpop.f32.mrb[59].mxu0  ;;  %3715 = vtanh.f32 %v1681_v20 }
 0x924   : > { %v4959_v63 = vadd.f32 %v2464_v11, %v4700_v18  ;;  %v4961_v62 = vadd.f32 %v2875_v28, %v2867_v60  ;;  %v1651_v10 = vadd.f32 %v1650_v3, %v4528_v9  ;;  %3717 = vtanh.f32 %v1682_v35 }
 0x925   : > { %v1683_v4 = vadd.f32 %v1675_v31, %v1649_v32  ;;  %v2465_v6 = vmul.f32 1.7142857, %v1649_v32  ;;  %v2876_v37 = vmul.f32 32.0, %v1649_v32  ;;  %v2872_v3 = vmul.f32 7.0, %v4556_v43 }
 0x926   : > { %v1684_v48 = vadd.f32 %v1676_v1, %v1651_v10  ;;  %v2466_v33 = vmul.f32 1.7142857, %v1651_v10  ;;  %v2877_v58 = vmul.f32 32.0, %v1651_v10  ;;  %v1654_v47 = vpop.f32.mrb[60].mxu0 }
 0x927   : > { %3719 = vtanh.f32 %v1683_v4  ;;  %v4966_v14 = vadd.f32 %v2465_v6, %v4711_v27  ;;  %v4968_v18 = vadd.f32 %v2876_v37, %v2868_v0  ;;  %v1655_v11 = vadd.f32 %v1654_v47, %v5659_v51  ;;  %v1656_v60 = vpop.f32.mrb[61].mxu0 }
 0x928   : > { %3721 = vtanh.f32 %v1684_v48  ;;  %v4972_v20 = vadd.f32 %v2466_v33, %v5671_v61  ;;  %v4974_v31 = vadd.f32 %v2877_v58, %v2869_v53  ;;  %v1657_v1 = vadd.f32 %v1656_v60, %v5659_v51 }
 0x929   : > { %v1685_v35 = vadd.f32 %v1677_v36, %v1655_v11  ;;  %v2467_v28 = vmul.f32 1.7142857, %v1655_v11  ;;  %v2878_v32 = vmul.f32 32.0, %v1655_v11  ;;  %v1679_v6 = vsub.f32 %v4726_v24, %v1671_v30 }
 0x92a   : > { %v1686_v27 = vadd.f32 %v1678_v22, %v1657_v1  ;;  %v2468_v10 = vmul.f32 1.7142857, %v1657_v1  ;;  %v2879_v0 = vmul.f32 32.0, %v1657_v1  ;;  %v1660_v4 = vpop.f32.mrb[62].mxu0  ;;  %v2873_v36 = vmul.f32 7.0, %v5661_v38 }
 0x92b   : > { %v4980_v37 = vadd.f32 %v2467_v28, %v4719_v7  ;;  %v4982_v48 = vadd.f32 %v2878_v32, %v2870_v45  ;;  %v1661_v53 = vadd.f32 %v1660_v4, %v5662_v55  ;;  %v1662_v33 = vpop.f32.mrb[63].mxu0  ;;  %v1680_v11 = vsub.f32 %v4731_v57, %v1672_v40 }
 0x92c   : > { %v4987_v58 = vadd.f32 %v2468_v10, %v4722_v8  ;;  %v4989_v47 = vadd.f32 %v2879_v0, %v2871_v12  ;;  %v1663_v22 = vadd.f32 %v1662_v33, %v5662_v55  ;;  %3723 = vtanh.f32 %v1685_v35 }
 0x92d   : > { %v1687_v24 = vadd.f32 %v1679_v6, %v1661_v53  ;;  %v2469_v7 = vmul.f32 1.7142857, %v1661_v53  ;;  %v2880_v30 = vmul.f32 32.0, %v1661_v53  ;;  %3725 = vtanh.f32 %v1686_v27  ;;  %v3716_v1 = vpop.eup %3715 }
 0x92e   : > { %v1688_v45 = vadd.f32 %v1680_v11, %v1663_v22  ;;  %v2470_v60 = vmul.f32 1.7142857, %v1663_v22  ;;  %v2881_v61 = vmul.f32 32.0, %v1663_v22  ;;  %v3718_v12 = vpop.eup %3717 }
 0x92f   : > { %3727 = vtanh.f32 %v1687_v24  ;;  %v4994_v28 = vadd.f32 %v2469_v7, %v4735_v44  ;;  %v4996_v8 = vadd.f32 %v2880_v30, %v2872_v3  ;;  %v5675_v24 = vld [vmem:[#allocation9_spill] sm:$0xff] }
 0x930   : > { %3729 = vtanh.f32 %v1688_v45  ;;  %v4999_v32 = vadd.f32 %v2470_v60, %v4737_v29  ;;  %v5001_v57 = vadd.f32 %v2881_v61, %v2873_v36  ;;  %v5672_v29 = vld [vmem:[#allocation26_spill] sm:$0xff] }
 0x931   : > { %v3720_v40 = vpop.eup %3719  ;;  %v5676_v61 = vld [vmem:[#allocation10_spill] sm:$0xff] }
 0x932   : > { %v3722_v35 = vpop.eup %3721  ;;  %v3303_v27 = vpack.c.bf16 %v3720_v40, %v3716_v1 }
 0x933   : > { %v3301_v10 = vpack.c.bf16 %v3722_v35, %v3718_v12 }
 0x935   : > { %3302 = vmatprep.subr.bf16.mxu1 %v3301_v10 }
 0x936   : > { %3304 = vmatpush1.bf16.msra.mxu1 %v3303_v27  ;;  %v3724_v0 = vpop.eup %3723 }
 0x937   : > { %v3726_v4 = vpop.eup %3725 }
 0x939   : > { %v3728_v6 = vpop.eup %3727 }
 0x93a   : > { %v3730_v44 = vpop.eup %3729  ;;  %v3307_v53 = vpack.c.bf16 %v3728_v6, %v3724_v0 }
 0x93b   : > { %v3305_v3 = vpack.c.bf16 %v3730_v44, %v3726_v4 }
 0x93d   : > { %3306 = vmatprep.subr.bf16.mxu1 %v3305_v3 }
 0x93e   : > { %3308 = vmatpush1.bf16.msra.mxu1 %v3307_v53 }
 0x941   : > { %3114 = vmatmul.mubr.msk.f32.vlgmr.msra.gmra.mrb[56].mxu1 %vm438_vm0, %v4742_v21 }
 0x942   : > { %1767 = vmatprep.mubr.f32.mxu1 %v5658_v17 }
 0x945   : > { %3115 = vmatmul.mubr.msk.f32.gmra.mrb[58].mxu1 %vm438_vm0, %v4750_v56  ;;  %v5673_v56 = vld [vmem:[#allocation7_spill] sm:$0xff] }
 0x946   : > { %1773 = vmatprep.mubr.f32.mxu1 %v5658_v17 }
 0x949   : > { %3116 = vmatmul.mubr.msk.f32.gmra.mrb[60].mxu1 %vm438_vm0, %v4758_v50 }
 0x94a   : > { %1779 = vmatprep.mubr.f32.mxu1 %v5658_v17 }
 0x94d   : > { %3117 = vmatmul.mubr.msk.f32.gmra.mrb[62].mxu1 %vm438_vm0, %v4766_v19 }
 0x94e   : > { %1785 = vmatprep.mubr.f32.mxu1 %v5658_v17 }
 0x951   : > { %3118 = vmatmul.mubr.msk.f32.gmra.mrb[64].mxu1 %vm438_vm0, %v4774_v16 }
 0x952   : > { %1791 = vmatprep.mubr.f32.mxu1 %v5658_v17 }
 0x955   : > { %3119 = vmatmul.mubr.msk.f32.gmra.mrb[66].mxu1 %vm438_vm0, %v4782_v15  ;;  %v5674_v15 = vld [vmem:[#allocation8_spill] sm:$0xff] }
 0x956   : > { %1797 = vmatprep.mubr.f32.mxu1 %v5658_v17 }
 0x959   : > { %3120 = vmatmul.mubr.msk.f32.gmra.mrb[68].mxu1 %vm438_vm0, %v4790_v26 }
 0x95a   : > { %1803 = vmatprep.mubr.f32.mxu1 %v5658_v17 }
 0x95d   : > { %3121 = vmatmul.mubr.msk.f32.gmra.mrb[70].mxu1 %vm438_vm0, %v5672_v29 }
 0x95e   : > { %2019 = vmatprep.mubr.f32.mxu1 %v5658_v17 }
 0xa14   : > { %v1763_v21 = vpop.f32.mrb[56].mxu1 }
 0xa15   : > { %v1764_v50 = vadd.f32 %v1763_v21, %v5673_v56  ;;  %v1765_v19 = vpop.f32.mrb[57].mxu1 }
 0xa16   : > { %v1766_v16 = vadd.f32 %v1765_v19, %v5673_v56 }
 0xa17   : > { %3731 = vtanh.f32 %v1764_v50  ;;  %v5677_v50 = vld [vmem:[#allocation11_spill] sm:$0xff] }
 0xa18   : > { %v1769_v33 = vpop.f32.mrb[58].mxu1  ;;  %3733 = vtanh.f32 %v1766_v16 }
 0xa19   : > { %v1770_v36 = vadd.f32 %v1769_v33, %v5674_v15  ;;  %v1771_v22 = vpop.f32.mrb[59].mxu1 }
 0xa1a   : > { %v1772_v26 = vadd.f32 %v1771_v22, %v5674_v15 }
 0xa1b   : > { %3735 = vtanh.f32 %v1770_v36 }
 0xa1c   : > { %3737 = vtanh.f32 %v1772_v26  ;;  %v1775_v11 = vpop.f32.mrb[60].mxu1 }
 0xa1d   : > { %v1776_v7 = vadd.f32 %v1775_v11, %v5675_v24  ;;  %v1777_v30 = vpop.f32.mrb[61].mxu1 }
 0xa1e   : > { %v1778_v45 = vadd.f32 %v1777_v30, %v5675_v24 }
 0xa1f   : > { %3739 = vtanh.f32 %v1776_v7 }
 0xa20   : > { %v1781_v60 = vpop.f32.mrb[62].mxu1  ;;  %3741 = vtanh.f32 %v1778_v45 }
 0xa21   : > { %v1782_v1 = vadd.f32 %v1781_v60, %v5676_v61  ;;  %v1783_v12 = vpop.f32.mrb[63].mxu1  ;;  %v3732_v35 = vpop.eup %3731 }
 0xa22   : > { %v1784_v40 = vadd.f32 %v1783_v12, %v5676_v61  ;;  %v3734_v27 = vpop.eup %3733 }
 0xa23   : > { %3743 = vtanh.f32 %v1782_v1 }
 0xa24   : > { %3745 = vtanh.f32 %v1784_v40  ;;  %v1787_v10 = vpop.f32.mrb[64].mxu1 }
 0xa25   : > { %v3736_v0 = vpop.eup %3735  ;;  %v1788_v4 = vadd.f32 %v1787_v10, %v4375_v25  ;;  %v1789_v6 = vpop.f32.mrb[65].mxu1 }
 0xa26   : > { %v3738_v44 = vpop.eup %3737  ;;  %v1790_v53 = vadd.f32 %v1789_v6, %v4375_v25  ;;  %v3311_v3 = vpack.c.bf16 %v3736_v0, %v3732_v35 }
 0xa27   : > { %v3309_v29 = vpack.c.bf16 %v3738_v44, %v3734_v27  ;;  %3747 = vtanh.f32 %v1788_v4 }
 0xa28   : > { %v1793_v21 = vpop.f32.mrb[66].mxu1  ;;  %3749 = vtanh.f32 %v1790_v53 }
 0xa29   : > { %v1794_v19 = vadd.f32 %v1793_v21, %v5677_v50  ;;  %v1795_v16 = vpop.f32.mrb[67].mxu1  ;;  %3310 = vmatprep.subr.bf16.mxu0 %v3309_v29  ;;  %v3740_v36 = vpop.eup %3739 }
 0xa2a   : > { %v1796_v33 = vadd.f32 %v1795_v16, %v5677_v50  ;;  %3312 = vmatpush1.bf16.msra.mxu0 %v3311_v3  ;;  %v3742_v22 = vpop.eup %3741 }
 0xa2b   : > { %3751 = vtanh.f32 %v1794_v19 }
 0xa2c   : > { %3753 = vtanh.f32 %v1796_v33  ;;  %v1799_v26 = vpop.f32.mrb[68].mxu1 }
 0xa2d   : > { %v3744_v11 = vpop.eup %3743  ;;  %v1800_v7 = vadd.f32 %v1799_v26, %v4383_v41  ;;  %v1801_v30 = vpop.f32.mrb[69].mxu1 }
 0xa2e   : > { %v3746_v45 = vpop.eup %3745  ;;  %v1802_v60 = vadd.f32 %v1801_v30, %v4383_v41  ;;  %v3315_v1 = vpack.c.bf16 %v3744_v11, %v3740_v36  ;;  %v5682_v30 = vld [vmem:[#allocation13_spill] sm:$0xff] }
 0xa2f   : > { %v3313_v12 = vpack.c.bf16 %v3746_v45, %v3742_v22  ;;  %3755 = vtanh.f32 %v1800_v7  ;;  %v5681_v22 = vld [vmem:[#allocation12_spill] sm:$0xff] }
 0xa30   : > { %v1805_v40 = vpop.f32.mrb[70].mxu1  ;;  %3757 = vtanh.f32 %v1802_v60 }
 0xa31   : > { %v1806_v35 = vadd.f32 %v1805_v40, %v4387_v59  ;;  %v1807_v27 = vpop.f32.mrb[71].mxu1  ;;  %3314 = vmatprep.subr.bf16.mxu0 %v3313_v12  ;;  %v3748_v0 = vpop.eup %3747  ;;  %v5683_v40 = vld [vmem:[#allocation14_spill] sm:$0xff] }
 0xa32   : > { %v1808_v10 = vadd.f32 %v1807_v27, %v4387_v59  ;;  %3316 = vmatpush1.bf16.msra.mxu0 %v3315_v1  ;;  %v3750_v4 = vpop.eup %3749 }
 0xa33   : > { %3759 = vtanh.f32 %v1806_v35 }
 0xa34   : > { %3761 = vtanh.f32 %v1808_v10 }
 0xa35   : > { %v3752_v6 = vpop.eup %3751 }
 0xa36   : > { %v3754_v44 = vpop.eup %3753  ;;  %v3319_v53 = vpack.c.bf16 %v3752_v6, %v3748_v0 }
 0xa37   : > { %v3317_v3 = vpack.c.bf16 %v3754_v44, %v3750_v4  ;;  %v5684_v4 = vld [vmem:[#allocation15_spill] sm:$0xff] }
 0xa39   : > { %3318 = vmatprep.subr.bf16.mxu0 %v3317_v3  ;;  %v3756_v29 = vpop.eup %3755 }
 0xa3a   : > { %3320 = vmatpush1.bf16.msra.mxu0 %v3319_v53  ;;  %v3758_v21 = vpop.eup %3757 }
 0xa3d   : > { %v3760_v19 = vpop.eup %3759 }
 0xa3e   : > { %v3762_v16 = vpop.eup %3761  ;;  %v3323_v33 = vpack.c.bf16 %v3760_v19, %v3756_v29 }
 0xa3f   : > { %v3321_v36 = vpack.c.bf16 %v3762_v16, %v3758_v21 }
 0xa41   : > { %3322 = vmatprep.subr.bf16.mxu0 %v3321_v36 }
 0xa42   : > { %3324 = vmatpush1.bf16.msra.mxu0 %v3323_v33 }
 0xa45   : > { %3122 = vmatmul.mubr.msk.f32.vlgmr.msra.gmra.mrb[64].mxu0 %vm632_vm1, %v4822_v23  ;;  %v5678_v23 = vld [vmem:[#allocation25_spill] sm:$0xff] }
 0xa46   : > { %1896 = vmatprep.mubr.f32.mxu0 %v5658_v17 }
 0xa49   : > { %3123 = vmatmul.mubr.msk.f32.gmra.mrb[66].mxu0 %vm632_vm1, %v4830_v34  ;;  %v5679_v34 = vld [vmem:[#allocation27_spill] sm:$0xff] }
 0xa4a   : > { %1902 = vmatprep.mubr.f32.mxu0 %v5658_v17 }
 0xa4d   : > { %3124 = vmatmul.mubr.msk.f32.gmra.mrb[68].mxu0 %vm632_vm1, %v4838_v52  ;;  %v5680_v52 = vld [vmem:[#allocation28_spill] sm:$0xff] }
 0xa4e   : > { %1908 = vmatprep.mubr.f32.mxu0 %v5658_v17 }
 0xa51   : > { %3125 = vmatmul.mubr.msk.f32.gmra.mrb[70].mxu0 %vm632_vm1, %v4846_v42 }
 0xa52   : > { %1914 = vmatprep.mubr.f32.mxu0 %v5658_v17 }
 0xa55   : > { %3126 = vmatmul.mubr.msk.f32.gmra.mrb[72].mxu0 %vm632_vm1, %v4854_v54 }
 0xa56   : > { %1920 = vmatprep.mubr.f32.mxu0 %v5658_v17 }
 0xa59   : > { %3127 = vmatmul.mubr.msk.f32.gmra.mrb[74].mxu0 %vm632_vm1, %v5678_v23 }
 0xa5a   : > { %1926 = vmatprep.mubr.f32.mxu0 %v5658_v17 }
 0xa5d   : > { %3128 = vmatmul.mubr.msk.f32.gmra.mrb[76].mxu0 %vm632_vm1, %v5679_v34 }
 0xa5e   : > { %1932 = vmatprep.mubr.f32.mxu0 %v5658_v17 }
 0xa61   : > { %3129 = vmatmul.mubr.msk.f32.gmra.mrb[78].mxu0 %vm632_vm1, %v5680_v52 }
 0xa62   : > { %2148 = vmatprep.mubr.f32.mxu0 %v5658_v17 }
 0xb18   : > { %v1892_v42 = vpop.f32.mrb[64].mxu0 }
 0xb19   : > { %v1893_v54 = vadd.f32 %v1892_v42, %v5681_v22  ;;  %v1894_v26 = vpop.f32.mrb[65].mxu0 }
 0xb1a   : > { %v1895_v11 = vadd.f32 %v1894_v26, %v5681_v22 }
 0xb1b   : > { %3763 = vtanh.f32 %v1893_v54  ;;  %v5685_v54 = vld [vmem:[#allocation17_spill] sm:$0xff] }
 0xb1c   : > { %v1898_v7 = vpop.f32.mrb[66].mxu0  ;;  %3765 = vtanh.f32 %v1895_v11 }
 0xb1d   : > { %v1899_v45 = vadd.f32 %v1898_v7, %v5682_v30  ;;  %v1900_v60 = vpop.f32.mrb[67].mxu0 }
 0xb1e   : > { %v1901_v1 = vadd.f32 %v1900_v60, %v5682_v30 }
 0xb1f   : > { %3767 = vtanh.f32 %v1899_v45 }
 0xb20   : > { %3769 = vtanh.f32 %v1901_v1  ;;  %v1904_v12 = vpop.f32.mrb[68].mxu0 }
 0xb21   : > { %v1905_v35 = vadd.f32 %v1904_v12, %v5683_v40  ;;  %v1906_v27 = vpop.f32.mrb[69].mxu0 }
 0xb22   : > { %v1907_v10 = vadd.f32 %v1906_v27, %v5683_v40 }
 0xb23   : > { %3771 = vtanh.f32 %v1905_v35 }
 0xb24   : > { %v1910_v0 = vpop.f32.mrb[70].mxu0  ;;  %3773 = vtanh.f32 %v1907_v10 }
 0xb25   : > { %v1911_v6 = vadd.f32 %v1910_v0, %v5684_v4  ;;  %v1912_v44 = vpop.f32.mrb[71].mxu0  ;;  %v3764_v3 = vpop.eup %3763 }
 0xb26   : > { %v1913_v53 = vadd.f32 %v1912_v44, %v5684_v4  ;;  %v3766_v29 = vpop.eup %3765 }
 0xb27   : > { %3775 = vtanh.f32 %v1911_v6 }
 0xb28   : > { %3777 = vtanh.f32 %v1913_v53  ;;  %v1916_v21 = vpop.f32.mrb[72].mxu0 }
 0xb29   : > { %v3768_v19 = vpop.eup %3767  ;;  %v1917_v16 = vadd.f32 %v1916_v21, %v4471_v5  ;;  %v1918_v33 = vpop.f32.mrb[73].mxu0 }
 0xb2a   : > { %v3770_v36 = vpop.eup %3769  ;;  %v1919_v23 = vadd.f32 %v1918_v33, %v4471_v5  ;;  %v3327_v34 = vpack.c.bf16 %v3768_v19, %v3764_v3  ;;  %v5686_v3 = vld [vmem:[#allocation18_spill] sm:$0xff] }
 0xb2b   : > { %v3325_v52 = vpack.c.bf16 %v3770_v36, %v3766_v29  ;;  %3779 = vtanh.f32 %v1917_v16 }
 0xb2c   : > { %v1922_v42 = vpop.f32.mrb[74].mxu0  ;;  %3781 = vtanh.f32 %v1919_v23 }
 0xb2d   : > { %v1923_v26 = vadd.f32 %v1922_v42, %v5685_v54  ;;  %v1924_v11 = vpop.f32.mrb[75].mxu0  ;;  %3326 = vmatprep.subr.bf16.mxu1 %v3325_v52  ;;  %v3772_v45 = vpop.eup %3771 }
 0xb2e   : > { %v1925_v7 = vadd.f32 %v1924_v11, %v5685_v54  ;;  %3328 = vmatpush1.bf16.msra.mxu1 %v3327_v34  ;;  %v3774_v60 = vpop.eup %3773 }
 0xb2f   : > { %3783 = vtanh.f32 %v1923_v26 }
 0xb30   : > { %3785 = vtanh.f32 %v1925_v7  ;;  %v1928_v1 = vpop.f32.mrb[76].mxu0 }
 0xb31   : > { %v3776_v12 = vpop.eup %3775  ;;  %v1929_v35 = vadd.f32 %v1928_v1, %v4479_v46  ;;  %v1930_v27 = vpop.f32.mrb[77].mxu0  ;;  %v5687_v1 = vld [vmem:[#allocation29_spill] sm:$0xff] }
 0xb32   : > { %v3778_v10 = vpop.eup %3777  ;;  %v1931_v0 = vadd.f32 %v1930_v27, %v4479_v46  ;;  %v3331_v6 = vpack.c.bf16 %v3776_v12, %v3772_v45  ;;  %v5688_v12 = vld [vmem:[#allocation30_spill] sm:$0xff]  ;;  %v5690_v27 = vld [vmem:[#allocation32_spill] sm:$0xff] }
 0xb33   : > { %v3329_v44 = vpack.c.bf16 %v3778_v10, %v3774_v60  ;;  %3787 = vtanh.f32 %v1929_v35  ;;  %v5689_v35 = vld [vmem:[#allocation31_spill] sm:$0xff]  ;;  %v5691_v10 = vld [vmem:[#allocation20_spill] sm:$0xff] }
 0xb34   : > { %v1934_v53 = vpop.f32.mrb[78].mxu0  ;;  %3789 = vtanh.f32 %v1931_v0  ;;  %v2044_v0 = vmul.f32 0.1875, %v5691_v10 }
 0xb35   : > { %v1935_v29 = vadd.f32 %v1934_v53, %v5686_v3  ;;  %v1936_v21 = vpop.f32.mrb[79].mxu0  ;;  %3330 = vmatprep.subr.bf16.mxu1 %v3329_v44  ;;  %v3780_v16 = vpop.eup %3779  ;;  %v5693_v53 = vld [vmem:[#allocation22_spill] sm:$0xff] }
 0xb36   : > { %v1937_v19 = vadd.f32 %v1936_v21, %v5686_v3  ;;  %3332 = vmatpush1.bf16.msra.mxu1 %v3331_v6  ;;  %v3782_v33 = vpop.eup %3781  ;;  %v5692_v6 = vld [vmem:[#allocation21_spill] sm:$0xff]  ;;  %v5694_v21 = vld [vmem:[#allocation23_spill] sm:$0xff] }
 0xb37   : > { %3791 = vtanh.f32 %v1935_v29  ;;  %v2045_v44 = vmul.f32 0.1875, %v5692_v6  ;;  %v2046_v29 = vmul.f32 0.1875, %v5693_v53 }
 0xb38   : > { %3793 = vtanh.f32 %v1937_v19  ;;  %v2047_v19 = vmul.f32 0.1875, %v5694_v21  ;;  %v3988_v21 = vld [vmem:[%s4204_s11 + $0x28] sm:$0xff] }
 0xb39   : > { %v3784_v36 = vpop.eup %3783 }
 0xb3a   : > { %v3786_v23 = vpop.eup %3785  ;;  %v3335_v34 = vpack.c.bf16 %v3784_v36, %v3780_v16  ;;  %v2048_v16 = vmul.f32 0.1875, %v4544_v49 }
 0xb3b   : > { %v3333_v52 = vpack.c.bf16 %v3786_v23, %v3782_v33  ;;  %v2049_v33 = vmul.f32 0.1875, %v4548_v13  ;;  %v5695_v23 = vld [vmem:[#allocation19_spill] sm:$0xff] }
 0xb3d   : > { %3334 = vmatprep.subr.bf16.mxu1 %v3333_v52  ;;  %v3788_v42 = vpop.eup %3787  ;;  %v3983_v52 = vld [vmem:[%s4204_s11] sm:$0xff] }
 0xb3e   : > { %3336 = vmatpush1.bf16.msra.mxu1 %v3335_v34  ;;  %v3790_v26 = vpop.eup %3789 }
 0xb41   : > { %v3792_v11 = vpop.eup %3791 }
 0xb42   : > { %v3794_v7 = vpop.eup %3793  ;;  %v3339_v45 = vpack.c.bf16 %v3792_v11, %v3788_v42  ;;  %v2052_v42 = vadd.f32 %v3983_v52, %v2044_v0  ;;  %v3984_v11 = vld [vmem:[%s4204_s11 + $0x8] sm:$0xff] }
 0xb43   : > { %v3337_v60 = vpack.c.bf16 %v3794_v7, %v3790_v26  ;;  %v2053_v7 = vadd.f32 %v3984_v11, %v2045_v44 }
 0xb45   : > { %3338 = vmatprep.subr.bf16.mxu1 %v3337_v60 }
 0xb46   : > { %3340 = vmatpush1.bf16.msra.mxu1 %v3339_v45  ;;  %v5105_v45 = vmul.f32 0.1875, %v4556_v43  ;;  %v2051_v43 = vmul.f32 0.1875, %v5661_v38 }
 0xb49   : > { %3130 = vmatmul.mubr.msk.f32.vlgmr.msra.gmra.mrb[72].mxu1 %vm632_vm1, %v5687_v1  ;;  %v3985_v1 = vld [vmem:[%s4204_s11 + $0x10] sm:$0xff] }
 0xb4a   : > { %2025 = vmatprep.mubr.f32.mxu1 %v5658_v17 }
 0xb4d   : > { %3131 = vmatmul.mubr.msk.f32.gmra.mrb[74].mxu1 %vm632_vm1, %v5688_v12  ;;  %v2054_v12 = vadd.f32 %v3985_v1, %v2046_v29 }
 0xb4e   : > { %2031 = vmatprep.mubr.f32.mxu1 %v5658_v17 }
 0xb51   : > { %3132 = vmatmul.mubr.msk.f32.gmra.mrb[76].mxu1 %vm632_vm1, %v5689_v35  ;;  %v3986_v35 = vld [vmem:[%s4204_s11 + $0x18] sm:$0xff] }
 0xb52   : > { %2037 = vmatprep.mubr.f32.mxu1 %v5658_v17  ;;  %v2055_v49 = vadd.f32 %v3986_v35, %v2047_v19 }
 0xb55   : > { %3133 = vmatmul.mubr.msk.f32.gmra.mrb[78].mxu1 %vm632_vm1, %v5690_v27  ;;  %v3987_v27 = vld [vmem:[%s4204_s11 + $0x20] sm:$0xff] }
 0xb56   : > { %2277 = vmatprep.mubr.f32.mxu1 %v5658_v17  ;;  %v2056_v13 = vadd.f32 %v3987_v27, %v2048_v16 }
 0xc1c   : > { %v2021_v36 = vpop.f32.mrb[72].mxu1 }
 0xc1d   : > { %v2022_v34 = vadd.f32 %v2021_v36, %v5695_v23  ;;  %v2023_v26 = vpop.f32.mrb[73].mxu1  ;;  %v2057_v36 = vadd.f32 %v3988_v21, %v2049_v33 }
 0xc1e   : > { %v2024_v60 = vadd.f32 %v2023_v26, %v5695_v23 }
 0xc1f   : > { %v2060_v10 = vmul.f32 0.5625, %v2022_v34  ;;  %v2479_v6 = vmul.f32 -1.7142857, %v2022_v34  ;;  %v2890_v53 = vmul.f32 12.0, %v2022_v34 }
 0xc20   : > { %v2061_v0 = vmul.f32 0.5625, %v2024_v60  ;;  %v2480_v52 = vmul.f32 -1.7142857, %v2024_v60  ;;  %v2891_v3 = vmul.f32 12.0, %v2024_v60  ;;  %v2027_v44 = vpop.f32.mrb[74].mxu1 }
 0xc21   : > { %v2068_v11 = vadd.f32 %v2060_v10, %v2052_v42  ;;  %v2028_v26 = vadd.f32 %v2027_v44, %v4528_v9  ;;  %v2029_v23 = vpop.f32.mrb[75].mxu1  ;;  %v5115_v29 = vadd.f32 %v2479_v6, %v4952_v2  ;;  %v5118_v19 = vadd.f32 %v2890_v53, %v4954_v39 }
 0xc22   : > { %v2069_v16 = vadd.f32 %v2061_v0, %v2053_v7  ;;  %v2030_v34 = vadd.f32 %v2029_v23, %v4528_v9  ;;  %v5122_v33 = vadd.f32 %v2480_v52, %v4959_v63  ;;  %v5125_v60 = vadd.f32 %v2891_v3, %v4961_v62 }
 0xc23   : > { %3795 = vtanh.f32 %v2068_v11  ;;  %v2062_v38 = vmul.f32 0.5625, %v2028_v26  ;;  %v2481_v42 = vmul.f32 -1.7142857, %v2028_v26  ;;  %v2892_v1 = vmul.f32 12.0, %v2028_v26 }
 0xc24   : > { %3797 = vtanh.f32 %v2069_v16  ;;  %v2063_v35 = vmul.f32 0.5625, %v2030_v34  ;;  %v2482_v2 = vmul.f32 -1.7142857, %v2030_v34  ;;  %v2893_v27 = vmul.f32 12.0, %v2030_v34  ;;  %v2033_v10 = vpop.f32.mrb[76].mxu1 }
 0xc25   : > { %v2070_v39 = vadd.f32 %v2062_v38, %v2054_v12  ;;  %v2034_v7 = vadd.f32 %v2033_v10, %v5659_v51  ;;  %v2035_v6 = vpop.f32.mrb[77].mxu1  ;;  %v5129_v23 = vadd.f32 %v2481_v42, %v4966_v14  ;;  %v5132_v63 = vadd.f32 %v2892_v1, %v4968_v18 }
 0xc26   : > { %v2071_v62 = vadd.f32 %v2063_v35, %v2055_v49  ;;  %v2036_v3 = vadd.f32 %v2035_v6, %v5659_v51  ;;  %v5136_v53 = vadd.f32 %v2482_v2, %v4972_v20  ;;  %v5139_v21 = vadd.f32 %v2893_v27, %v4974_v31  ;;  %v3989_v35 = vld [vmem:[%s4204_s11 + $0x30] sm:$0xff] }
 0xc27   : > { %3799 = vtanh.f32 %v2070_v39  ;;  %v2064_v12 = vmul.f32 0.5625, %v2034_v7  ;;  %v2483_v0 = vmul.f32 -1.7142857, %v2034_v7  ;;  %v2894_v52 = vmul.f32 12.0, %v2034_v7 }
 0xc28   : > { %3801 = vtanh.f32 %v2071_v62  ;;  %v2065_v14 = vmul.f32 0.5625, %v2036_v3  ;;  %v2484_v44 = vmul.f32 -1.7142857, %v2036_v3  ;;  %v2895_v11 = vmul.f32 12.0, %v2036_v3  ;;  %v2039_v18 = vpop.f32.mrb[78].mxu1 }
 0xc29   : > { %v2072_v49 = vadd.f32 %v2064_v12, %v2056_v13  ;;  %v2040_v26 = vadd.f32 %v2039_v18, %v5662_v55  ;;  %v2041_v16 = vpop.f32.mrb[79].mxu1  ;;  %v5143_v20 = vadd.f32 %v2483_v0, %v4980_v37  ;;  %v5146_v31 = vadd.f32 %v2894_v52, %v4982_v48  ;;  %v3990_v37 = vld [vmem:[%s4204_s11 + $0x38] sm:$0xff] }
 0xc2a   : > { %v2073_v34 = vadd.f32 %v2065_v14, %v2057_v36  ;;  %v2042_v38 = vadd.f32 %v2041_v16, %v5662_v55  ;;  %v5150_v42 = vadd.f32 %v2484_v44, %v4987_v58  ;;  %v5153_v1 = vadd.f32 %v2895_v11, %v4989_v47  ;;  %v5189_v16 = vld [vmem:[%s5572_s2 + $0x10] sm:$0xff] }
 0xc2b   : > { %v2058_v13 = vadd.f32 %v3989_v35, %v5105_v45  ;;  %v2066_v2 = vmul.f32 0.5625, %v2040_v26  ;;  %v2485_v27 = vmul.f32 -1.7142857, %v2040_v26  ;;  %v2896_v10 = vmul.f32 12.0, %v2040_v26  ;;  %v5213_v35 = vld [vmem:[%s5572_s2 + $0x28] sm:$0xff] }
 0xc2c   : > { %v2059_v39 = vadd.f32 %v3990_v37, %v2051_v43  ;;  %v2067_v7 = vmul.f32 0.5625, %v2042_v38  ;;  %v2486_v48 = vmul.f32 -1.7142857, %v2042_v38  ;;  %v2897_v6 = vmul.f32 12.0, %v2042_v38  ;;  %v5205_v38 = vld [vmem:[%s5572_s2 + $0x20] sm:$0xff] }
 0xc2d   : > { %v3796_v36 = vpop.eup %3795  ;;  %3803 = vtanh.f32 %v2072_v49  ;;  %v2074_v62 = vadd.f32 %v2066_v2, %v2058_v13  ;;  %v5159_v58 = vadd.f32 %v2485_v27, %v4994_v28  ;;  %v5162_v47 = vadd.f32 %v2896_v10, %v4996_v8  ;;  %v5221_v13 = vld [vmem:[%s5572_s2 + $0x30] sm:$0xff]  ;;  %v5229_v2 = vld [vmem:[%s5572_s2 + $0x38] sm:$0xff] }
 0xc2e   : > { %v3798_v3 = vpop.eup %3797  ;;  %3805 = vtanh.f32 %v2073_v34  ;;  %v2075_v45 = vadd.f32 %v2067_v7, %v2059_v39  ;;  %v5165_v12 = vadd.f32 %v2486_v48, %v4999_v32  ;;  %v5168_v43 = vadd.f32 %v2897_v6, %v5001_v57  ;;  %v5173_v32 = vld [vmem:[%s5572_s2] sm:$0xff]  ;;  %v5181_v57 = vld [vmem:[%s5572_s2 + $0x8] sm:$0xff]  ;;  %v5197_v34 = vld [vmem:[%s5572_s2 + $0x18] sm:$0xff] }
 0xc2f   : > { %3807 = vtanh.f32 %v2074_v62 }
 0xc30   : > { %3809 = vtanh.f32 %v2075_v45 }
 0xc31   : > { %v3800_v0 = vpop.eup %3799 }
 0xc32   : > { %v3802_v52 = vpop.eup %3801  ;;  %v3343_v14 = vpack.c.bf16 %v3800_v0, %v3796_v36 }
 0xc33   : > { %v3341_v44 = vpack.c.bf16 %v3802_v52, %v3798_v3 }
 0xc35   : > { %3342 = vmatprep.subr.bf16.mxu0 %v3341_v44 }
 0xc36   : > { %3344 = vmatpush1.bf16.msra.mxu0 %v3343_v14 }
 0xc37   : > { %v3804_v28 = vpop.eup %3803 }
 0xc38   : > { %v3806_v8 = vpop.eup %3805 }
 0xc39   : > { %v3808_v11 = vpop.eup %3807 }
 0xc3a   : > { %v3810_v18 = vpop.eup %3809  ;;  %v3347_v49 = vpack.c.bf16 %v3808_v11, %v3804_v28 }
 0xc3b   : > { %v3345_v26 = vpack.c.bf16 %v3810_v18, %v3806_v8 }
 0xc3d   : > { %3346 = vmatprep.subr.bf16.mxu0 %v3345_v26 }
 0xc3e   : > { %3348 = vmatpush1.bf16.msra.mxu0 %v3347_v49 }
 0xc41   : > { %3134 = vmatmul.mubr.msk.f32.vlgmr.msra.gmra.mrb[80].mxu0 %vm438_vm0, %v5173_v32 }
 0xc42   : > { %2154 = vmatprep.mubr.f32.mxu0 %v5658_v17 }
 0xc45   : > { %3135 = vmatmul.mubr.msk.f32.gmra.mrb[82].mxu0 %vm438_vm0, %v5181_v57 }
 0xc46   : > { %2160 = vmatprep.mubr.f32.mxu0 %v5658_v17 }
 0xc49   : > { %3136 = vmatmul.mubr.msk.f32.gmra.mrb[84].mxu0 %vm438_vm0, %v5189_v16 }
 0xc4a   : > { %2166 = vmatprep.mubr.f32.mxu0 %v5658_v17 }
 0xc4d   : > { %3137 = vmatmul.mubr.msk.f32.gmra.mrb[86].mxu0 %vm438_vm0, %v5197_v34 }
 0xc4e   : > { %2172 = vmatprep.mubr.f32.mxu0 %v5658_v17 }
 0xc51   : > { %3138 = vmatmul.mubr.msk.f32.gmra.mrb[88].mxu0 %vm438_vm0, %v5205_v38 }
 0xc52   : > { %2178 = vmatprep.mubr.f32.mxu0 %v5658_v17 }
 0xc55   : > { %3139 = vmatmul.mubr.msk.f32.gmra.mrb[90].mxu0 %vm438_vm0, %v5213_v35 }
 0xc56   : > { %2184 = vmatprep.mubr.f32.mxu0 %v5658_v17 }
 0xc59   : > { %3140 = vmatmul.mubr.msk.f32.gmra.mrb[92].mxu0 %vm438_vm0, %v5221_v13 }
 0xc5a   : > { %2190 = vmatprep.mubr.f32.mxu0 %v5658_v17 }
 0xc5d   : > { %3141 = vmatmul.mubr.msk.f32.gmra.mrb[94].mxu0 %vm438_vm0, %v5229_v2 }
 0xc5e   : > { %2406 = vmatprep.mubr.f32.mxu0 %v5658_v17 }
 0xd14   : > { %v2150_v27 = vpop.f32.mrb[80].mxu0 }
 0xd15   : > { %v2151_v10 = vadd.f32 %v2150_v27, %v5673_v56  ;;  %v2152_v37 = vpop.f32.mrb[81].mxu0 }
 0xd16   : > { %v2153_v39 = vadd.f32 %v2152_v37, %v5673_v56 }
 0xd17   : > { %3811 = vtanh.f32 %v2151_v10 }
 0xd18   : > { %v2156_v7 = vpop.f32.mrb[82].mxu0  ;;  %3813 = vtanh.f32 %v2153_v39 }
 0xd19   : > { %v2157_v48 = vadd.f32 %v2156_v7, %v5674_v15  ;;  %v2158_v6 = vpop.f32.mrb[83].mxu0 }
 0xd1a   : > { %v2159_v36 = vadd.f32 %v2158_v6, %v5674_v15 }
 0xd1b   : > { %3815 = vtanh.f32 %v2157_v48 }
 0xd1c   : > { %3817 = vtanh.f32 %v2159_v36  ;;  %v2162_v62 = vpop.f32.mrb[84].mxu0 }
 0xd1d   : > { %v2163_v3 = vadd.f32 %v2162_v62, %v5675_v24  ;;  %v2164_v45 = vpop.f32.mrb[85].mxu0 }
 0xd1e   : > { %v2165_v0 = vadd.f32 %v2164_v45, %v5675_v24 }
 0xd1f   : > { %3819 = vtanh.f32 %v2163_v3 }
 0xd20   : > { %v2168_v52 = vpop.f32.mrb[86].mxu0  ;;  %3821 = vtanh.f32 %v2165_v0 }
 0xd21   : > { %v2169_v14 = vadd.f32 %v2168_v52, %v5676_v61  ;;  %v2170_v44 = vpop.f32.mrb[87].mxu0  ;;  %v3812_v8 = vpop.eup %3811 }
 0xd22   : > { %v2171_v28 = vadd.f32 %v2170_v44, %v5676_v61  ;;  %v3814_v11 = vpop.eup %3813 }
 0xd23   : > { %3823 = vtanh.f32 %v2169_v14 }
 0xd24   : > { %3825 = vtanh.f32 %v2171_v28  ;;  %v2174_v18 = vpop.f32.mrb[88].mxu0 }
 0xd25   : > { %v3816_v49 = vpop.eup %3815  ;;  %v2175_v26 = vadd.f32 %v2174_v18, %v4375_v25  ;;  %v2176_v27 = vpop.f32.mrb[89].mxu0 }
 0xd26   : > { %v3818_v10 = vpop.eup %3817  ;;  %v2177_v37 = vadd.f32 %v2176_v27, %v4375_v25  ;;  %v3351_v39 = vpack.c.bf16 %v3816_v49, %v3812_v8 }
 0xd27   : > { %v3349_v7 = vpack.c.bf16 %v3818_v10, %v3814_v11  ;;  %3827 = vtanh.f32 %v2175_v26 }
 0xd28   : > { %v2180_v48 = vpop.f32.mrb[90].mxu0  ;;  %3829 = vtanh.f32 %v2177_v37 }
 0xd29   : > { %v2181_v6 = vadd.f32 %v2180_v48, %v5677_v50  ;;  %v2182_v36 = vpop.f32.mrb[91].mxu0  ;;  %3350 = vmatprep.subr.bf16.mxu1 %v3349_v7  ;;  %v3820_v3 = vpop.eup %3819 }
 0xd2a   : > { %v2183_v62 = vadd.f32 %v2182_v36, %v5677_v50  ;;  %3352 = vmatpush1.bf16.msra.mxu1 %v3351_v39  ;;  %v3822_v45 = vpop.eup %3821 }
 0xd2b   : > { %3831 = vtanh.f32 %v2181_v6 }
 0xd2c   : > { %3833 = vtanh.f32 %v2183_v62  ;;  %v2186_v0 = vpop.f32.mrb[92].mxu0 }
 0xd2d   : > { %v3824_v52 = vpop.eup %3823  ;;  %v2187_v14 = vadd.f32 %v2186_v0, %v4383_v41  ;;  %v2188_v44 = vpop.f32.mrb[93].mxu0 }
 0xd2e   : > { %v3826_v28 = vpop.eup %3825  ;;  %v2189_v8 = vadd.f32 %v2188_v44, %v4383_v41  ;;  %v3355_v11 = vpack.c.bf16 %v3824_v52, %v3820_v3  ;;  %v5253_v44 = vld [vmem:[%s5573_s3] sm:$0xff] }
 0xd2f   : > { %v3353_v18 = vpack.c.bf16 %v3826_v28, %v3822_v45  ;;  %3835 = vtanh.f32 %v2187_v14  ;;  %v5261_v28 = vld [vmem:[%s5573_s3 + $0x8] sm:$0xff] }
 0xd30   : > { %v2192_v49 = vpop.f32.mrb[94].mxu0  ;;  %3837 = vtanh.f32 %v2189_v8  ;;  %v5269_v8 = vld [vmem:[%s5573_s3 + $0x10] sm:$0xff] }
 0xd31   : > { %v2193_v26 = vadd.f32 %v2192_v49, %v4387_v59  ;;  %v2194_v27 = vpop.f32.mrb[95].mxu0  ;;  %3354 = vmatprep.subr.bf16.mxu1 %v3353_v18  ;;  %v3828_v37 = vpop.eup %3827  ;;  %v5285_v18 = vld [vmem:[%s5573_s3 + $0x20] sm:$0xff]  ;;  %v5293_v49 = vld [vmem:[%s5573_s3 + $0x28] sm:$0xff] }
 0xd32   : > { %v2195_v10 = vadd.f32 %v2194_v27, %v4387_v59  ;;  %3356 = vmatpush1.bf16.msra.mxu1 %v3355_v11  ;;  %v3830_v39 = vpop.eup %3829  ;;  %v5277_v11 = vld [vmem:[%s5573_s3 + $0x18] sm:$0xff] }
 0xd33   : > { %3839 = vtanh.f32 %v2193_v26  ;;  %v5301_v26 = vld [vmem:[%s5573_s3 + $0x30] sm:$0xff]  ;;  %v5309_v27 = vld [vmem:[%s5573_s3 + $0x38] sm:$0xff] }
 0xd34   : > { %3841 = vtanh.f32 %v2195_v10 }
 0xd35   : > { %v3832_v7 = vpop.eup %3831 }
 0xd36   : > { %v3834_v48 = vpop.eup %3833  ;;  %v3359_v6 = vpack.c.bf16 %v3832_v7, %v3828_v37 }
 0xd37   : > { %v3357_v36 = vpack.c.bf16 %v3834_v48, %v3830_v39 }
 0xd39   : > { %3358 = vmatprep.subr.bf16.mxu1 %v3357_v36  ;;  %v3836_v62 = vpop.eup %3835 }
 0xd3a   : > { %3360 = vmatpush1.bf16.msra.mxu1 %v3359_v6  ;;  %v3838_v3 = vpop.eup %3837 }
 0xd3d   : > { %v3840_v45 = vpop.eup %3839 }
 0xd3e   : > { %v3842_v0 = vpop.eup %3841  ;;  %v3363_v52 = vpack.c.bf16 %v3840_v45, %v3836_v62 }
 0xd3f   : > { %v3361_v14 = vpack.c.bf16 %v3842_v0, %v3838_v3 }
 0xd41   : > { %3362 = vmatprep.subr.bf16.mxu1 %v3361_v14 }
 0xd42   : > { %3364 = vmatpush1.bf16.msra.mxu1 %v3363_v52 }
 0xd45   : > { %3142 = vmatmul.mubr.msk.f32.vlgmr.msra.gmra.mrb[80].mxu1 %vm632_vm1, %v5253_v44 }
 0xd46   : > { %2283 = vmatprep.mubr.f32.mxu1 %v5658_v17 }
 0xd49   : > { %3143 = vmatmul.mubr.msk.f32.gmra.mrb[82].mxu1 %vm632_vm1, %v5261_v28 }
 0xd4a   : > { %2289 = vmatprep.mubr.f32.mxu1 %v5658_v17 }
 0xd4d   : > { %3144 = vmatmul.mubr.msk.f32.gmra.mrb[84].mxu1 %vm632_vm1, %v5269_v8 }
 0xd4e   : > { %2295 = vmatprep.mubr.f32.mxu1 %v5658_v17 }
 0xd51   : > { %3145 = vmatmul.mubr.msk.f32.gmra.mrb[86].mxu1 %vm632_vm1, %v5277_v11 }
 0xd52   : > { %2301 = vmatprep.mubr.f32.mxu1 %v5658_v17 }
 0xd55   : > { %3146 = vmatmul.mubr.msk.f32.gmra.mrb[88].mxu1 %vm632_vm1, %v5285_v18 }
 0xd56   : > { %2307 = vmatprep.mubr.f32.mxu1 %v5658_v17 }
 0xd59   : > { %3147 = vmatmul.mubr.msk.f32.gmra.mrb[90].mxu1 %vm632_vm1, %v5293_v49 }
 0xd5a   : > { %2313 = vmatprep.mubr.f32.mxu1 %v5658_v17 }
 0xd5d   : > { %3148 = vmatmul.mubr.msk.f32.gmra.mrb[92].mxu1 %vm632_vm1, %v5301_v26 }
 0xd5e   : > { %2319 = vmatprep.mubr.f32.mxu1 %v5658_v17 }
 0xd61   : > { %3149 = vmatmul.mubr.msk.f32.gmra.mrb[94].mxu1 %vm632_vm1, %v5309_v27 }
 0xd62   : > { %2583 = vmatprep.mubr.f32.mxu1 %v5658_v17 }
 0xe18   : > { %v2279_v10 = vpop.f32.mrb[80].mxu1 }
 0xe19   : > { %v2280_v37 = vadd.f32 %v2279_v10, %v5681_v22  ;;  %v2281_v39 = vpop.f32.mrb[81].mxu1 }
 0xe1a   : > { %v2282_v7 = vadd.f32 %v2281_v39, %v5681_v22 }
 0xe1b   : > { %3843 = vtanh.f32 %v2280_v37 }
 0xe1c   : > { %v2285_v48 = vpop.f32.mrb[82].mxu1  ;;  %3845 = vtanh.f32 %v2282_v7 }
 0xe1d   : > { %v2286_v6 = vadd.f32 %v2285_v48, %v5682_v30  ;;  %v2287_v36 = vpop.f32.mrb[83].mxu1 }
 0xe1e   : > { %v2288_v62 = vadd.f32 %v2287_v36, %v5682_v30 }
 0xe1f   : > { %3847 = vtanh.f32 %v2286_v6 }
 0xe20   : > { %3849 = vtanh.f32 %v2288_v62  ;;  %v2291_v3 = vpop.f32.mrb[84].mxu1 }
 0xe21   : > { %v2292_v45 = vadd.f32 %v2291_v3, %v5683_v40  ;;  %v2293_v0 = vpop.f32.mrb[85].mxu1 }
 0xe22   : > { %v2294_v52 = vadd.f32 %v2293_v0, %v5683_v40 }
 0xe23   : > { %3851 = vtanh.f32 %v2292_v45 }
 0xe24   : > { %v2297_v14 = vpop.f32.mrb[86].mxu1  ;;  %3853 = vtanh.f32 %v2294_v52 }
 0xe25   : > { %v2298_v10 = vadd.f32 %v2297_v14, %v5684_v4  ;;  %v2299_v39 = vpop.f32.mrb[87].mxu1  ;;  %v3844_v48 = vpop.eup %3843 }
 0xe26   : > { %v2300_v37 = vadd.f32 %v2299_v39, %v5684_v4  ;;  %v3846_v7 = vpop.eup %3845 }
 0xe27   : > { %3855 = vtanh.f32 %v2298_v10 }
 0xe28   : > { %3857 = vtanh.f32 %v2300_v37  ;;  %v2303_v6 = vpop.f32.mrb[88].mxu1 }
 0xe29   : > { %v3848_v36 = vpop.eup %3847  ;;  %v2304_v62 = vadd.f32 %v2303_v6, %v4471_v5  ;;  %v2305_v3 = vpop.f32.mrb[89].mxu1 }
 0xe2a   : > { %v3850_v30 = vpop.eup %3849  ;;  %v2306_v0 = vadd.f32 %v2305_v3, %v4471_v5  ;;  %v3367_v40 = vpack.c.bf16 %v3848_v36, %v3844_v48 }
 0xe2b   : > { %v3365_v45 = vpack.c.bf16 %v3850_v30, %v3846_v7  ;;  %3859 = vtanh.f32 %v2304_v62 }
 0xe2c   : > { %v2309_v22 = vpop.f32.mrb[90].mxu1  ;;  %3861 = vtanh.f32 %v2306_v0  ;;  %v5696_v0 = vld [vmem:[#allocation18_spill] sm:$0xff] }
 0xe2d   : > { %v2310_v52 = vadd.f32 %v2309_v22, %v5685_v54  ;;  %v2311_v14 = vpop.f32.mrb[91].mxu1  ;;  %3366 = vmatprep.subr.bf16.mxu0 %v3365_v45  ;;  %v3852_v39 = vpop.eup %3851 }
 0xe2e   : > { %v2312_v10 = vadd.f32 %v2311_v14, %v5685_v54  ;;  %3368 = vmatpush1.bf16.msra.mxu0 %v3367_v40  ;;  %v3854_v37 = vpop.eup %3853 }
 0xe2f   : > { %3863 = vtanh.f32 %v2310_v52 }
 0xe30   : > { %3865 = vtanh.f32 %v2312_v10  ;;  %v2315_v6 = vpop.f32.mrb[92].mxu1 }
 0xe31   : > { %v3856_v4 = vpop.eup %3855  ;;  %v2316_v3 = vadd.f32 %v2315_v6, %v4479_v46  ;;  %v2317_v48 = vpop.f32.mrb[93].mxu1 }
 0xe32   : > { %v3858_v30 = vpop.eup %3857  ;;  %v2318_v7 = vadd.f32 %v2317_v48, %v4479_v46  ;;  %v3371_v36 = vpack.c.bf16 %v3856_v4, %v3852_v39 }
 0xe33   : > { %v3369_v22 = vpack.c.bf16 %v3858_v30, %v3854_v37  ;;  %3867 = vtanh.f32 %v2316_v3 }
 0xe34   : > { %v2321_v62 = vpop.f32.mrb[94].mxu1  ;;  %3869 = vtanh.f32 %v2318_v7  ;;  %v5333_v7 = vld [vmem:[%s5574_s4] sm:$0xff] }
 0xe35   : > { %v2322_v45 = vadd.f32 %v2321_v62, %v5696_v0  ;;  %v2323_v14 = vpop.f32.mrb[95].mxu1  ;;  %3370 = vmatprep.subr.bf16.mxu0 %v3369_v22  ;;  %v3860_v52 = vpop.eup %3859 }
 0xe36   : > { %v2324_v40 = vadd.f32 %v2323_v14, %v5696_v0  ;;  %3372 = vmatpush1.bf16.msra.mxu0 %v3371_v36  ;;  %v3862_v10 = vpop.eup %3861  ;;  %v5357_v36 = vld [vmem:[%s5574_s4 + $0x18] sm:$0xff] }
 0xe37   : > { %3871 = vtanh.f32 %v2322_v45  ;;  %5699 = vst [vmem:[#allocation7_spill] sm:$0xff] %v5357_v36  ;;  %v5700_v45 = vld [vmem:[#allocation19_spill] sm:$0xff] }
 0xe38   : > { %3873 = vtanh.f32 %v2324_v40 }
 0xe39   : > { %v3864_v6 = vpop.eup %3863 }
 0xe3a   : > { %v3866_v54 = vpop.eup %3865  ;;  %v3375_v5 = vpack.c.bf16 %v3864_v6, %v3860_v52 }
 0xe3b   : > { %v3373_v48 = vpack.c.bf16 %v3866_v54, %v3862_v10  ;;  %v5349_v54 = vld [vmem:[%s5574_s4 + $0x10] sm:$0xff] }
 0xe3c   : > { %5698 = vst [vmem:[#allocation26_spill] sm:$0xff] %v5349_v54 }
 0xe3d   : > { %3374 = vmatprep.subr.bf16.mxu0 %v3373_v48  ;;  %v3868_v4 = vpop.eup %3867 }
 0xe3e   : > { %3376 = vmatpush1.bf16.msra.mxu0 %v3375_v5  ;;  %v3870_v39 = vpop.eup %3869  ;;  %v5341_v5 = vld [vmem:[%s5574_s4 + $0x8] sm:$0xff] }
 0xe3f   : > { %5697 = vst [vmem:[#allocation24_spill] sm:$0xff] %v5341_v5 }
 0xe41   : > { %v3872_v37 = vpop.eup %3871 }
 0xe42   : > { %v3874_v3 = vpop.eup %3873  ;;  %v3379_v30 = vpack.c.bf16 %v3872_v37, %v3868_v4 }
 0xe43   : > { %v3377_v22 = vpack.c.bf16 %v3874_v3, %v3870_v39 }
 0xe45   : > { %3378 = vmatprep.subr.bf16.mxu0 %v3377_v22 }
 0xe46   : > { %3380 = vmatpush1.bf16.msra.mxu0 %v3379_v30 }
 0xe49   : > { %3150 = vmatmul.mubr.msk.f32.vlgmr.msra.gmra.mrb[96].mxu0 %vm632_vm1, %v5333_v7 }
 0xe4a   : > { %2412 = vmatprep.mubr.f32.mxu0 %v5658_v17 }
 0xe4d   : > { %3151 = vmatmul.mubr.msk.f32.gmra.mrb[98].mxu0 %vm632_vm1, %v5341_v5 }
 0xe4e   : > { %2418 = vmatprep.mubr.f32.mxu0 %v5658_v17 }
 0xe51   : > { %3152 = vmatmul.mubr.msk.f32.gmra.mrb[100].mxu0 %vm632_vm1, %v5349_v54 }
 0xe52   : > { %2424 = vmatprep.mubr.f32.mxu0 %v5658_v17 }
 0xe55   : > { %3153 = vmatmul.mubr.msk.f32.gmra.mrb[102].mxu0 %vm632_vm1, %v5357_v36 }
 0xe56   : > { %2712 = vmatprep.mubr.f32.mxu0 %v5658_v17 }
 0xf1c   : > { %v2408_v62 = vpop.f32.mrb[96].mxu0 }
 0xf1d   : > { %v2409_v14 = vadd.f32 %v2408_v62, %v5700_v45  ;;  %v2410_v40 = vpop.f32.mrb[97].mxu0 }
 0xf1e   : > { %v2411_v52 = vadd.f32 %v2410_v40, %v5700_v45 }
 0xf1f   : > { %v2495_v10 = vmul.f32 1.1428572, %v2409_v14  ;;  %v2906_v6 = vmul.f32 32.0, %v2409_v14 }
 0xf20   : > { %v2496_v48 = vmul.f32 1.1428572, %v2411_v52  ;;  %v2907_v4 = vmul.f32 32.0, %v2411_v52  ;;  %v2414_v39 = vpop.f32.mrb[98].mxu0 }
 0xf21   : > { %v2503_v37 = vadd.f32 %v2495_v10, %v5115_v29  ;;  %v5366_v3 = vadd.f32 %v2906_v6, %v5118_v19  ;;  %v2415_v30 = vadd.f32 %v2414_v39, %v4528_v9  ;;  %v2416_v22 = vpop.f32.mrb[99].mxu0 }
 0xf22   : > { %v2504_v36 = vadd.f32 %v2496_v48, %v5122_v33  ;;  %v5371_v62 = vadd.f32 %v2907_v4, %v5125_v60  ;;  %v2417_v40 = vadd.f32 %v2416_v22, %v4528_v9 }
 0xf23   : > { %v2497_v45 = vmul.f32 1.1428572, %v2415_v30  ;;  %v2908_v14 = vmul.f32 32.0, %v2415_v30  ;;  %3875 = vtanh.f32 %v2503_v37 }
 0xf24   : > { %v2498_v54 = vmul.f32 1.1428572, %v2417_v40  ;;  %v2909_v52 = vmul.f32 32.0, %v2417_v40  ;;  %v2420_v5 = vpop.f32.mrb[100].mxu0  ;;  %3877 = vtanh.f32 %v2504_v36 }
 0xf25   : > { %v2505_v29 = vadd.f32 %v2497_v45, %v5129_v23  ;;  %v5376_v19 = vadd.f32 %v2908_v14, %v5132_v63  ;;  %v2421_v10 = vadd.f32 %v2420_v5, %v5659_v51  ;;  %v2422_v6 = vpop.f32.mrb[101].mxu0 }
 0xf26   : > { %v2506_v33 = vadd.f32 %v2498_v54, %v5136_v53  ;;  %v5381_v60 = vadd.f32 %v2909_v52, %v5139_v21  ;;  %v2423_v48 = vadd.f32 %v2422_v6, %v5659_v51 }
 0xf27   : > { %3879 = vtanh.f32 %v2505_v29  ;;  %v2499_v4 = vmul.f32 1.1428572, %v2421_v10  ;;  %v2910_v39 = vmul.f32 32.0, %v2421_v10 }
 0xf28   : > { %3881 = vtanh.f32 %v2506_v33  ;;  %v2500_v37 = vmul.f32 1.1428572, %v2423_v48  ;;  %v2911_v23 = vmul.f32 32.0, %v2423_v48  ;;  %v2426_v45 = vpop.f32.mrb[102].mxu0 }
 0xf29   : > { %v2507_v63 = vadd.f32 %v2499_v4, %v5143_v20  ;;  %v5386_v5 = vadd.f32 %v2910_v39, %v5146_v31  ;;  %v2427_v36 = vadd.f32 %v2426_v45, %v5662_v55  ;;  %v2428_v53 = vpop.f32.mrb[103].mxu0 }
 0xf2a   : > { %v2508_v21 = vadd.f32 %v2500_v37, %v5150_v42  ;;  %v5391_v54 = vadd.f32 %v2911_v23, %v5153_v1  ;;  %v2429_v30 = vadd.f32 %v2428_v53, %v5662_v55 }
 0xf2b   : > { %v2501_v22 = vmul.f32 1.1428572, %v2427_v36  ;;  %v2912_v40 = vmul.f32 32.0, %v2427_v36  ;;  %3883 = vtanh.f32 %v2507_v63 }
 0xf2c   : > { %v2502_v14 = vmul.f32 1.1428572, %v2429_v30  ;;  %v2913_v52 = vmul.f32 32.0, %v2429_v30  ;;  %3885 = vtanh.f32 %v2508_v21 }
 0xf2d   : > { %v2509_v20 = vadd.f32 %v2501_v22, %v5159_v58  ;;  %v5396_v31 = vadd.f32 %v2912_v40, %v5162_v47  ;;  %v3876_v1 = vpop.eup %3875 }
 0xf2e   : > { %v2510_v29 = vadd.f32 %v2502_v14, %v5165_v12  ;;  %v5400_v42 = vadd.f32 %v2913_v52, %v5168_v43  ;;  %v3878_v10 = vpop.eup %3877 }
 0xf2f   : > { %3887 = vtanh.f32 %v2509_v20 }
 0xf30   : > { %3889 = vtanh.f32 %v2510_v29 }
 0xf31   : > { %v3880_v6 = vpop.eup %3879 }
 0xf32   : > { %v3882_v33 = vpop.eup %3881  ;;  %v3383_v48 = vpack.c.bf16 %v3880_v6, %v3876_v1 }
 0xf33   : > { %v3381_v4 = vpack.c.bf16 %v3882_v33, %v3878_v10 }
 0xf35   : > { %3382 = vmatprep.subr.bf16.mxu1 %v3381_v4  ;;  %v3884_v58 = vpop.eup %3883 }
 0xf36   : > { %3384 = vmatpush1.bf16.msra.mxu1 %v3383_v48  ;;  %v3886_v39 = vpop.eup %3885 }
 0xf39   : > { %v3888_v47 = vpop.eup %3887 }
 0xf3a   : > { %v3890_v37 = vpop.eup %3889  ;;  %v3387_v23 = vpack.c.bf16 %v3888_v47, %v3884_v58 }
 0xf3b   : > { %v3385_v45 = vpack.c.bf16 %v3890_v37, %v3886_v39 }
 0xf3d   : > { %3386 = vmatprep.subr.bf16.mxu1 %v3385_v45 }
 0xf3e   : > { %3388 = vmatpush1.bf16.msra.mxu1 %v3387_v23 }
 0xf41   : > { %3154 = vmatmul.mubr.msk.f32.vlgmr.msra.gmra.mrb[96].mxu1 %vm438_vm0, %v5173_v32 }
 0xf42   : > { %2589 = vmatprep.mubr.f32.mxu1 %v5658_v17 }
 0xf45   : > { %3155 = vmatmul.mubr.msk.f32.gmra.mrb[98].mxu1 %vm438_vm0, %v5181_v57 }
 0xf46   : > { %2595 = vmatprep.mubr.f32.mxu1 %v5658_v17 }
 0xf49   : > { %3156 = vmatmul.mubr.msk.f32.gmra.mrb[100].mxu1 %vm438_vm0, %v5189_v16 }
 0xf4a   : > { %2601 = vmatprep.mubr.f32.mxu1 %v5658_v17 }
 0xf4d   : > { %3157 = vmatmul.mubr.msk.f32.gmra.mrb[102].mxu1 %vm438_vm0, %v5197_v34 }
 0xf4e   : > { %2607 = vmatprep.mubr.f32.mxu1 %v5658_v17 }
 0xf51   : > { %3158 = vmatmul.mubr.msk.f32.gmra.mrb[104].mxu1 %vm438_vm0, %v5205_v38 }
 0xf52   : > { %2613 = vmatprep.mubr.f32.mxu1 %v5658_v17 }
 0xf55   : > { %3159 = vmatmul.mubr.msk.f32.gmra.mrb[106].mxu1 %vm438_vm0, %v5213_v35 }
 0xf56   : > { %2619 = vmatprep.mubr.f32.mxu1 %v5658_v17 }
 0xf59   : > { %3160 = vmatmul.mubr.msk.f32.gmra.mrb[108].mxu1 %vm438_vm0, %v5221_v13 }
 0xf5a   : > { %2625 = vmatprep.mubr.f32.mxu1 %v5658_v17 }
 0xf5d   : > { %3161 = vmatmul.mubr.msk.f32.gmra.mrb[110].mxu1 %vm438_vm0, %v5229_v2 }
 0xf5e   : > { %2847 = vmatprep.mubr.f32.mxu1 %v5658_v17 }
0x1014   : > { %v2585_v12 = vpop.f32.mrb[96].mxu1 }
0x1015   : > { %v2586_v43 = vadd.f32 %v2585_v12, %v5673_v56  ;;  %v2587_v32 = vpop.f32.mrb[97].mxu1 }
0x1016   : > { %v2588_v57 = vadd.f32 %v2587_v32, %v5673_v56 }
0x1017   : > { %3891 = vtanh.f32 %v2586_v43 }
0x1018   : > { %v2591_v16 = vpop.f32.mrb[98].mxu1  ;;  %3893 = vtanh.f32 %v2588_v57 }
0x1019   : > { %v2592_v34 = vadd.f32 %v2591_v16, %v5674_v15  ;;  %v2593_v38 = vpop.f32.mrb[99].mxu1 }
0x101a   : > { %v2594_v35 = vadd.f32 %v2593_v38, %v5674_v15 }
0x101b   : > { %3895 = vtanh.f32 %v2592_v34 }
0x101c   : > { %3897 = vtanh.f32 %v2594_v35  ;;  %v2597_v13 = vpop.f32.mrb[100].mxu1 }
0x101d   : > { %v2598_v2 = vadd.f32 %v2597_v13, %v5675_v24  ;;  %v2599_v63 = vpop.f32.mrb[101].mxu1 }
0x101e   : > { %v2600_v36 = vadd.f32 %v2599_v63, %v5675_v24 }
0x101f   : > { %3899 = vtanh.f32 %v2598_v2 }
0x1020   : > { %v2603_v53 = vpop.f32.mrb[102].mxu1  ;;  %3901 = vtanh.f32 %v2600_v36 }
0x1021   : > { %v2604_v56 = vadd.f32 %v2603_v53, %v5676_v61  ;;  %v2605_v21 = vpop.f32.mrb[103].mxu1  ;;  %v3892_v22 = vpop.eup %3891 }
0x1022   : > { %v2606_v30 = vadd.f32 %v2605_v21, %v5676_v61  ;;  %v3894_v40 = vpop.eup %3893 }
0x1023   : > { %3903 = vtanh.f32 %v2604_v56 }
0x1024   : > { %3905 = vtanh.f32 %v2606_v30  ;;  %v2609_v15 = vpop.f32.mrb[104].mxu1 }
0x1025   : > { %v3896_v14 = vpop.eup %3895  ;;  %v2610_v52 = vadd.f32 %v2609_v15, %v4375_v25  ;;  %v2611_v20 = vpop.f32.mrb[105].mxu1 }
0x1026   : > { %v3898_v29 = vpop.eup %3897  ;;  %v2612_v24 = vadd.f32 %v2611_v20, %v4375_v25  ;;  %v3391_v1 = vpack.c.bf16 %v3896_v14, %v3892_v22 }
0x1027   : > { %v3389_v10 = vpack.c.bf16 %v3898_v29, %v3894_v40  ;;  %3907 = vtanh.f32 %v2610_v52 }
0x1028   : > { %v2615_v6 = vpop.f32.mrb[106].mxu1  ;;  %3909 = vtanh.f32 %v2612_v24  ;;  %v5704_v24 = vld [vmem:[#allocation15_spill] sm:$0xff] }
0x1029   : > { %v2616_v33 = vadd.f32 %v2615_v6, %v5677_v50  ;;  %v2617_v48 = vpop.f32.mrb[107].mxu1  ;;  %3390 = vmatprep.subr.bf16.mxu0 %v3389_v10  ;;  %v3900_v4 = vpop.eup %3899 }
0x102a   : > { %v2618_v61 = vadd.f32 %v2617_v48, %v5677_v50  ;;  %3392 = vmatpush1.bf16.msra.mxu0 %v3391_v1  ;;  %v3902_v58 = vpop.eup %3901 }
0x102b   : > { %3911 = vtanh.f32 %v2616_v33 }
0x102c   : > { %3913 = vtanh.f32 %v2618_v61  ;;  %v2621_v39 = vpop.f32.mrb[108].mxu1 }
0x102d   : > { %v3904_v47 = vpop.eup %3903  ;;  %v2622_v25 = vadd.f32 %v2621_v39, %v4383_v41  ;;  %v2623_v37 = vpop.f32.mrb[109].mxu1 }
0x102e   : > { %v3906_v23 = vpop.eup %3905  ;;  %v2624_v45 = vadd.f32 %v2623_v37, %v4383_v41  ;;  %v3395_v12 = vpack.c.bf16 %v3904_v47, %v3900_v4 }
0x102f   : > { %v3393_v43 = vpack.c.bf16 %v3906_v23, %v3902_v58  ;;  %3915 = vtanh.f32 %v2622_v25  ;;  %v5705_v58 = vld [vmem:[#allocation16_spill] sm:$0xff] }
0x1030   : > { %v2627_v32 = vpop.f32.mrb[110].mxu1  ;;  %3917 = vtanh.f32 %v2624_v45 }
0x1031   : > { %v2628_v57 = vadd.f32 %v2627_v32, %v4387_v59  ;;  %v2629_v50 = vpop.f32.mrb[111].mxu1  ;;  %3394 = vmatprep.subr.bf16.mxu0 %v3393_v43  ;;  %v3908_v34 = vpop.eup %3907  ;;  %v5706_v43 = vld [vmem:[#allocation17_spill] sm:$0xff] }
0x1032   : > { %v2630_v16 = vadd.f32 %v2629_v50, %v4387_v59  ;;  %3396 = vmatpush1.bf16.msra.mxu0 %v3395_v12  ;;  %v3910_v38 = vpop.eup %3909 }
0x1033   : > { %3919 = vtanh.f32 %v2628_v57 }
0x1034   : > { %3921 = vtanh.f32 %v2630_v16 }
0x1035   : > { %v3912_v35 = vpop.eup %3911 }
0x1036   : > { %v3914_v13 = vpop.eup %3913  ;;  %v3399_v2 = vpack.c.bf16 %v3912_v35, %v3908_v34 }
0x1037   : > { %v3397_v41 = vpack.c.bf16 %v3914_v13, %v3910_v38 }
0x1039   : > { %3398 = vmatprep.subr.bf16.mxu0 %v3397_v41  ;;  %v3916_v63 = vpop.eup %3915 }
0x103a   : > { %3400 = vmatpush1.bf16.msra.mxu0 %v3399_v2  ;;  %v3918_v36 = vpop.eup %3917 }
0x103d   : > { %v3920_v53 = vpop.eup %3919 }
0x103e   : > { %v3922_v56 = vpop.eup %3921  ;;  %v3403_v21 = vpack.c.bf16 %v3920_v53, %v3916_v63 }
0x103f   : > { %v3401_v30 = vpack.c.bf16 %v3922_v56, %v3918_v36 }
0x1041   : > { %3402 = vmatprep.subr.bf16.mxu0 %v3401_v30 }
0x1042   : > { %3404 = vmatpush1.bf16.msra.mxu0 %v3403_v21 }
0x1045   : > { %3162 = vmatmul.mubr.msk.f32.vlgmr.msra.gmra.mrb[104].mxu0 %vm632_vm1, %v5253_v44  ;;  %v5701_v44 = vld [vmem:[#allocation12_spill] sm:$0xff] }
0x1046   : > { %2718 = vmatprep.mubr.f32.mxu0 %v5658_v17 }
0x1049   : > { %3163 = vmatmul.mubr.msk.f32.gmra.mrb[106].mxu0 %vm632_vm1, %v5261_v28 }
0x104a   : > { %2724 = vmatprep.mubr.f32.mxu0 %v5658_v17 }
0x104d   : > { %3164 = vmatmul.mubr.msk.f32.gmra.mrb[108].mxu0 %vm632_vm1, %v5269_v8 }
0x104e   : > { %2730 = vmatprep.mubr.f32.mxu0 %v5658_v17 }
0x1051   : > { %3165 = vmatmul.mubr.msk.f32.gmra.mrb[110].mxu0 %vm632_vm1, %v5277_v11 }
0x1052   : > { %2736 = vmatprep.mubr.f32.mxu0 %v5658_v17 }
0x1055   : > { %3166 = vmatmul.mubr.msk.f32.gmra.mrb[112].mxu0 %vm632_vm1, %v5285_v18 }
0x1056   : > { %2742 = vmatprep.mubr.f32.mxu0 %v5658_v17 }
0x1059   : > { %3167 = vmatmul.mubr.msk.f32.gmra.mrb[114].mxu0 %vm632_vm1, %v5293_v49  ;;  %v5702_v49 = vld [vmem:[#allocation13_spill] sm:$0xff] }
0x105a   : > { %2748 = vmatprep.mubr.f32.mxu0 %v5658_v17 }
0x105d   : > { %3168 = vmatmul.mubr.msk.f32.gmra.mrb[116].mxu0 %vm632_vm1, %v5301_v26 }
0x105e   : > { %2754 = vmatprep.mubr.f32.mxu0 %v5658_v17 }
0x1061   : > { %3169 = vmatmul.mubr.msk.f32.gmra.mrb[118].mxu0 %vm632_vm1, %v5309_v27  ;;  %v5703_v27 = vld [vmem:[#allocation14_spill] sm:$0xff] }
0x1062   : > { %2841 = vmatprep.mubr.f32.mxu0 %v5658_v17 }
0x1118   : > { %v2714_v59 = vpop.f32.mrb[104].mxu0 }
0x1119   : > { %v2715_v28 = vadd.f32 %v2714_v59, %v5701_v44  ;;  %v2716_v8 = vpop.f32.mrb[105].mxu0 }
0x111a   : > { %v2717_v11 = vadd.f32 %v2716_v8, %v5701_v44 }
0x111b   : > { %3923 = vtanh.f32 %v2715_v28 }
0x111c   : > { %v2720_v18 = vpop.f32.mrb[106].mxu0  ;;  %3925 = vtanh.f32 %v2717_v11 }
0x111d   : > { %v2721_v22 = vadd.f32 %v2720_v18, %v5702_v49  ;;  %v2722_v40 = vpop.f32.mrb[107].mxu0 }
0x111e   : > { %v2723_v26 = vadd.f32 %v2722_v40, %v5702_v49 }
0x111f   : > { %3927 = vtanh.f32 %v2721_v22 }
0x1120   : > { %3929 = vtanh.f32 %v2723_v26  ;;  %v2726_v15 = vpop.f32.mrb[108].mxu0 }
0x1121   : > { %v2727_v14 = vadd.f32 %v2726_v15, %v5703_v27  ;;  %v2728_v52 = vpop.f32.mrb[109].mxu0 }
0x1122   : > { %v2729_v20 = vadd.f32 %v2728_v52, %v5703_v27  ;;  %v5707_v27 = vld [vmem:[#allocation24_spill] sm:$0xff]  ;;  %v5709_v52 = vld [vmem:[#allocation7_spill] sm:$0xff] }
0x1123   : > { %3931 = vtanh.f32 %v2727_v14  ;;  %v5708_v14 = vld [vmem:[#allocation26_spill] sm:$0xff] }
0x1124   : > { %v2732_v29 = vpop.f32.mrb[110].mxu0  ;;  %3933 = vtanh.f32 %v2729_v20 }
0x1125   : > { %v2733_v1 = vadd.f32 %v2732_v29, %v5704_v24  ;;  %v2734_v10 = vpop.f32.mrb[111].mxu0  ;;  %v3924_v33 = vpop.eup %3923 }
0x1126   : > { %v2735_v6 = vadd.f32 %v2734_v10, %v5704_v24  ;;  %v3926_v48 = vpop.eup %3925  ;;  %v5710_v24 = vld [vmem:[#allocation19_spill] sm:$0xff] }
0x1127   : > { %3935 = vtanh.f32 %v2733_v1 }
0x1128   : > { %3937 = vtanh.f32 %v2735_v6  ;;  %v2738_v61 = vpop.f32.mrb[112].mxu0 }
0x1129   : > { %v3928_v4 = vpop.eup %3927  ;;  %v2739_v39 = vadd.f32 %v2738_v61, %v5705_v58  ;;  %v2740_v47 = vpop.f32.mrb[113].mxu0 }
0x112a   : > { %v3930_v25 = vpop.eup %3929  ;;  %v2741_v37 = vadd.f32 %v2740_v47, %v5705_v58  ;;  %v3407_v23 = vpack.c.bf16 %v3928_v4, %v3924_v33  ;;  %v2938_v58 = vstv %s389_s20 }
0x112b   : > { %v3405_v45 = vpack.c.bf16 %v3930_v25, %v3926_v48  ;;  %3939 = vtanh.f32 %v2739_v39 }
0x112c   : > { %v2744_v12 = vpop.f32.mrb[114].mxu0  ;;  %3941 = vtanh.f32 %v2741_v37 }
0x112d   : > { %v2745_v32 = vadd.f32 %v2744_v12, %v5706_v43  ;;  %v2746_v57 = vpop.f32.mrb[115].mxu0  ;;  %3406 = vmatprep.subr.bf16.mxu0 %v3405_v45  ;;  %3421 = vmatprep.subr.bf16.mxu1 %v3405_v45  ;;  %v3932_v16 = vpop.eup %3931 }
0x112e   : > { %v2747_v50 = vadd.f32 %v2746_v57, %v5706_v43  ;;  %3408 = vmatpush1.bf16.msra.mxu0 %v3407_v23  ;;  %3425 = vmatpush1.bf16.msra.mxu1 %v3407_v23  ;;  %v3934_v34 = vpop.eup %3933 }
0x112f   : > { %3943 = vtanh.f32 %v2745_v32 }
0x1130   : > { %3945 = vtanh.f32 %v2747_v50  ;;  %v2750_v38 = vpop.f32.mrb[116].mxu0 }
0x1131   : > { %v3936_v35 = vpop.eup %3935  ;;  %v2751_v13 = vadd.f32 %v2750_v38, %v4479_v46  ;;  %v2752_v2 = vpop.f32.mrb[117].mxu0 }
0x1132   : > { %v3938_v41 = vpop.eup %3937  ;;  %v2753_v63 = vadd.f32 %v2752_v2, %v4479_v46  ;;  %v3411_v36 = vpack.c.bf16 %v3936_v35, %v3932_v16 }
0x1133   : > { %v3409_v53 = vpack.c.bf16 %v3938_v41, %v3934_v34  ;;  %3947 = vtanh.f32 %v2751_v13  ;;  %v4012_v13 = vld [vmem:[%s4204_s11 + $0x10] sm:$0xff] }
0x1134   : > { %v2756_v56 = vpop.f32.mrb[118].mxu0  ;;  %3949 = vtanh.f32 %v2753_v63 }
0x1135   : > { %v2757_v21 = vadd.f32 %v2756_v56, %v5696_v0  ;;  %v2758_v30 = vpop.f32.mrb[119].mxu0  ;;  %3410 = vmatprep.subr.bf16.mxu0 %v3409_v53  ;;  %3422 = vmatprep.subr.bf16.mxu1 %v3409_v53  ;;  %v3940_v44 = vpop.eup %3939 }
0x1136   : > { %v2759_v59 = vadd.f32 %v2758_v30, %v5696_v0  ;;  %3412 = vmatpush1.bf16.msra.mxu0 %v3411_v36  ;;  %3426 = vmatpush1.bf16.msra.mxu1 %v3411_v36  ;;  %v3942_v28 = vpop.eup %3941  ;;  %v4014_v36 = vld [vmem:[%s4204_s11 + $0x18] sm:$0xff] }
0x1137   : > { %3951 = vtanh.f32 %v2757_v21 }
0x1138   : > { %3953 = vtanh.f32 %v2759_v59 }
0x1139   : > { %v3944_v8 = vpop.eup %3943 }
0x113a   : > { %v3946_v46 = vpop.eup %3945  ;;  %v3415_v11 = vpack.c.bf16 %v3944_v8, %v3940_v44 }
0x113b   : > { %v3413_v18 = vpack.c.bf16 %v3946_v46, %v3942_v28  ;;  %v4015_v28 = vld [vmem:[%s4204_s11 + $0x20] sm:$0xff] }
0x113d   : > { %3414 = vmatprep.subr.bf16.mxu0 %v3413_v18  ;;  %3423 = vmatprep.subr.bf16.mxu1 %v3413_v18  ;;  %v3948_v49 = vpop.eup %3947 }
0x113e   : > { %3416 = vmatpush1.bf16.msra.mxu0 %v3415_v11  ;;  %3427 = vmatpush1.bf16.msra.mxu1 %v3415_v11  ;;  %v3950_v22 = vpop.eup %3949 }
0x1141   : > { %v3952_v40 = vpop.eup %3951 }
0x1142   : > { %v3954_v26 = vpop.eup %3953  ;;  %v3419_v15 = vpack.c.bf16 %v3952_v40, %v3948_v49  ;;  %v4018_v40 = vld [vmem:[%s4204_s11 + $0x38] sm:$0xff] }
0x1143   : > { %v3417_v0 = vpack.c.bf16 %v3954_v26, %v3950_v22  ;;  %v4017_v22 = vld [vmem:[%s4204_s11 + $0x30] sm:$0xff] }
0x1145   : > { %3418 = vmatprep.subr.bf16.mxu0 %v3417_v0  ;;  %3424 = vmatprep.subr.bf16.mxu1 %v3417_v0 }
0x1146   : > { %3420 = vmatpush1.bf16.msra.mxu0 %v3419_v15  ;;  %3428 = vmatpush1.bf16.msra.mxu1 %v3419_v15 }
0x1149   : > { %3170 = vmatmul.mubr.msk.f32.vlgmr.msra.gmra.mrb[120].mxu0 %vm632_vm1, %v5333_v7  ;;  %3171 = vmatmul.mubr.msk.f32.vlgmr.msra.gmra.mrb[112].mxu1 %vm632_vm1, %v5707_v27 }
0x114a   : > { %2853 = vmatprep.mubr.f32.mxu1 %v5658_v17 }
0x114d   : > { %3172 = vmatmul.mubr.msk.f32.gmra.mrb[114].mxu1 %vm632_vm1, %v5708_v14 }
0x114e   : > { %2859 = vmatprep.mubr.f32.mxu1 %v5658_v17 }
0x1151   : > { %3173 = vmatmul.mubr.msk.f32.gmra.mrb[116].mxu1 %vm632_vm1, %v5709_v52 }
0x121c   : > { %v2843_v20 = vpop.f32.mrb[120].mxu0  ;;  %v2849_v29 = vpop.f32.mrb[112].mxu1 }
0x121d   : > { %v2844_v1 = vadd.f32 %v2843_v20, %v5710_v24  ;;  %v2850_v7 = vadd.f32 %v2849_v29, %v4528_v9  ;;  %v2845_v10 = vpop.f32.mrb[121].mxu0  ;;  %v2851_v6 = vpop.f32.mrb[113].mxu1 }
0x121e   : > { %v2846_v33 = vadd.f32 %v2845_v10, %v5710_v24  ;;  %v2852_v48 = vadd.f32 %v2851_v6, %v4528_v9 }
0x121f   : > { %v2922_v61 = vmul.f32 7.0, %v2844_v1  ;;  %v2924_v4 = vmul.f32 7.0, %v2850_v7 }
0x1220   : > { %v2923_v17 = vmul.f32 7.0, %v2846_v33  ;;  %v2925_v39 = vmul.f32 7.0, %v2852_v48  ;;  %v2855_v47 = vpop.f32.mrb[114].mxu1 }
0x1221   : > { %v2930_v25 = vadd.f32 %v2922_v61, %v5366_v3  ;;  %v2932_v37 = vadd.f32 %v2924_v4, %v5376_v19  ;;  %v2856_v23 = vadd.f32 %v2855_v47, %v5659_v51  ;;  %v2857_v45 = vpop.f32.mrb[115].mxu1  ;;  %v4011_v19 = vld [vmem:[%s4204_s11] sm:$0xff] }
0x1222   : > { %v2931_v12 = vadd.f32 %v2923_v17, %v5371_v62  ;;  %v2933_v43 = vadd.f32 %v2925_v39, %v5381_v60  ;;  %v2858_v9 = vadd.f32 %v2857_v45, %v5659_v51  ;;  %v4013_v51 = vld [vmem:[%s4204_s11 + $0x8] sm:$0xff] }
0x1223   : > { %v2939_v32 = vmul.f32 %v2938_v58, %v2930_v25  ;;  %v2941_v57 = vmul.f32 %v2938_v58, %v2932_v37  ;;  %v2926_v50 = vmul.f32 7.0, %v2856_v23 }
0x1224   : > { %v2940_v16 = vmul.f32 %v2938_v58, %v2931_v12  ;;  %v2942_v34 = vmul.f32 %v2938_v58, %v2933_v43  ;;  %v2927_v3 = vmul.f32 7.0, %v2858_v9  ;;  %v2861_v38 = vpop.f32.mrb[116].mxu1 }
0x1225   : > { %v2947_v35 = vadd.f32 %v4011_v19, %v2939_v32  ;;  %v2949_v2 = vadd.f32 %v4012_v13, %v2941_v57  ;;  %v2934_v62 = vadd.f32 %v2926_v50, %v5386_v5  ;;  %v2862_v60 = vadd.f32 %v2861_v38, %v5662_v55  ;;  %v2863_v41 = vpop.f32.mrb[117].mxu1 }
0x1226   : > { %v2948_v63 = vadd.f32 %v4013_v51, %v2940_v16  ;;  %v2950_v53 = vadd.f32 %v4014_v36, %v2942_v34  ;;  %v2935_v56 = vadd.f32 %v2927_v3, %v5391_v54  ;;  %v2864_v21 = vadd.f32 %v2863_v41, %v5662_v55  ;;  %v4016_v54 = vld [vmem:[%s4204_s11 + $0x28] sm:$0xff] }
0x1227   : > { %2955 = vst [vmem:[%s338_s21] sm:$0xff] %v2947_v35  ;;  %2957 = vst [vmem:[%s338_s21 + $0x10] sm:$0xff] %v2949_v2  ;;  %v2943_v30 = vmul.f32 %v2938_v58, %v2934_v62  ;;  %v2928_v59 = vmul.f32 7.0, %v2862_v60 }
0x1228   : > { %2956 = vst [vmem:[%s338_s21 + $0x8] sm:$0xff] %v2948_v63  ;;  %2958 = vst [vmem:[%s338_s21 + $0x18] sm:$0xff] %v2950_v53  ;;  %v2944_v5 = vmul.f32 %v2938_v58, %v2935_v56  ;;  %v2929_v44 = vmul.f32 7.0, %v2864_v21 }
0x1229   : > { %v2951_v8 = vadd.f32 %v4015_v28, %v2943_v30  ;;  %v2936_v46 = vadd.f32 %v2928_v59, %v5396_v31 }
0x122a   : > { %v2952_v55 = vadd.f32 %v4016_v54, %v2944_v5  ;;  %v2937_v11 = vadd.f32 %v2929_v44, %v5400_v42 }
0x122b   : > { %2959 = vst [vmem:[%s338_s21 + $0x20] sm:$0xff] %v2951_v8  ;;  %v2945_v18 = vmul.f32 %v2938_v58, %v2936_v46 }
0x122c   : > { %2960 = vst [vmem:[%s338_s21 + $0x28] sm:$0xff] %v2952_v55  ;;  %v2946_v49 = vmul.f32 %v2938_v58, %v2937_v11 }
0x122d   : > { %v2953_v31 = vadd.f32 %v4017_v22, %v2945_v18 }
0x122e   : > { %v2954_v42 = vadd.f32 %v4018_v40, %v2946_v49 }
0x122f   : > { %2961 = vst [vmem:[%s338_s21 + $0x30] sm:$0xff] %v2953_v31 }
0x1230   : > { %2962 = vst [vmem:[%s338_s21 + $0x38] sm:$0xff] %v2954_v42 }
0x1231   : > { %4032 = shalt.err (!%p4029_p5)
}
0x1232   : > { %s4033_s25 = scalar_lea.hbm %s5520_s27, 1024  ;;  %s4037_s20 = scalar_lea.hbm %s5578_s8, 2048 }
0x1233   : > { %p4034_p7 = scmp.ne.s32.totalorder %s5520_s27, %s4033_s25  ;;  %p4038_p12 = scmp.lt.u32.totalorder %s5520_s27, %s5578_s8 }
0x1234   : > { %p4039_p13 = scmp.lt.u32.totalorder %s4037_s20, %s4033_s25  ;;  %p4041_p1 = scmp.lt.u32.totalorder %s4033_s25, %s5520_s27 }
0x1235   : > { %p4035_p10 = pnand %p4034_p7, %p4175_p6 }
0x1236   : > { %p4040_p0 = por %p4039_p13, %p4038_p12 }
0x1237   : > { %p4036_p11 = pneg %p4035_p10 }
0x1238   : > { %p4042_p2 = por %p4041_p1, %p4040_p0 }
0x123a   : > { %p4043_p3 = pnand %p4042_p2, %p4036_p11 }
0x123c   : > { %4046 = shalt.err (!%p4043_p3)
}
0x123d   : > { %s4086_s23 = smov 256   ;;  %s4087_s24 = smov 512  }
0x123e   : > { %s4088_s28 = smov 16  }
0x123f   : > { %3429 = dma.vmem_to_hbm [thread:$0]  (%p4175_p6), %s5523_s26, 1024, %s5520_s27, %s5528_s0, %s4086_s23, %s4087_s24, %s4088_s28  }
0x1240 PF: > { %s2992_s13 = sand.u32 1, %s4069_s29   ;;  %p3432_p4 = pnand %p3047_p9, %p4179_p8 }
0x1241   : > { %s2993_s14 = scalar_lea.sflag [#allocation5], %s2992_s13 }
0x1242   : > { %4064 = dma.done.wait (!%p3432_p4), %s2993_s14, 1024  }
0x1243   : > { %4066 = vsyncadd (!%p3432_p4), %s2993_s14, 4294966272  ;;  %p19_p5 = scmp.ge.s32.totalorder %s4160_s12, 4   ;;  %s5711_s29 = smov %s4073_s30 }
0x1244   : > { %s5712_s30 = smov %s4077_s9  ;;  %s5713_s9 = smov %s4173_s15 }
0x1245   : > { %s5714_s10 = smov %s4160_s12  ;;  %21 = sbr.rel (!%p19_p5) target bundleno = 5 (0x5), region = 115 }
0x124c   :  { %2998 = vsyncpa [#allocation5], 1 }
0x124d   :  { %3000 = vsyncpa [#allocation5 + $0x1], 1 }

</bundles_post_ra>
